<compile_context>
chip_gen: v6e
topology: v6e:2x2x1
jax: 0.10.0
libtpu: 0.0.40
codegen_flags: <defaults>
</compile_context>

<pallas_src>
import functools

import jax
import jax.numpy as jnp
from jax import lax
from jax.experimental import pallas as pl
from jax.experimental.pallas import tpu as pltpu

EPS = 1e-5  # PyTorch BatchNorm2d default eps


def _conv3x3_bn_stats_kernel(x_ref, scale_ref, bias_ref, w_ref,
                             y_ref, stats_ref, pad_ref,
                             *, h, w, cin, cout, fuse_bn_relu):
    """One image: [optional BN-apply+ReLU] -> replicate-pad -> 3x3 conv.

    Also emits per-image partial BatchNorm statistics (sum, sum of squares)
    of the f32 conv output so the batch grid axis stays parallel.
    """
    a = x_ref[0]                                        # (h*w, cin) f32
    if fuse_bn_relu:
        # Folded BN of the *previous* layer + ReLU (per-channel FMA).
        a = jnp.maximum(a * scale_ref[...] + bias_ref[...], 0.0)
    a3 = a.reshape(h, w, cin).astype(jnp.bfloat16)

    # Replicate ('edge') padding of 1 on H and W into a bf16 VMEM scratch:
    # interior store + 2 row copies + 2 column copies (corners via columns).
    pad_ref[1:h + 1, 1:w + 1, :] = a3
    pad_ref[0:1, 1:w + 1, :] = a3[0:1]
    pad_ref[h + 1:h + 2, 1:w + 1, :] = a3[h - 1:h]
    pad_ref[:, 0:1, :] = pad_ref[:, 1:2, :]
    pad_ref[:, w + 1:w + 2, :] = pad_ref[:, w:w + 1, :]

    # 3x3 conv = nine accumulating bf16 matmuls with f32 accumulation
    # (no materialized im2col patch slab).
    acc = jnp.zeros((h * w, cout), jnp.float32)
    for dy in range(3):
        for dx in range(3):
            tap = pad_ref[dy:dy + h, dx:dx + w, :].reshape(h * w, cin)
            acc = acc + jnp.dot(tap, w_ref[dy * 3 + dx],
                                preferred_element_type=jnp.float32)

    y_ref[0] = acc
    s = jnp.sum(acc, axis=0, keepdims=True)             # (1, cout)
    ss = jnp.sum(acc * acc, axis=0, keepdims=True)      # (1, cout)
    stats_ref[0] = jnp.concatenate([s, ss], axis=0)     # (2, cout)


def _bn_residual_relu_kernel(y_ref, scale_ref, bias_ref, res_ref, o_ref):
    """Lane-dense BN2-apply + identity residual + ReLU on (h, w*C) slabs."""
    y = y_ref[0]                                        # (h, w*c) f32
    o_ref[0] = jnp.maximum(y * scale_ref[...] + bias_ref[...] + res_ref[0],
                           0.0)


def _conv3x3_bn_stats(x, scale, bias, wt, *, n, h, w, cin, cout,
                      fuse_bn_relu):
    kernel = functools.partial(_conv3x3_bn_stats_kernel,
                               h=h, w=w, cin=cin, cout=cout,
                               fuse_bn_relu=fuse_bn_relu)
    return pl.pallas_call(
        kernel,
        out_shape=(jax.ShapeDtypeStruct((n, h * w, cout), jnp.float32),
                   jax.ShapeDtypeStruct((n, 2, cout), jnp.float32)),
        grid=(n,),
        in_specs=[pl.BlockSpec((1, h * w, cin), lambda i: (i, 0, 0)),
                  pl.BlockSpec((1, cin), lambda i: (0, 0)),
                  pl.BlockSpec((1, cin), lambda i: (0, 0)),
                  pl.BlockSpec((9, cin, cout), lambda i: (0, 0, 0))],
        out_specs=(pl.BlockSpec((1, h * w, cout), lambda i: (i, 0, 0)),
                   pl.BlockSpec((1, 2, cout), lambda i: (i, 0, 0))),
        scratch_shapes=[pltpu.VMEM((h + 2, w + 2, cin), jnp.bfloat16)],
        compiler_params=pltpu.CompilerParams(
            dimension_semantics=("parallel",)),
    )(x, scale, bias, wt)


def _bn_scale_bias(stats, gamma, beta, m):
    """Fold training-mode BatchNorm2d (biased batch variance) into scale/bias.

    Note: single-pass variance (ss/m - mean^2) is cancellation-prone when
    |mean| >> std; clamp at 0 before adding eps.
    """
    s = jnp.sum(stats[:, 0, :], axis=0, keepdims=True)
    ss = jnp.sum(stats[:, 1, :], axis=0, keepdims=True)
    mean = s / m
    var = jnp.maximum(ss / m - mean * mean, 0.0)
    scale = gamma * lax.rsqrt(var + EPS)
    bias = beta - mean * scale
    return scale, bias


def basic_block_forward(x_nchw, params):
    """x_nchw: (N, Cin, H, W) float32. Returns (N, Cout, H, W) float32."""
    w1, g1, b1, w2, g2, b2 = params
    n, cin, h, w = x_nchw.shape
    c1 = w1.shape[-1]
    c2 = w2.shape[-1]
    assert cin == c2, "identity residual requires inplanes == expansion*planes"

    m = n * h * w
    x_nhwc = jnp.transpose(x_nchw, (0, 2, 3, 1)).astype(jnp.float32)
    x_rows = x_nhwc.reshape(n, h * w, cin)               # free reshape

    # Conv weights as 9 bf16 (Cin, Cout) taps; BN affine params as (1, C) f32.
    w1t = w1.reshape(9, cin, c1).astype(jnp.bfloat16)
    w2t = w2.reshape(9, c1, c2).astype(jnp.bfloat16)
    ones = jnp.ones((1, cin), jnp.float32)
    zeros = jnp.zeros((1, cin), jnp.float32)

    # Pass 1: conv1 + per-image BN1 partial stats.
    y1, st1 = _conv3x3_bn_stats(x_rows, ones, zeros, w1t, n=n, h=h, w=w,
                                cin=cin, cout=c1, fuse_bn_relu=False)
    scale1, bias1 = _bn_scale_bias(st1, g1.reshape(1, c1), b1.reshape(1, c1),
                                   m)

    # Pass 2: BN1-apply + ReLU + conv2 + per-image BN2 partial stats.
    y2, st2 = _conv3x3_bn_stats(y1, scale1, bias1, w2t, n=n, h=h, w=w,
                                cin=c1, cout=c2, fuse_bn_relu=True)
    scale2, bias2 = _bn_scale_bias(st2, g2.reshape(1, c2), b2.reshape(1, c2),
                                   m)

    # Pass 3: BN2-apply + identity residual + ReLU, lane-dense (h, w*C) view.
    y2_l = y2.reshape(n, h, w * c2)                      # free reshape
    res_l = x_nhwc.reshape(n, h, w * c2)                 # free reshape
    scale2_t = jnp.tile(scale2, (1, w))                  # (1, w*c2)
    bias2_t = jnp.tile(bias2, (1, w))
    out = pl.pallas_call(
        _bn_residual_relu_kernel,
        out_shape=jax.ShapeDtypeStruct((n, h, w * c2), jnp.float32),
        grid=(n,),
        in_specs=[pl.BlockSpec((1, h, w * c2), lambda i: (i, 0, 0)),
                  pl.BlockSpec((1, w * c2), lambda i: (0, 0)),
                  pl.BlockSpec((1, w * c2), lambda i: (0, 0)),
                  pl.BlockSpec((1, h, w * c2), lambda i: (i, 0, 0))],
        out_specs=pl.BlockSpec((1, h, w * c2), lambda i: (i, 0, 0)),
        compiler_params=pltpu.CompilerParams(
            dimension_semantics=("parallel",)),
    )(y2_l, scale2_t, bias2_t, res_l)

    return jnp.transpose(out.reshape(n, h, w, c2), (0, 3, 1, 2))


def reference_forward(x_nchw, params):
    """Pure-JAX f32 reference (lax.conv) for correctness checking."""
    w1, g1, b1, w2, g2, b2 = params
    x = jnp.transpose(x_nchw, (0, 2, 3, 1))

    def conv(y, wt):
        yp = jnp.pad(y, ((0, 0), (1, 1), (1, 1), (0, 0)), mode="edge")
        return lax.conv_general_dilated(
            yp, wt, (1, 1), "VALID",
            dimension_numbers=("NHWC", "HWIO", "NHWC"))

    def bn(y, g, b):
        mean = jnp.mean(y, axis=(0, 1, 2), keepdims=True)
        var = jnp.mean((y - mean) ** 2, axis=(0, 1, 2), keepdims=True)
        return (y - mean) * lax.rsqrt(var + EPS) * g + b

    out = jnp.maximum(bn(conv(x, w1), g1, b1), 0.)
    out = bn(conv(out, w2), g2, b2)
    out = jnp.maximum(out + x, 0.)
    return jnp.transpose(out, (0, 3, 1, 2))


def make_params(key, inplanes, planes, expansion=1):
    """Deterministic synthetic parameters (shapes from BasicBlock.__init__)."""
    k1, k2 = jax.random.split(key)
    c1 = planes
    c2 = expansion * planes
    w1 = 0.1 * jax.random.normal(k1, (3, 3, inplanes, c1), jnp.float32)  # conv1
    w2 = 0.1 * jax.random.normal(k2, (3, 3, c1, c2), jnp.float32)        # conv2
    g1 = jnp.ones((1, 1, 1, c1), jnp.float32)   # bn1 gamma
    b1 = jnp.zeros((1, 1, 1, c1), jnp.float32)  # bn1 beta
    g2 = jnp.ones((1, 1, 1, c2), jnp.float32)   # bn2 gamma
    b2 = jnp.zeros((1, 1, 1, c2), jnp.float32)  # bn2 beta
    return (w1, g1, b1, w2, g2, b2)


if __name__ == "__main__":
    key = jax.random.PRNGKey(0)

    def run_case(case_key, n, c, hh, ww):
        kx, kp = jax.random.split(case_key)
        x = jax.random.normal(kx, (n, c, hh, ww), jnp.float32)
        params = make_params(kp, inplanes=c, planes=c, expansion=1)
        out = jax.block_until_ready(basic_block_forward(x, params))
        ref = jax.block_until_ready(reference_forward(x, params))
        assert out.shape == (n, c, hh, ww)
        max_err = float(jnp.max(jnp.abs(out - ref)))
        # bf16 matmul operands (f32 accumulation) vs f32 reference -> ~1e-3
        # level differences; tolerance chosen accordingly.
        assert jnp.allclose(out, ref, atol=3e-2, rtol=3e-2), max_err

    k1, k2 = jax.random.split(key)
    run_case(k1, 2, 8, 16, 16)   # w*c2 = 128 (full-lane elementwise path)
    run_case(k2, 2, 4, 16, 16)   # w*c2 = 64  (smaller-channel path)
    print("KERNEL_OK")
</pallas_src>

<mosaic_0001>
module attributes {stable_mosaic.version = 11 : i64} {
  func.func @_conv3x3_bn_stats_kernel(%arg0: i32, %arg1: memref<1x256x8xf32, #tpu.memory_space<vmem>>, %arg2: memref<1x8xf32, #tpu.memory_space<vmem>>, %arg3: memref<1x8xf32, #tpu.memory_space<vmem>>, %arg4: memref<9x8x8xbf16, #tpu.memory_space<vmem>>, %arg5: memref<1x256x8xf32, #tpu.memory_space<vmem>>, %arg6: memref<1x2x8xf32, #tpu.memory_space<vmem>>, %arg7: memref<18x18x8xbf16, #tpu.memory_space<vmem>>) attributes {dimension_semantics = [#tpu.dimension_semantics<parallel>], iteration_bounds = array<i64: 2>, scalar_prefetch = 0 : i64, scratch_operands = 1 : i64, tpu.core_type = #tpu.core_type<tc>, window_params = [{transform_indices = @transform_0, window_bounds = array<i64: 1, 256, 8>}, {pipeline_mode = #tpu.pipeline_mode<synchronous>, transform_indices = @transform_1, window_bounds = array<i64: 1, 8>}, {pipeline_mode = #tpu.pipeline_mode<synchronous>, transform_indices = @transform_2, window_bounds = array<i64: 1, 8>}, {pipeline_mode = #tpu.pipeline_mode<synchronous>, transform_indices = @transform_3, window_bounds = array<i64: 9, 8, 8>}, {transform_indices = @transform_4, window_bounds = array<i64: 1, 256, 8>}, {transform_indices = @transform_5, window_bounds = array<i64: 1, 2, 8>}]} {
    %c0 = arith.constant 0 : index
    %c0_0 = arith.constant 0 : index
    %c0_1 = arith.constant 0 : index
    %0 = vector.load %arg1[%c0, %c0_0, %c0_1] : memref<1x256x8xf32, #tpu.memory_space<vmem>>, vector<1x256x8xf32>
    %1 = vector.shape_cast %0 : vector<1x256x8xf32> to vector<256x8xf32>
    %2 = vector.shape_cast %1 : vector<256x8xf32> to vector<16x16x8xf32>
    %3 = arith.truncf %2 : vector<16x16x8xf32> to vector<16x16x8xbf16>
    %c1 = arith.constant 1 : index
    %c1_2 = arith.constant 1 : index
    %c0_3 = arith.constant 0 : index
    %4 = vector.load %arg7[%c1, %c1_2, %c0_3] : memref<18x18x8xbf16, #tpu.memory_space<vmem>>, vector<16x16x8xbf16>
    tpu.vector_store %arg7[%c1, %c1_2, %c0_3], %3 {strides = array<i32>} : memref<18x18x8xbf16, #tpu.memory_space<vmem>>, vector<16x16x8xbf16>,
    %5 = vector.extract_strided_slice %3 {offsets = [0, 0, 0], sizes = [1, 16, 8], strides = [1, 1, 1]} : vector<16x16x8xbf16> to vector<1x16x8xbf16>
    %c0_4 = arith.constant 0 : index
    %c1_5 = arith.constant 1 : index
    %c0_6 = arith.constant 0 : index
    %6 = vector.load %arg7[%c0_4, %c1_5, %c0_6] : memref<18x18x8xbf16, #tpu.memory_space<vmem>>, vector<1x16x8xbf16>
    tpu.vector_store %arg7[%c0_4, %c1_5, %c0_6], %5 {strides = array<i32>} : memref<18x18x8xbf16, #tpu.memory_space<vmem>>, vector<1x16x8xbf16>,
    %7 = vector.extract_strided_slice %3 {offsets = [15, 0, 0], sizes = [1, 16, 8], strides = [1, 1, 1]} : vector<16x16x8xbf16> to vector<1x16x8xbf16>
    %c17 = arith.constant 17 : index
    %c1_7 = arith.constant 1 : index
    %c0_8 = arith.constant 0 : index
    %8 = vector.load %arg7[%c17, %c1_7, %c0_8] : memref<18x18x8xbf16, #tpu.memory_space<vmem>>, vector<1x16x8xbf16>
    tpu.vector_store %arg7[%c17, %c1_7, %c0_8], %7 {strides = array<i32>} : memref<18x18x8xbf16, #tpu.memory_space<vmem>>, vector<1x16x8xbf16>,
    %c0_9 = arith.constant 0 : index
    %c1_10 = arith.constant 1 : index
    %c0_11 = arith.constant 0 : index
    %9 = vector.load %arg7[%c0_9, %c1_10, %c0_11] : memref<18x18x8xbf16, #tpu.memory_space<vmem>>, vector<18x1x8xbf16>
    %c0_12 = arith.constant 0 : index
    %c0_13 = arith.constant 0 : index
    %c0_14 = arith.constant 0 : index
    %10 = vector.load %arg7[%c0_12, %c0_13, %c0_14] : memref<18x18x8xbf16, #tpu.memory_space<vmem>>, vector<18x1x8xbf16>
    tpu.vector_store %arg7[%c0_12, %c0_13, %c0_14], %9 {strides = array<i32>} : memref<18x18x8xbf16, #tpu.memory_space<vmem>>, vector<18x1x8xbf16>,
    %c0_15 = arith.constant 0 : index
    %c16 = arith.constant 16 : index
    %c0_16 = arith.constant 0 : index
    %11 = vector.load %arg7[%c0_15, %c16, %c0_16] : memref<18x18x8xbf16, #tpu.memory_space<vmem>>, vector<18x1x8xbf16>
    %c0_17 = arith.constant 0 : index
    %c17_18 = arith.constant 17 : index
    %c0_19 = arith.constant 0 : index
    %12 = vector.load %arg7[%c0_17, %c17_18, %c0_19] : memref<18x18x8xbf16, #tpu.memory_space<vmem>>, vector<18x1x8xbf16>
    tpu.vector_store %arg7[%c0_17, %c17_18, %c0_19], %11 {strides = array<i32>} : memref<18x18x8xbf16, #tpu.memory_space<vmem>>, vector<18x1x8xbf16>,
    %cst = arith.constant 0.000000e+00 : f32
    %13 = vector.broadcast %cst : f32 to vector<256x8xf32>
    %c0_20 = arith.constant 0 : index
    %c0_21 = arith.constant 0 : index
    %c0_22 = arith.constant 0 : index
    %14 = vector.load %arg7[%c0_20, %c0_21, %c0_22] : memref<18x18x8xbf16, #tpu.memory_space<vmem>>, vector<16x16x8xbf16>
    %15 = vector.shape_cast %14 : vector<16x16x8xbf16> to vector<256x8xbf16>
    %c0_23 = arith.constant 0 : index
    %c0_24 = arith.constant 0 : index
    %c0_25 = arith.constant 0 : index
    %16 = vector.load %arg4[%c0_23, %c0_24, %c0_25] : memref<9x8x8xbf16, #tpu.memory_space<vmem>>, vector<1x8x8xbf16>
    %17 = vector.shape_cast %16 : vector<1x8x8xbf16> to vector<8x8xbf16>
    %cst_26 = arith.constant dense<0.000000e+00> : vector<256x8xf32>
    %18 = tpu.matmul %15, %17, %cst_26 {dimension_numbers = #tpu.dot_dimension_numbers<[1], [0], [0], [1], [0, 0, 1, 1], [], []>} : vector<256x8xbf16>, vector<8x8xbf16>, vector<256x8xf32> -> vector<256x8xf32>
    %19 = arith.addf %13, %18 : vector<256x8xf32>
    %c0_27 = arith.constant 0 : index
    %c1_28 = arith.constant 1 : index
    %c0_29 = arith.constant 0 : index
    %20 = vector.load %arg7[%c0_27, %c1_28, %c0_29] : memref<18x18x8xbf16, #tpu.memory_space<vmem>>, vector<16x16x8xbf16>
    %21 = vector.shape_cast %20 : vector<16x16x8xbf16> to vector<256x8xbf16>
    %c1_30 = arith.constant 1 : index
    %c0_31 = arith.constant 0 : index
    %c0_32 = arith.constant 0 : index
    %22 = vector.load %arg4[%c1_30, %c0_31, %c0_32] : memref<9x8x8xbf16, #tpu.memory_space<vmem>>, vector<1x8x8xbf16>
    %23 = vector.shape_cast %22 : vector<1x8x8xbf16> to vector<8x8xbf16>
    %cst_33 = arith.constant dense<0.000000e+00> : vector<256x8xf32>
    %24 = tpu.matmul %21, %23, %cst_33 {dimension_numbers = #tpu.dot_dimension_numbers<[1], [0], [0], [1], [0, 0, 1, 1], [], []>} : vector<256x8xbf16>, vector<8x8xbf16>, vector<256x8xf32> -> vector<256x8xf32>
    %25 = arith.addf %19, %24 : vector<256x8xf32>
    %c0_34 = arith.constant 0 : index
    %c2 = arith.constant 2 : index
    %c0_35 = arith.constant 0 : index
    %26 = vector.load %arg7[%c0_34, %c2, %c0_35] : memref<18x18x8xbf16, #tpu.memory_space<vmem>>, vector<16x16x8xbf16>
    %27 = vector.shape_cast %26 : vector<16x16x8xbf16> to vector<256x8xbf16>
    %c2_36 = arith.constant 2 : index
    %c0_37 = arith.constant 0 : index
    %c0_38 = arith.constant 0 : index
    %28 = vector.load %arg4[%c2_36, %c0_37, %c0_38] : memref<9x8x8xbf16, #tpu.memory_space<vmem>>, vector<1x8x8xbf16>
    %29 = vector.shape_cast %28 : vector<1x8x8xbf16> to vector<8x8xbf16>
    %cst_39 = arith.constant dense<0.000000e+00> : vector<256x8xf32>
    %30 = tpu.matmul %27, %29, %cst_39 {dimension_numbers = #tpu.dot_dimension_numbers<[1], [0], [0], [1], [0, 0, 1, 1], [], []>} : vector<256x8xbf16>, vector<8x8xbf16>, vector<256x8xf32> -> vector<256x8xf32>
    %31 = arith.addf %25, %30 : vector<256x8xf32>
    %c1_40 = arith.constant 1 : index
    %c0_41 = arith.constant 0 : index
    %c0_42 = arith.constant 0 : index
    %32 = vector.load %arg7[%c1_40, %c0_41, %c0_42] : memref<18x18x8xbf16, #tpu.memory_space<vmem>>, vector<16x16x8xbf16>
    %33 = vector.shape_cast %32 : vector<16x16x8xbf16> to vector<256x8xbf16>
    %c3 = arith.constant 3 : index
    %c0_43 = arith.constant 0 : index
    %c0_44 = arith.constant 0 : index
    %34 = vector.load %arg4[%c3, %c0_43, %c0_44] : memref<9x8x8xbf16, #tpu.memory_space<vmem>>, vector<1x8x8xbf16>
    %35 = vector.shape_cast %34 : vector<1x8x8xbf16> to vector<8x8xbf16>
    %cst_45 = arith.constant dense<0.000000e+00> : vector<256x8xf32>
    %36 = tpu.matmul %33, %35, %cst_45 {dimension_numbers = #tpu.dot_dimension_numbers<[1], [0], [0], [1], [0, 0, 1, 1], [], []>} : vector<256x8xbf16>, vector<8x8xbf16>, vector<256x8xf32> -> vector<256x8xf32>
    %37 = arith.addf %31, %36 : vector<256x8xf32>
    %c1_46 = arith.constant 1 : index
    %c1_47 = arith.constant 1 : index
    %c0_48 = arith.constant 0 : index
    %38 = vector.load %arg7[%c1_46, %c1_47, %c0_48] : memref<18x18x8xbf16, #tpu.memory_space<vmem>>, vector<16x16x8xbf16>
    %39 = vector.shape_cast %38 : vector<16x16x8xbf16> to vector<256x8xbf16>
    %c4 = arith.constant 4 : index
    %c0_49 = arith.constant 0 : index
    %c0_50 = arith.constant 0 : index
    %40 = vector.load %arg4[%c4, %c0_49, %c0_50] : memref<9x8x8xbf16, #tpu.memory_space<vmem>>, vector<1x8x8xbf16>
    %41 = vector.shape_cast %40 : vector<1x8x8xbf16> to vector<8x8xbf16>
    %cst_51 = arith.constant dense<0.000000e+00> : vector<256x8xf32>
    %42 = tpu.matmul %39, %41, %cst_51 {dimension_numbers = #tpu.dot_dimension_numbers<[1], [0], [0], [1], [0, 0, 1, 1], [], []>} : vector<256x8xbf16>, vector<8x8xbf16>, vector<256x8xf32> -> vector<256x8xf32>
    %43 = arith.addf %37, %42 : vector<256x8xf32>
    %c1_52 = arith.constant 1 : index
    %c2_53 = arith.constant 2 : index
    %c0_54 = arith.constant 0 : index
    %44 = vector.load %arg7[%c1_52, %c2_53, %c0_54] : memref<18x18x8xbf16, #tpu.memory_space<vmem>>, vector<16x16x8xbf16>
    %45 = vector.shape_cast %44 : vector<16x16x8xbf16> to vector<256x8xbf16>
    %c5 = arith.constant 5 : index
    %c0_55 = arith.constant 0 : index
    %c0_56 = arith.constant 0 : index
    %46 = vector.load %arg4[%c5, %c0_55, %c0_56] : memref<9x8x8xbf16, #tpu.memory_space<vmem>>, vector<1x8x8xbf16>
    %47 = vector.shape_cast %46 : vector<1x8x8xbf16> to vector<8x8xbf16>
    %cst_57 = arith.constant dense<0.000000e+00> : vector<256x8xf32>
    %48 = tpu.matmul %45, %47, %cst_57 {dimension_numbers = #tpu.dot_dimension_numbers<[1], [0], [0], [1], [0, 0, 1, 1], [], []>} : vector<256x8xbf16>, vector<8x8xbf16>, vector<256x8xf32> -> vector<256x8xf32>
    %49 = arith.addf %43, %48 : vector<256x8xf32>
    %c2_58 = arith.constant 2 : index
    %c0_59 = arith.constant 0 : index
    %c0_60 = arith.constant 0 : index
    %50 = vector.load %arg7[%c2_58, %c0_59, %c0_60] : memref<18x18x8xbf16, #tpu.memory_space<vmem>>, vector<16x16x8xbf16>
    %51 = vector.shape_cast %50 : vector<16x16x8xbf16> to vector<256x8xbf16>
    %c6 = arith.constant 6 : index
    %c0_61 = arith.constant 0 : index
    %c0_62 = arith.constant 0 : index
    %52 = vector.load %arg4[%c6, %c0_61, %c0_62] : memref<9x8x8xbf16, #tpu.memory_space<vmem>>, vector<1x8x8xbf16>
    %53 = vector.shape_cast %52 : vector<1x8x8xbf16> to vector<8x8xbf16>
    %cst_63 = arith.constant dense<0.000000e+00> : vector<256x8xf32>
    %54 = tpu.matmul %51, %53, %cst_63 {dimension_numbers = #tpu.dot_dimension_numbers<[1], [0], [0], [1], [0, 0, 1, 1], [], []>} : vector<256x8xbf16>, vector<8x8xbf16>, vector<256x8xf32> -> vector<256x8xf32>
    %55 = arith.addf %49, %54 : vector<256x8xf32>
    %c2_64 = arith.constant 2 : index
    %c1_65 = arith.constant 1 : index
    %c0_66 = arith.constant 0 : index
    %56 = vector.load %arg7[%c2_64, %c1_65, %c0_66] : memref<18x18x8xbf16, #tpu.memory_space<vmem>>, vector<16x16x8xbf16>
    %57 = vector.shape_cast %56 : vector<16x16x8xbf16> to vector<256x8xbf16>
    %c7 = arith.constant 7 : index
    %c0_67 = arith.constant 0 : index
    %c0_68 = arith.constant 0 : index
    %58 = vector.load %arg4[%c7, %c0_67, %c0_68] : memref<9x8x8xbf16, #tpu.memory_space<vmem>>, vector<1x8x8xbf16>
    %59 = vector.shape_cast %58 : vector<1x8x8xbf16> to vector<8x8xbf16>
    %cst_69 = arith.constant dense<0.000000e+00> : vector<256x8xf32>
    %60 = tpu.matmul %57, %59, %cst_69 {dimension_numbers = #tpu.dot_dimension_numbers<[1], [0], [0], [1], [0, 0, 1, 1], [], []>} : vector<256x8xbf16>, vector<8x8xbf16>, vector<256x8xf32> -> vector<256x8xf32>
    %61 = arith.addf %55, %60 : vector<256x8xf32>
    %c2_70 = arith.constant 2 : index
    %c2_71 = arith.constant 2 : index
    %c0_72 = arith.constant 0 : index
    %62 = vector.load %arg7[%c2_70, %c2_71, %c0_72] : memref<18x18x8xbf16, #tpu.memory_space<vmem>>, vector<16x16x8xbf16>
    %63 = vector.shape_cast %62 : vector<16x16x8xbf16> to vector<256x8xbf16>
    %c8 = arith.constant 8 : index
    %c0_73 = arith.constant 0 : index
    %c0_74 = arith.constant 0 : index
    %64 = vector.load %arg4[%c8, %c0_73, %c0_74] : memref<9x8x8xbf16, #tpu.memory_space<vmem>>, vector<1x8x8xbf16>
    %65 = vector.shape_cast %64 : vector<1x8x8xbf16> to vector<8x8xbf16>
    %cst_75 = arith.constant dense<0.000000e+00> : vector<256x8xf32>
    %66 = tpu.matmul %63, %65, %cst_75 {dimension_numbers = #tpu.dot_dimension_numbers<[1], [0], [0], [1], [0, 0, 1, 1], [], []>} : vector<256x8xbf16>, vector<8x8xbf16>, vector<256x8xf32> -> vector<256x8xf32>
    %67 = arith.addf %61, %66 : vector<256x8xf32>
    %c0_76 = arith.constant 0 : index
    %c0_77 = arith.constant 0 : index
    %c0_78 = arith.constant 0 : index
    %68 = vector.load %arg5[%c0_76, %c0_77, %c0_78] : memref<1x256x8xf32, #tpu.memory_space<vmem>>, vector<1x256x8xf32>
    %69 = vector.shape_cast %68 : vector<1x256x8xf32> to vector<256x8xf32>
    %70 = vector.shape_cast %67 : vector<256x8xf32> to vector<1x256x8xf32>
    tpu.vector_store %arg5[%c0_76, %c0_77, %c0_78], %70 {strides = array<i32>} : memref<1x256x8xf32, #tpu.memory_space<vmem>>, vector<1x256x8xf32>,
    %cst_79 = arith.constant dense<0.000000e+00> : vector<8xf32>
    %71 = vector.multi_reduction <add>, %67, %cst_79 [0] : vector<256x8xf32> to vector<8xf32>
    %72 = vector.shape_cast %71 : vector<8xf32> to vector<1x8xf32>
    %73 = arith.mulf %67, %67 : vector<256x8xf32>
    %cst_80 = arith.constant dense<0.000000e+00> : vector<8xf32>
    %74 = vector.multi_reduction <add>, %73, %cst_80 [0] : vector<256x8xf32> to vector<8xf32>
    %75 = vector.shape_cast %74 : vector<8xf32> to vector<1x8xf32>
    %76 = tpu.concatenate %72, %75 in 0 : vector<1x8xf32>, vector<1x8xf32> -> vector<2x8xf32>
    %c0_81 = arith.constant 0 : index
    %c0_82 = arith.constant 0 : index
    %c0_83 = arith.constant 0 : index
    %77 = vector.load %arg6[%c0_81, %c0_82, %c0_83] : memref<1x2x8xf32, #tpu.memory_space<vmem>>, vector<1x2x8xf32>
    %78 = vector.shape_cast %77 : vector<1x2x8xf32> to vector<2x8xf32>
    %79 = vector.shape_cast %76 : vector<2x8xf32> to vector<1x2x8xf32>
    tpu.vector_store %arg6[%c0_81, %c0_82, %c0_83], %79 {strides = array<i32>} : memref<1x2x8xf32, #tpu.memory_space<vmem>>, vector<1x2x8xf32>,
    return
  }
  func.func @transform_0(%arg0: i32) -> (i32, i32, i32) {
    %c0_i32 = arith.constant 0 : i32
    %c0_i32_0 = arith.constant 0 : i32
    %c0_i32_1 = arith.constant 0 : i32
    return %arg0, %c0_i32, %c0_i32_0 : i32, i32, i32
  }
  func.func @transform_1(%arg0: i32) -> (i32, i32) {
    %c0_i32 = arith.constant 0 : i32
    %c0_i32_0 = arith.constant 0 : i32
    %c0_i32_1 = arith.constant 0 : i32
    return %c0_i32, %c0_i32_0 : i32, i32
  }
  func.func @transform_2(%arg0: i32) -> (i32, i32) {
    %c0_i32 = arith.constant 0 : i32
    %c0_i32_0 = arith.constant 0 : i32
    %c0_i32_1 = arith.constant 0 : i32
    return %c0_i32, %c0_i32_0 : i32, i32
  }
  func.func @transform_3(%arg0: i32) -> (i32, i32, i32) {
    %c0_i32 = arith.constant 0 : i32
    %c0_i32_0 = arith.constant 0 : i32
    %c0_i32_1 = arith.constant 0 : i32
    %c0_i32_2 = arith.constant 0 : i32
    return %c0_i32, %c0_i32_0, %c0_i32_1 : i32, i32, i32
  }
  func.func @transform_4(%arg0: i32) -> (i32, i32, i32) {
    %c0_i32 = arith.constant 0 : i32
    %c0_i32_0 = arith.constant 0 : i32
    %c0_i32_1 = arith.constant 0 : i32
    return %arg0, %c0_i32, %c0_i32_0 : i32, i32, i32
  }
  func.func @transform_5(%arg0: i32) -> (i32, i32, i32) {
    %c0_i32 = arith.constant 0 : i32
    %c0_i32_0 = arith.constant 0 : i32
    %c0_i32_1 = arith.constant 0 : i32
    return %arg0, %c0_i32, %c0_i32_0 : i32, i32, i32
  }
}

</mosaic_0001>

<bundles_post_ra>
// kernel: tpu_custom_call.1
= control target key start
LH: loop header
LB: loop body
LE: loop exit
PB: predicated region body
PF: predicated region fallthrough
CT: control target
= control target key end

     0   :  { %11 = vsyncpa [#allocation4], 0  ;;  %s10077_s0 = inlined_call_operand.vmem [shape: f32[2,256,8], index: 0, kind: input, shape index: {}]   ;;  %s10078_s1 = inlined_call_operand.vmem [shape: f32[1,8], index: 1, kind: input, shape index: {}]   ;;  %s10079_s2 = inlined_call_operand.vmem [shape: f32[1,8], index: 2, kind: input, shape index: {}]   ;;  %s10080_s3 = inlined_call_operand.vmem [shape: bf16[9,8,8], index: 3, kind: input, shape index: {}]   ;;  %s10081_s4 = inlined_call_operand.vmem [shape: f32[2,256,8], index: 4, kind: output, shape index: {0}]   ;;  %s10082_s5 = inlined_call_operand.hbm [shape: f32[2,2,8], index: 5, kind: output, shape index: {1}]  }
   0x1   :  { %13 = vsyncpa [#allocation4 + $0x1], 0  ;;  %s7122_s18 = smov 0   ;;  %s7124_s19 = smov 0  }
   0x2   :  { %s7126_s20 = smov 0   ;;  %s7128_s1 = smov 0  }
   0x3 LB: > { %s7143_s2 = sadd.s32 4294967295, %s7089_s1   ;;  %s6015_s21 = sadd.s32 4294967294, %s7089_s1   ;;  %s7089_s1 = sphi %s7128_s1, %s10362_s1   ;;  %s7085_s20 = sphi %s7126_s20, %s10361_s20   ;;  %s7081_s19 = sphi %s7124_s19, %s10360_s19   ;;  %s7077_s18 = sphi %s7122_s18, %s10359_s18  }
   0x4   : > { %s7147_s22 = sadd.s32 1, %s7089_s1   ;;  %s141_s23 = sadd.s32 1, %s7085_s20 }
   0x5   : > { %s138_s24 = ssub.s32 %s7089_s1, %s7147_s22  ;;  %p151_p0 = scmp.ne.s32.totalorder %s7085_s20, %s7081_s19 }
   0x6   : > { %p139_p1 = scmp.eq.s32.totalorder %s138_s24, 0  ;;  %p152_p2 = scmp.eq.s32.totalorder %s7143_s2, 1 }
   0x7   : > { %p157_p3 = scmp.ne.s32.totalorder %s7081_s19, %s7077_s18  ;;  %p158_p4 = scmp.eq.s32.totalorder %s6015_s21, 1 }
   0x8   : > { %s7158_s25 = scalar_select %p139_p1, %s7085_s20, %s141_s23  }
   0x9   : > { %p7160_p5 = por %p152_p2, %p151_p0  ;;  %p7164_p6 = por %p158_p4, %p157_p3 }
   0xa   : > { %p6018_p7 = scmp.ge.s32.totalorder %s7089_s1, 1  ;;  %p193_p8 = scmp.lt.s32.totalorder %s7089_s1, 3 }
   0xc   : > { %p194_p9 = pnand %p6018_p7, %p193_p8 }
   0xe   : > { %197 = sbr.rel (%p194_p9) target bundleno = 688 (0x2b0), region = 36 }
  0x13   : > { %v6074_v0 = vld [vmem:[%s10080_s3 + $0x4] sm:$0xf]  ;;  %vm1680_vm0 = vcmask 1043456   ;;  %p226_p10 = scmp.lt.s32.totalorder %s7143_s2, 1  ;;  %v7191_v2 = vld [vmem:[%s10080_s3] sm:$0xf] }
  0x14   : > { %6918 = vmatprep.subr.msk.bf16.mxu1 %vm1680_vm0, %v6074_v0  ;;  %6917 = vmatprep.subr.msk.bf16.mxu0 %vm1680_vm0, %v6074_v0  ;;  %v1682_v1 = vsel %vm1680_vm0, %v6074_v0, 0  ;;  %vm365_vm1 = vsmask.f32 256  ;;  %vm366_vm2 = vsmask.f32 4368  ;;  %vm689_vm3 = vcmask 60416  }
  0x15   : > { %6916 = vmatpush3.bf16.msra.mxu1 %v1682_v1  ;;  %6610 = vmatpush3.bf16.msra.mxu0 %v1682_v1  ;;  %s7178_s30 = scalar_select %p226_p10, %s7143_s2, 1  ;;  %vm690_vm4 = vsmask.f32 7938  ;;  %vm697_vm5 = vcmask 57344   ;;  %vm7202_vm6 = vmor %vm365_vm1, %vm366_vm2  ;;  %v10111_v17 = vmov 0  ;;  %v10114_v26 = vmov 0 }
  0x16   : > { %6919 = vmatprep.subr.msk.bf16.mxu1 %vm1680_vm0, %v7191_v2  ;;  %v10112_v17 = vsel %vm7202_vm6, 4294967295, %v10111_v17  ;;  %v807_v18 = vld [vmem:[#allocation2] sm:$0xf]  ;;  %v6155_v23 = vld [vmem:[%s10080_s3 + $0x8] sm:$0xf]  ;;  %vm7211_vm7 = vmand %vm689_vm3, %vm690_vm4  ;;  %v10117_v30 = vmov 0 }
  0x17   : > { %s6422_s6 = sshll.u32 %s7178_s30, 8  ;;  %10113 = vst [vmem:[#allocation6_spill] sm:$0xff] %v10112_v17  ;;  %v10115_v26 = vsel %vm7211_vm7, 4294967295, %v10114_v26  ;;  %v811_v27 = vld [vmem:[#allocation2 + $0x8] sm:$0x1]  ;;  %6920 = vmatprep.subr.msk.bf16.mxu0 %vm1680_vm0, %v6155_v23  ;;  %vm7219_vm8 = vmand %vm697_vm5, %vm365_vm1  ;;  %vm1631_vm12 = vcmask 64512  }
  0x18   : > { %s7186_s9 = scalar_lea.vmem %s10077_s0, %s6422_s6  ;;  %10116 = vst [vmem:[#allocation7_spill] sm:$0xff] %v10115_v26  ;;  %v10118_v30 = vsel %vm7219_vm8, 4294967295, %v10117_v30  ;;  %v744_v33 = vld [vmem:[#allocation2 + $0x60] sm:$0xf]  ;;  %v692_v34 = vld [vmem:[#allocation2 + $0xc] sm:$0xf]  ;;  %vm7256_vm9 = vmand %vm697_vm5, %vm690_vm4  ;;  %s9780_s16 = scalar_lea.vmem %s10081_s4, %s6422_s6 }
  0x19   : > { %v237_v3 = vld [vmem:[%s7186_s9] sm:$0xff]  ;;  %v238_v4 = vld [vmem:[%s7186_s9 + $0x8] sm:$0xff]  ;;  %v251_v7 = vld [vmem:[%s7186_s9 + $0x70] sm:$0xff]  ;;  %10119 = vst [vmem:[#allocation8_spill] sm:$0xff] %v10118_v30  ;;  %vm1194_vm10 = vsmask.f32 3328 }
  0x1a   : > { %v6424_v5 = vpack.c.bf16 %v237_v3, %v237_v3  ;;  %v6425_v6 = vpack.c.bf16 %v238_v4, %v238_v4  ;;  %v252_v8 = vld [vmem:[%s7186_s9 + $0x78] sm:$0xff]  ;;  %v6438_v9 = vpack.c.bf16 %v251_v7, %v251_v7  ;;  %v253_v11 = vld [vmem:[%s7186_s9 + $0x80] sm:$0xff]  ;;  %v254_v16 = vld [vmem:[%s7186_s9 + $0x88] sm:$0xff]  ;;  %vm1195_vm11 = vsmask.f32 7440  ;;  %s223_s30 = sand.u32 1, %s7081_s19  }
  0x1b   : > { %v6439_v10 = vpack.c.bf16 %v252_v8, %v252_v8  ;;  %v6440_v28 = vpack.c.bf16 %v253_v11, %v253_v11  ;;  %v239_v29 = vld [vmem:[%s7186_s9 + $0x10] sm:$0xff]  ;;  %v6441_v35 = vpack.c.bf16 %v254_v16, %v254_v16  ;;  %v748_v41 = vld [vmem:[#allocation2 + $0x68] sm:$0x1]  ;;  %v240_v51 = vld [vmem:[%s7186_s9 + $0x18] sm:$0xff]  ;;  %v10120_v16 = vmov 0  ;;  %s6019_s6 = sshll.u32 %s223_s30, 1 }
  0x1c   : > { %v369_v12 = vshrl.u32 %v6424_v5, 16  ;;  %v372_v13 = vshll.u32 %v6424_v5, 16  ;;  %v377_v14 = vshrl.u32 %v6425_v6, 16  ;;  %v380_v15 = vshll.u32 %v6425_v6, 16  ;;  %v699_v42 = vld [vmem:[#allocation2 + $0x14] sm:$0x1]  ;;  %vm7322_vm13 = vmor %vm1194_vm10, %vm1195_vm11 }
  0x1d   : > { %v488_v19 = vshrl.u32 %v6438_v9, 16  ;;  %v491_v20 = vshll.u32 %v6438_v9, 16  ;;  %v496_v21 = vshrl.u32 %v6439_v10, 16  ;;  %v499_v22 = vshll.u32 %v6439_v10, 16  ;;  %v255_v52 = vld [vmem:[%s7186_s9 + $0x90] sm:$0xff]  ;;  %s6419_s17 = sshll.u32 %s7143_s2, 5 }
  0x1e   : > { %v371_v24 = vrot.slane %v369_v12, 7  ;;  %v379_v25 = vrot.slane %v377_v14, 7  ;;  %v6426_v36 = vpack.c.bf16 %v239_v29, %v239_v29  ;;  %v505_v57 = vshrl.u32 %v6440_v28, 16  ;;  %v751_v4 = vld [vmem:[#allocation2 + $0x6c] sm:$0xf]  ;;  %s225_s21 = scalar_lea.vmem [#allocation3], %s6019_s6  ;;  %s10042_s29 = scalar_lea.hbm %s10082_s5, %s6419_s17 }
  0x1f   : > { %v490_v31 = vrot.slane %v488_v19, 7  ;;  %v498_v32 = vrot.slane %v496_v21, 7  ;;  %v508_v58 = vshll.u32 %v6440_v28, 16  ;;  %v513_v59 = vshrl.u32 %v6441_v35, 16  ;;  %v755_v7 = vld [vmem:[#allocation2 + $0x74] sm:$0x1] }
  0x20   : > { %v374_v37 = vor.u32 %v372_v13, %v371_v24  ;;  %v375_v38 = vrot.slane %v371_v24, 4  ;;  %v382_v39 = vor.u32 %v380_v15, %v379_v25  ;;  %v384_v40 = vrot.slane %v379_v25, 4  ;;  %v706_v29 = vld [vmem:[#allocation2 + $0x20] sm:$0x1]  ;;  %s5931_s23 = sshll.u32 %s225_s21, 4  ;;  %s5915_s7 = scalar_lea.sflag [#allocation4], %s223_s30  ;;  %s5932_s23 = int_to_ptr.vmem [resolvable:$true] %s5931_s23 }
  0x21   : > { %v493_v43 = vor.u32 %v491_v20, %v490_v31  ;;  %v494_v44 = vrot.slane %v490_v31, 4  ;;  %v501_v45 = vor.u32 %v499_v22, %v498_v32  ;;  %v503_v46 = vrot.slane %v498_v32, 4  ;;  %v702_v20 = vld [vmem:[#allocation2 + $0x18] sm:$0xf]  ;;  %s7029_s8 = scalar_lea.vmem %s5932_s23, 32  ;;  %s7091_s2 = smov [#allocation3]  }
  0x22   : > { %v383_v47 = vsel %vm7202_vm6, %v375_v38, %v382_v39  ;;  %v808_v48 = vsel %vm7211_vm7, %v374_v37, %v807_v18  ;;  %v812_v49 = vsel %vm7219_vm8, %v384_v40, %v811_v27  ;;  %v693_v50 = vsel %vm7211_vm7, %v374_v37, %v692_v34  ;;  %p7030_p11 = scmp.ne.s32.totalorder %s5932_s23, %s7029_s8  ;;  %s7033_s10 = sshll.u32 %s7091_s2, 4  ;;  %s7034_s10 = int_to_ptr.vmem [resolvable:$false] %s7033_s10 }
  0x23   : > { %696 = vst.msk [vmem:[#allocation2 + $0x10] sm:$0xf] %vm689_vm3, %v383_v47  ;;  %809 = vst [vmem:[#allocation2] sm:$0xf] %v808_v48  ;;  %v502_v53 = vsel %vm7202_vm6, %v494_v44, %v501_v45  ;;  %v745_v54 = vsel %vm7211_vm7, %v493_v43, %v744_v33  ;;  %v749_v55 = vsel %vm7219_vm8, %v503_v46, %v748_v41  ;;  %v516_v60 = vshll.u32 %v6441_v35, 16  ;;  %s7035_s11 = scalar_lea.vmem %s7034_s10, 64  ;;  %p7036_p0 = scmp.lt.s32.totalorder %s5932_s23, %s7034_s10 }
  0x24   : > { %810 = vst.msk [vmem:[#allocation2 + $0x4] sm:$0xf] %vm689_vm3, %v383_v47  ;;  %813 = vst [vmem:[#allocation2 + $0x8] sm:$0x1] %v812_v49  ;;  %v700_v56 = vsel %vm7219_vm8, %v384_v40, %v699_v42  ;;  %v6427_v61 = vpack.c.bf16 %v240_v51, %v240_v51  ;;  %v386_v62 = vshrl.u32 %v6426_v36, 16  ;;  %v389_v63 = vshll.u32 %v6426_v36, 16  ;;  %p7031_p12 = pnand %p7030_p11, %p7160_p5  ;;  %p7037_p1 = scmp.lt.s32.totalorder %s7035_s11, %s7029_s8 }
  0x25   : > { %694 = vst [vmem:[#allocation2 + $0xc] sm:$0xf] %v693_v50  ;;  %746 = vst [vmem:[#allocation2 + $0x60] sm:$0xf] %v745_v54  ;;  %v7244_v0 = vpack.c.bf16 %v255_v52, %v255_v52  ;;  %v507_v1 = vrot.slane %v505_v57, 7  ;;  %v515_v3 = vrot.slane %v513_v59, 7 }
  0x26   : > { %747 = vst.msk [vmem:[#allocation2 + $0x64] sm:$0xf] %vm689_vm3, %v502_v53  ;;  %750 = vst [vmem:[#allocation2 + $0x68] sm:$0x1] %v749_v55  ;;  %v7248_v5 = vsel %vm1680_vm0, %v7191_v2, 0  ;;  %v7251_v6 = vsel %vm1680_vm0, %v6155_v23, 0  ;;  %p7032_p13 = pneg %p7031_p12  ;;  %p7038_p2 = por %p7037_p1, %p7036_p0 }
  0x27   : > { %701 = vst [vmem:[#allocation2 + $0x14] sm:$0x1] %v700_v56  ;;  %v388_v8 = vrot.slane %v386_v62, 7  ;;  %v394_v9 = vshrl.u32 %v6427_v61, 16  ;;  %v397_v10 = vshll.u32 %v6427_v61, 16  ;;  %v522_v11 = vshrl.u32 %v7244_v0, 16 }
  0x28   : > { %v510_v12 = vor.u32 %v508_v58, %v507_v1  ;;  %v511_v13 = vrot.slane %v507_v1, 4  ;;  %v518_v14 = vor.u32 %v516_v60, %v515_v3  ;;  %v520_v15 = vrot.slane %v515_v3, 4  ;;  %v256_v53 = vld [vmem:[%s7186_s9 + $0x98] sm:$0xff]  ;;  %v241_v60 = vld [vmem:[%s7186_s9 + $0x20] sm:$0xff]  ;;  %p7039_p3 = pnand %p7038_p2, %p7032_p13 }
  0x29   : > { %v10121_v16 = vsel %vm7256_vm9, 4294967295, %v10120_v16  ;;  %v391_v2 = vor.u32 %v389_v63, %v388_v8  ;;  %v392_v18 = vrot.slane %v388_v8, 4  ;;  %v396_v19 = vrot.slane %v394_v9, 7 }
  0x2a   : > { %10122 = vst [vmem:[#allocation9_spill] sm:$0xff] %v10121_v16  ;;  %v7260_v21 = vrot.slane %v522_v11, 7  ;;  %v822_v22 = vld [vmem:[#allocation2] sm:$0x1]  ;;  %v519_v25 = vsel %vm7202_vm6, %v511_v13, %v518_v14  ;;  %v752_v27 = vsel %vm7211_vm7, %v510_v12, %v751_v4  ;;  %v756_v28 = vsel %vm7219_vm8, %v520_v15, %v755_v7  ;;  %v242_v4 = vld [vmem:[%s7186_s9 + $0x28] sm:$0xff] }
  0x2b   : > { %v1001_v23 = vld [vmem:[#allocation2 + $0x8] sm:$0x1]  ;;  %v1146_v24 = vld [vmem:[#allocation2 + $0x4] sm:$0xf]  ;;  %v841_v31 = vshrl.u32 %v822_v22, 16  ;;  %v399_v39 = vor.u32 %v397_v10, %v396_v19  ;;  %v401_v40 = vrot.slane %v396_v19, 4  ;;  %v703_v41 = vsel %vm7211_vm7, %v391_v2, %v702_v20 }
  0x2c   : > { %v1020_v32 = vshll.u32 %v1001_v23, 16  ;;  %v1207_v33 = vshll.u32 %v1146_v24, 16  ;;  %v1211_v34 = vshrl.u32 %v1146_v24, 16  ;;  %v830_v35 = vld [vmem:[#allocation2 + $0x60] sm:$0x1]  ;;  %v7294_v9 = vpack.c.bf16 %v256_v53, %v256_v53 }
  0x2d   : > { %753 = vst [vmem:[#allocation2 + $0x6c] sm:$0xf] %v752_v27  ;;  %754 = vst.msk [vmem:[#allocation2 + $0x70] sm:$0xf] %vm689_vm3, %v519_v25  ;;  %v881_v36 = vshrl.u32 %v830_v35, 16  ;;  %v948_v42 = vsel %vm7219_vm8, %v841_v31, %v822_v22  ;;  %v400_v58 = vsel %vm7202_vm6, %v392_v18, %v399_v39  ;;  %v707_v59 = vsel %vm7219_vm8, %v401_v40, %v706_v29  ;;  %v257_v12 = vld [vmem:[%s7186_s9 + $0xa0] sm:$0xff] }
  0x2e   : > { %757 = vst [vmem:[#allocation2 + $0x74] sm:$0x1] %v756_v28  ;;  %v971_v37 = vld [vmem:[#allocation2 + $0x60] sm:$0x1]  ;;  %v1009_v38 = vld [vmem:[#allocation2 + $0x68] sm:$0x1]  ;;  %v1092_v43 = vsel %vm7256_vm9, %v1020_v32, %v1001_v23  ;;  %v7300_v19 = vpack.c.bf16 %v241_v60, %v241_v60  ;;  %v7305_v25 = vpack.c.bf16 %v242_v4, %v242_v4 }
  0x2f   : > { %v7275_v44 = vrot.slane %v1207_v33, 5  ;;  %v1213_v45 = vrot.slane %v1211_v34, 4  ;;  %v1115_v46 = vld [vmem:[#allocation2 + $0x68] sm:$0x1]  ;;  %v1162_v47 = vld [vmem:[#allocation2 + $0x64] sm:$0xf]  ;;  %v972_v48 = vsel %vm7219_vm8, %v881_v36, %v971_v37 }
  0x30   : > { %704 = vst [vmem:[#allocation2 + $0x18] sm:$0xf] %v703_v41  ;;  %949 = vst [vmem:[#allocation2] sm:$0x1] %v948_v42  ;;  %v1044_v49 = vshll.u32 %v1009_v38, 16  ;;  %v1399_v50 = vshll.u32 %v1162_v47, 16  ;;  %v7315_v38 = vpack.c.bf16 %v257_v12, %v257_v12 }
  0x31   : > { %1093 = vst [vmem:[#allocation2 + $0x8] sm:$0x1] %v1092_v43  ;;  %v1403_v51 = vshrl.u32 %v1162_v47, 16  ;;  %v823_v52 = vld [vmem:[#allocation2 + $0xc] sm:$0x1]  ;;  %v1214_v54 = vor.u32 %v1213_v45, %v7275_v44  ;;  %v525_v10 = vshll.u32 %v7244_v0, 16 }
  0x32   : > { %973 = vst [vmem:[#allocation2 + $0x60] sm:$0x1] %v972_v48  ;;  %v846_v55 = vshrl.u32 %v823_v52, 16  ;;  %v950_v56 = vld [vmem:[#allocation2 + $0xc] sm:$0x1]  ;;  %v1116_v61 = vsel %vm7256_vm9, %v1044_v49, %v1115_v46  ;;  %v7288_v62 = vrot.slane %v1399_v50, 5 }
  0x33   : > { %v1002_v57 = vld [vmem:[#allocation2 + $0x14] sm:$0x1]  ;;  %v1405_v63 = vrot.slane %v1403_v51, 4  ;;  %705 = vst.msk [vmem:[#allocation2 + $0x1c] sm:$0xf] %vm689_vm3, %v400_v58  ;;  %v7302_v20 = vrot.slane %v1214_v54, 4  ;;  %v527_v0 = vor.u32 %v525_v10, %v7260_v21 }
  0x34   : > { %v1023_v1 = vshll.u32 %v1002_v57, 16  ;;  %v1094_v3 = vld [vmem:[#allocation2 + $0x14] sm:$0x1]  ;;  %708 = vst [vmem:[#allocation2 + $0x20] sm:$0x1] %v707_v59  ;;  %v951_v7 = vsel %vm7219_vm8, %v846_v55, %v950_v56  ;;  %v528_v36 = vrot.slane %v7260_v21, 4 }
  0x35   : > { %1117 = vst [vmem:[#allocation2 + $0x68] sm:$0x1] %v1116_v61  ;;  %v1148_v8 = vld [vmem:[#allocation2 + $0x10] sm:$0xf]  ;;  %v758_v11 = vld [vmem:[#allocation2 + $0x78] sm:$0xf]  ;;  %v1406_v27 = vor.u32 %v1405_v63, %v7288_v62 }
  0x36   : > { %952 = vst [vmem:[#allocation2 + $0xc] sm:$0x1] %v951_v7  ;;  %v1095_v13 = vsel %vm7256_vm9, %v1023_v1, %v1094_v3  ;;  %v1231_v14 = vshll.u32 %v1148_v8, 16  ;;  %v1235_v15 = vshrl.u32 %v1148_v8, 16  ;;  %v831_v2 = vld [vmem:[#allocation2 + $0x6c] sm:$0x1]  ;;  %v759_v37 = vsel %vm7211_vm7, %v527_v0, %v758_v11 }
  0x37   : > { %v974_v18 = vld [vmem:[#allocation2 + $0x6c] sm:$0x1]  ;;  %1096 = vst [vmem:[#allocation2 + $0x14] sm:$0x1] %v1095_v13  ;;  %v886_v22 = vshrl.u32 %v831_v2, 16  ;;  %v1407_v53 = vrot.slane %v1406_v27, 4 }
  0x38   : > { %v1010_v23 = vld [vmem:[#allocation2 + $0x74] sm:$0x1]  ;;  %v7308_v28 = vrot.slane %v1231_v14, 5  ;;  %v1237_v29 = vrot.slane %v1235_v15, 4  ;;  %v1164_v32 = vld [vmem:[#allocation2 + $0x70] sm:$0xf] }
  0x39   : > { %v1118_v24 = vld [vmem:[#allocation2 + $0x74] sm:$0x1]  ;;  %v1047_v31 = vshll.u32 %v1010_v23, 16  ;;  %v1145_v33 = vld [vmem:[#allocation2] sm:$0xf]  ;;  %v975_v35 = vsel %vm7219_vm8, %v886_v22, %v974_v18  ;;  %v1423_v43 = vshll.u32 %v1164_v32, 16 }
  0x3a   : > { %v1178_v34 = vld [vmem:[#allocation2 + $0x8] sm:$0x1]  ;;  %v1198_v39 = vshrl.u32 %v1145_v33, 16  ;;  %v1201_v40 = vshll.u32 %v1145_v33, 16  ;;  %v1161_v42 = vld [vmem:[#allocation2 + $0x60] sm:$0xf]  ;;  %v1238_v47 = vor.u32 %v1237_v29, %v7308_v28 }
  0x3b   : > { %v1217_v41 = vshll.u32 %v1178_v34, 16  ;;  %976 = vst [vmem:[#allocation2 + $0x6c] sm:$0x1] %v975_v35  ;;  %760 = vst [vmem:[#allocation2 + $0x78] sm:$0xf] %v759_v37  ;;  %v1390_v45 = vshrl.u32 %v1161_v42, 16  ;;  %v1119_v48 = vsel %vm7256_vm9, %v1047_v31, %v1118_v24 }
  0x3c   : > { %v1393_v46 = vshll.u32 %v1161_v42, 16  ;;  %v1200_v49 = vrot.slane %v1198_v39, 4  ;;  %v1203_v50 = vrot.slane %v1201_v40, 5  ;;  %v1186_v52 = vld [vmem:[#allocation2 + $0x68] sm:$0x1]  ;;  %v1427_v59 = vshrl.u32 %v1164_v32, 16 }
  0x3d   : > { %v1219_v51 = vrot.slane %v1217_v41, 5  ;;  %1120 = vst [vmem:[#allocation2 + $0x74] sm:$0x1] %v1119_v48  ;;  %v1392_v55 = vrot.slane %v1390_v45, 4  ;;  %v1409_v57 = vshll.u32 %v1186_v52, 16  ;;  %v7326_v3 = vrot.slane %v1423_v43, 5 }
  0x3e   : > { %v1395_v56 = vrot.slane %v1393_v46, 5  ;;  %v1147_v58 = vld [vmem:[#allocation2 + $0xc] sm:$0xf]  ;;  %v1204_v60 = vor.u32 %v1203_v50, %v1200_v49  ;;  %v1179_v61 = vld [vmem:[#allocation2 + $0x14] sm:$0x1]  ;;  %v1239_v8 = vrot.slane %v1238_v47, 4 }
  0x3f   : > { %v1222_v63 = vshrl.u32 %v1147_v58, 16  ;;  %v1225_v1 = vshll.u32 %v1147_v58, 16  ;;  %v1411_v7 = vrot.slane %v1409_v57, 5  ;;  %v1241_v10 = vshll.u32 %v1179_v61, 16  ;;  %v824_v31 = vld [vmem:[#allocation2 + $0x18] sm:$0x1] }
  0x40   : > { %v1396_v4 = vor.u32 %v1395_v56, %v1392_v55  ;;  %v1205_v11 = vrot.slane %v1204_v60, 4  ;;  %v1220_v12 = vsel %vm7322_vm13, %v7302_v20, %v1219_v51  ;;  %v1429_v23 = vrot.slane %v1427_v59, 4  ;;  %v1003_v32 = vld [vmem:[#allocation2 + $0x20] sm:$0x1]  ;;  %v953_v39 = vld [vmem:[#allocation2 + $0x18] sm:$0x1] }
  0x41   : > { %v1224_v13 = vrot.slane %v1222_v63, 4  ;;  %v1227_v14 = vrot.slane %v1225_v1, 5  ;;  %v1412_v2 = vsel %vm7322_vm13, %v1407_v53, %v1411_v7  ;;  %v1243_v18 = vrot.slane %v1241_v10, 5  ;;  %v1150_v40 = vld [vmem:[#allocation2 + $0x1c] sm:$0xf] }
  0x42   : > { %v1397_v15 = vrot.slane %v1396_v4, 4  ;;  %v1163_v22 = vld [vmem:[#allocation2 + $0x6c] sm:$0xf]  ;;  %v1210_v24 = vsel %vm7322_vm13, %v1205_v11, %v7275_v44  ;;  %v1430_v37 = vor.u32 %v1429_v23, %v7326_v3  ;;  %v1097_v45 = vld [vmem:[#allocation2 + $0x20] sm:$0x1]  ;;  %v851_v48 = vshrl.u32 %v824_v31, 16 }
  0x43   : > { %v1228_v0 = vor.u32 %v1227_v14, %v1224_v13  ;;  %v1414_v27 = vshrl.u32 %v1163_v22, 16  ;;  %v1417_v29 = vshll.u32 %v1163_v22, 16  ;;  %v6075_v33 = vcombine.low %v1210_v24, %v1220_v12  ;;  %v832_v53 = vld [vmem:[#allocation2 + $0x78] sm:$0x1]  ;;  %v762_v13 = vld [vmem:[#allocation2 + $0x80] sm:$0x1] }
  0x44   : > { %v1402_v20 = vsel %vm7322_vm13, %v1397_v15, %v7288_v62  ;;  %v1244_v34 = vsel %vm7322_vm13, %v1239_v8, %v1243_v18  ;;  %v1187_v35 = vld [vmem:[#allocation2 + $0x74] sm:$0x1]  ;;  %v1431_v46 = vrot.slane %v1430_v37, 4  ;;  %v1026_v49 = vshll.u32 %v1003_v32, 16  ;;  %v977_v63 = vld [vmem:[#allocation2 + $0x78] sm:$0x1] }
  0x45   : > { %v6083_v41 = vcombine.low %v1402_v20, %v1412_v2  ;;  %v1229_v44 = vrot.slane %v1228_v0, 4  ;;  %v1416_v42 = vrot.slane %v1414_v27, 4  ;;  %v1419_v43 = vrot.slane %v1417_v29, 5  ;;  %6611 = vmatprep.mubr.msk.bf16.mxu0 %vm1631_vm12, %v6075_v33  ;;  %v258_v15 = vld [vmem:[%s7186_s9 + $0xa8] sm:$0xff]  ;;  %v709_v23 = vld [vmem:[#allocation2 + $0x24] sm:$0xf] }
  0x46   : > { %v1433_v47 = vshll.u32 %v1187_v35, 16  ;;  %v1255_v51 = vshll.u32 %v1150_v40, 16  ;;  %v1259_v52 = vshrl.u32 %v1150_v40, 16  ;;  %v954_v57 = vsel %vm7219_vm8, %v851_v48, %v953_v39  ;;  %v713_v27 = vld [vmem:[#allocation2 + $0x2c] sm:$0x1]  ;;  %v243_v39 = vld [vmem:[%s7186_s9 + $0x30] sm:$0xff] }
  0x47   : > { %6627 = vmatprep.mubr.msk.bf16.mxu1 %vm1631_vm12, %v6083_v41  ;;  %v1234_v62 = vsel %vm7322_vm13, %v1229_v44, %v7308_v28  ;;  %v1420_v50 = vor.u32 %v1419_v43, %v1416_v42  ;;  %v1098_v58 = vsel %vm7256_vm9, %v1026_v49, %v1097_v45  ;;  %955 = vst [vmem:[#allocation2 + $0x18] sm:$0x1] %v954_v57  ;;  %v530_v28 = vshrl.u32 %v7294_v9, 16  ;;  %v6188_v29 = vld [vmem:[%s10080_s3 + $0xc] sm:$0xf]  ;;  %v244_v48 = vld [vmem:[%s7186_s9 + $0x38] sm:$0xff] }
  0x48   : > { %v6076_v55 = vcombine.low %v1234_v62, %v1244_v34  ;;  %v1435_v56 = vrot.slane %v1433_v47, 5  ;;  %1099 = vst [vmem:[#allocation2 + $0x20] sm:$0x1] %v1098_v58  ;;  %v7351_v60 = vrot.slane %v1255_v51, 5  ;;  %v1261_v61 = vrot.slane %v1259_v52, 4  ;;  %v259_v52 = vld [vmem:[%s7186_s9 + $0xb0] sm:$0xff] }
  0x49   : > { %v1421_v59 = vrot.slane %v1420_v50, 4  ;;  %v533_v4 = vshll.u32 %v7294_v9, 16  ;;  %v891_v7 = vshrl.u32 %v832_v53, 16  ;;  %v403_v8 = vshrl.u32 %v7300_v19, 16  ;;  %v769_v47 = vld [vmem:[#allocation2 + $0x8c] sm:$0x1] }
  0x4a   : > { %6612 = vmatmul.mubr.msk.bf16.vlgmr.msra.gmra.mxu0 %vm1631_vm12, %v6076_v55  ;;  %v1436_v1 = vsel %vm7322_vm13, %v1431_v46, %v1435_v56  ;;  %v1262_v11 = vor.u32 %v1261_v61, %v7351_v60  ;;  %v532_v12 = vrot.slane %v530_v28, 7  ;;  %v406_v14 = vshll.u32 %v7300_v19, 16  ;;  %v765_v46 = vld [vmem:[#allocation2 + $0x84] sm:$0xf]  ;;  %v260_v53 = vld [vmem:[%s7186_s9 + $0xb8] sm:$0xff]  ;;  %v246_v61 = vld [vmem:[%s7186_s9 + $0x48] sm:$0xff] }
  0x4b   : > { %v1426_v10 = vsel %vm7322_vm13, %v1421_v59, %v7326_v3  ;;  %6678 = vmatpush3.bf16.msra.mxu0 %v7251_v6  ;;  %v978_v9 = vsel %vm7219_vm8, %v891_v7, %v977_v63  ;;  %v405_v18 = vrot.slane %v403_v8, 7  ;;  %v411_v22 = vshrl.u32 %v7305_v25, 16  ;;  %v6221_v3 = vld [vmem:[%s10080_s3 + $0x10] sm:$0xf]  ;;  %v245_v59 = vld [vmem:[%s7186_s9 + $0x40] sm:$0xff] }
  0x4c   : > { %v6084_v2 = vcombine.low %v1426_v10, %v1436_v1  ;;  %v7372_v6 = vrot.slane %v1262_v11, 4  ;;  %v535_v24 = vor.u32 %v533_v4, %v532_v12  ;;  %v537_v0 = vrot.slane %v532_v12, 4  ;;  %979 = vst [vmem:[#allocation2 + $0x78] sm:$0x1] %v978_v9  ;;  %6922 = vmatprep.subr.msk.bf16.mxu0 %vm1680_vm0, %v6221_v3  ;;  %v7006_v16 = vld [vmem:[#allocation2] sm:$0xf] }
  0x4d   : > { %v414_v19 = vshll.u32 %v7305_v25, 16  ;;  %v408_v31 = vor.u32 %v406_v14, %v405_v18  ;;  %v409_v32 = vrot.slane %v405_v18, 4  ;;  %v413_v33 = vrot.slane %v411_v22, 7 }
  0x4e   : > { %6628 = vmatmul.mubr.msk.bf16.vlgmr.msra.gmra.mxu1 %vm1631_vm12, %v6084_v2  ;;  %v6445_v20 = vpack.c.bf16 %v258_v15, %v258_v15  ;;  %v536_v25 = vsel %vm7202_vm6, %v528_v36, %v535_v24  ;;  %v763_v34 = vsel %vm7219_vm8, %v537_v0, %v762_v13  ;;  %v539_v35 = vshrl.u32 %v7315_v38, 16  ;;  %v1149_v40 = vld [vmem:[#allocation2 + $0x18] sm:$0xf]  ;;  %v261_v13 = vld [vmem:[%s7186_s9 + $0xc0] sm:$0xff] }
  0x4f   : > { %6644 = vmatpush3.bf16.msra.mxu1 %v7248_v5  ;;  %v542_v37 = vshll.u32 %v7315_v38, 16  ;;  %v1180_v41 = vld [vmem:[#allocation2 + $0x20] sm:$0x1]  ;;  %761 = vst.msk [vmem:[#allocation2 + $0x7c] sm:$0xf] %vm689_vm3, %v536_v25  ;;  %v416_v5 = vor.u32 %v414_v19, %v413_v33  ;;  %v418_v44 = vrot.slane %v413_v33, 4  ;;  %v710_v21 = vsel %vm7211_vm7, %v408_v31, %v709_v23 }
  0x50   : > { %764 = vst [vmem:[#allocation2 + $0x80] sm:$0x1] %v763_v34  ;;  %v547_v36 = vshrl.u32 %v6445_v20, 16  ;;  %6921 = vmatprep.subr.msk.bf16.mxu1 %vm1680_vm0, %v6188_v29  ;;  %v1246_v42 = vshrl.u32 %v1149_v40, 16  ;;  %v1249_v43 = vshll.u32 %v1149_v40, 16  ;;  %v1265_v38 = vshll.u32 %v1180_v41, 16 }
  0x51   : > { %711 = vst [vmem:[#allocation2 + $0x24] sm:$0xf] %v710_v21  ;;  %v541_v45 = vrot.slane %v539_v35, 7  ;;  %v417_v49 = vsel %vm7202_vm6, %v409_v32, %v416_v5  ;;  %v714_v62 = vsel %vm7219_vm8, %v418_v44, %v713_v27  ;;  %v550_v51 = vshll.u32 %v6445_v20, 16 }
  0x52   : > { %v549_v50 = vrot.slane %v547_v36, 7  ;;  %v1248_v55 = vrot.slane %v1246_v42, 4  ;;  %v1251_v56 = vrot.slane %v1249_v43, 5  ;;  %v1267_v57 = vrot.slane %v1265_v38, 5  ;;  %712 = vst.msk [vmem:[#allocation2 + $0x28] sm:$0xf] %vm689_vm3, %v417_v49 }
  0x53   : > { %715 = vst [vmem:[#allocation2 + $0x2c] sm:$0x1] %v714_v62  ;;  %v544_v58 = vor.u32 %v542_v37, %v541_v45  ;;  %v1165_v28 = vld [vmem:[#allocation2 + $0x78] sm:$0xf]  ;;  %v545_v63 = vrot.slane %v541_v45, 4  ;;  %v7404_v7 = vpack.c.bf16 %v243_v39, %v243_v39  ;;  %v7416_v9 = vpack.c.bf16 %v244_v48, %v244_v48  ;;  %v262_v38 = vld [vmem:[%s7186_s9 + $0xc8] sm:$0xff] }
  0x54   : > { %v552_v1 = vor.u32 %v550_v51, %v549_v50  ;;  %v554_v4 = vrot.slane %v549_v50, 4  ;;  %v1252_v8 = vor.u32 %v1251_v56, %v1248_v55  ;;  %v1268_v10 = vsel %vm7322_vm13, %v7372_v6, %v1267_v57  ;;  %v247_v45 = vld [vmem:[%s7186_s9 + $0x50] sm:$0xff] }
  0x55   : > { %v1438_v11 = vshrl.u32 %v1165_v28, 16  ;;  %v1441_v12 = vshll.u32 %v1165_v28, 16  ;;  %v766_v15 = vsel %vm7211_vm7, %v544_v58, %v765_v46  ;;  %v7419_v6 = vpack.c.bf16 %v259_v52, %v259_v52  ;;  %v248_v46 = vld [vmem:[%s7186_s9 + $0x58] sm:$0xff] }
  0x56   : > { %v553_v14 = vsel %vm7202_vm6, %v545_v63, %v552_v1  ;;  %v770_v2 = vsel %vm7219_vm8, %v554_v4, %v769_v47  ;;  %v1253_v18 = vrot.slane %v1252_v8, 4  ;;  %767 = vst [vmem:[#allocation2 + $0x84] sm:$0xf] %v766_v15  ;;  %v7421_v24 = vpack.c.bf16 %v260_v53, %v260_v53  ;;  %v1166_v19 = vld [vmem:[#allocation2 + $0x7c] sm:$0xf] }
  0x57   : > { %v1011_v22 = vld [vmem:[#allocation2 + $0x80] sm:$0x1]  ;;  %v1440_v3 = vrot.slane %v1438_v11, 4  ;;  %768 = vst.msk [vmem:[#allocation2 + $0x88] sm:$0xf] %vm689_vm3, %v553_v14  ;;  %v1443_v27 = vrot.slane %v1441_v12, 5  ;;  %v7423_v31 = vpack.c.bf16 %v245_v59, %v245_v59  ;;  %v7425_v32 = vpack.c.bf16 %v246_v61, %v246_v61 }
  0x58   : > { %v1121_v23 = vld [vmem:[#allocation2 + $0x80] sm:$0x1]  ;;  %771 = vst [vmem:[#allocation2 + $0x8c] sm:$0x1] %v770_v2  ;;  %v1050_v0 = vshll.u32 %v1011_v22, 16  ;;  %v1258_v33 = vsel %vm7322_vm13, %v1253_v18, %v7351_v60  ;;  %v1447_v20 = vshll.u32 %v1166_v19, 16  ;;  %v7434_v21 = vpack.c.bf16 %v261_v13, %v261_v13 }
  0x59   : > { %v825_v29 = vld [vmem:[#allocation2 + $0x24] sm:$0x1]  ;;  %v1451_v25 = vshrl.u32 %v1166_v19, 16  ;;  %v6077_v37 = vcombine.low %v1258_v33, %v1268_v10  ;;  %v1444_v40 = vor.u32 %v1443_v27, %v1440_v3  ;;  %v7432_v44 = vld [vmem:[#allocation2 + $0x28] sm:$0xf]  ;;  %v420_v62 = vshrl.u32 %v7404_v7, 16 }
  0x5a   : > { %v856_v34 = vshrl.u32 %v825_v29, 16  ;;  %v956_v35 = vld [vmem:[#allocation2 + $0x24] sm:$0x1]  ;;  %v1122_v39 = vsel %vm7256_vm9, %v1050_v0, %v1121_v23  ;;  %v1004_v41 = vld [vmem:[#allocation2 + $0x2c] sm:$0x1]  ;;  %v7436_v60 = vrot.slane %v1447_v20, 5  ;;  %v7460_v61 = vpack.c.bf16 %v262_v38, %v262_v38 }
  0x5b   : > { %v1100_v5 = vld [vmem:[#allocation2 + $0x2c] sm:$0x1]  ;;  %1123 = vst [vmem:[#allocation2 + $0x80] sm:$0x1] %v1122_v39  ;;  %v1453_v36 = vrot.slane %v1451_v25, 4  ;;  %v1029_v43 = vshll.u32 %v1004_v41, 16  ;;  %6615 = vmatprep.mubr.msk.bf16.mxu0 %vm1631_vm12, %v6077_v37  ;;  %v7464_v8 = vpack.c.bf16 %v248_v46, %v248_v46 }
  0x5c   : > { %v957_v42 = vsel %vm7219_vm8, %v856_v34, %v956_v35  ;;  %v7444_v47 = vrot.slane %v1444_v40, 4  ;;  %v1279_v48 = vshll.u32 %v7432_v44, 16  ;;  %v1283_v49 = vshrl.u32 %v7432_v44, 16  ;;  %v716_v23 = vld [vmem:[#allocation2 + $0x30] sm:$0xf] }
  0x5d   : > { %958 = vst [vmem:[#allocation2 + $0x24] sm:$0x1] %v957_v42  ;;  %v1454_v50 = vor.u32 %v1453_v36, %v7436_v60  ;;  %v1101_v51 = vsel %vm7256_vm9, %v1029_v43, %v1100_v5  ;;  %v423_v52 = vshll.u32 %v7404_v7, 16  ;;  %v428_v53 = vshrl.u32 %v7416_v9, 16  ;;  %v833_v58 = vld [vmem:[#allocation2 + $0x84] sm:$0x1] }
  0x5e   : > { %v1450_v55 = vsel %vm7322_vm13, %v7444_v47, %v7436_v60  ;;  %1102 = vst [vmem:[#allocation2 + $0x2c] sm:$0x1] %v1101_v51  ;;  %v7458_v56 = vrot.slane %v1279_v48, 5  ;;  %v1285_v57 = vrot.slane %v1283_v49, 4  ;;  %v980_v59 = vld [vmem:[#allocation2 + $0x84] sm:$0x1]  ;;  %v7462_v7 = vpack.c.bf16 %v247_v45, %v247_v45 }
  0x5f   : > { %v1455_v28 = vrot.slane %v1454_v50, 4  ;;  %v896_v63 = vshrl.u32 %v833_v58, 16  ;;  %v1012_v1 = vld [vmem:[#allocation2 + $0x8c] sm:$0x1]  ;;  %v1168_v12 = vld [vmem:[#allocation2 + $0x88] sm:$0xf] }
  0x60   : > { %v1124_v4 = vld [vmem:[#allocation2 + $0x8c] sm:$0x1]  ;;  %v1286_v10 = vor.u32 %v1285_v57, %v7458_v56  ;;  %v1053_v11 = vshll.u32 %v1012_v1, 16  ;;  %v422_v13 = vrot.slane %v420_v62, 7  ;;  %v430_v14 = vrot.slane %v428_v53, 7 }
  0x61   : > { %v981_v15 = vsel %vm7219_vm8, %v896_v63, %v980_v59  ;;  %v1471_v2 = vshll.u32 %v1168_v12, 16  ;;  %v1475_v18 = vshrl.u32 %v1168_v12, 16  ;;  %v431_v22 = vshll.u32 %v7416_v9, 16  ;;  %v720_v33 = vld [vmem:[#allocation2 + $0x38] sm:$0x1] }
  0x62   : > { %v1188_v3 = vld [vmem:[#allocation2 + $0x80] sm:$0x1]  ;;  %v1287_v0 = vrot.slane %v1286_v10, 4  ;;  %982 = vst [vmem:[#allocation2 + $0x84] sm:$0x1] %v981_v15  ;;  %v1125_v19 = vsel %vm7256_vm9, %v1053_v11, %v1124_v4  ;;  %v425_v27 = vor.u32 %v423_v52, %v422_v13  ;;  %v426_v29 = vrot.slane %v422_v13, 4 }
  0x63   : > { %v1457_v20 = vshll.u32 %v1188_v3, 16  ;;  %1126 = vst [vmem:[#allocation2 + $0x8c] sm:$0x1] %v1125_v19  ;;  %v7472_v34 = vrot.slane %v1471_v2, 5  ;;  %v1477_v35 = vrot.slane %v1475_v18, 4  ;;  %v433_v37 = vor.u32 %v431_v22, %v430_v14  ;;  %v263_v10 = vld [vmem:[%s7186_s9 + $0xd0] sm:$0xff] }
  0x64   : > { %v1151_v25 = vld [vmem:[#allocation2 + $0x24] sm:$0xf]  ;;  %v435_v9 = vrot.slane %v430_v14, 4  ;;  %v717_v41 = vsel %vm7211_vm7, %v425_v27, %v716_v23  ;;  %v556_v43 = vshrl.u32 %v7419_v6, 16  ;;  %v559_v50 = vshll.u32 %v7419_v6, 16 }
  0x65   : > { %v1270_v39 = vshrl.u32 %v1151_v25, 16  ;;  %v1273_v40 = vshll.u32 %v1151_v25, 16  ;;  %v1459_v5 = vrot.slane %v1457_v20, 5  ;;  %v7476_v60 = vld [vmem:[#allocation2 + $0x2c] sm:$0x1]  ;;  %v1478_v36 = vor.u32 %v1477_v35, %v7472_v34 }
  0x66   : > { %v434_v42 = vsel %vm7202_vm6, %v426_v29, %v433_v37  ;;  %718 = vst [vmem:[#allocation2 + $0x30] sm:$0xf] %v717_v41  ;;  %v1289_v46 = vshll.u32 %v7476_v60, 16  ;;  %v721_v47 = vsel %vm7219_vm8, %v435_v9, %v720_v33  ;;  %v558_v62 = vrot.slane %v556_v43, 7  ;;  %v772_v51 = vld [vmem:[#allocation2 + $0x90] sm:$0xf] }
  0x67   : > { %v1272_v38 = vrot.slane %v1270_v39, 4  ;;  %v1275_v45 = vrot.slane %v1273_v40, 5  ;;  %719 = vst.msk [vmem:[#allocation2 + $0x34] sm:$0xf] %vm689_vm3, %v434_v42  ;;  %v1460_v48 = vsel %vm7322_vm13, %v1455_v28, %v1459_v5  ;;  %v7488_v49 = vrot.slane %v1478_v36, 4 }
  0x68   : > { %722 = vst [vmem:[#allocation2 + $0x38] sm:$0x1] %v721_v47  ;;  %v6085_v52 = vcombine.low %v1450_v55, %v1460_v48  ;;  %v1291_v57 = vrot.slane %v1289_v46, 5  ;;  %v564_v58 = vshrl.u32 %v7421_v24, 16  ;;  %v561_v63 = vor.u32 %v559_v50, %v558_v62  ;;  %v776_v37 = vld [vmem:[#allocation2 + $0x98] sm:$0x1] }
  0x69   : > { %v1276_v53 = vor.u32 %v1275_v45, %v1272_v38  ;;  %v1167_v59 = vld [vmem:[#allocation2 + $0x84] sm:$0xf]  ;;  %v562_v1 = vrot.slane %v558_v62, 4  ;;  %v567_v4 = vshll.u32 %v7421_v24, 16  ;;  %v437_v28 = vshrl.u32 %v7423_v31, 16  ;;  %v264_v24 = vld [vmem:[%s7186_s9 + $0xd8] sm:$0xff] }
  0x6a   : > { %6631 = vmatprep.mubr.msk.bf16.mxu1 %vm1631_vm12, %v6085_v52  ;;  %v1292_v6 = vsel %vm7322_vm13, %v1287_v0, %v1291_v57  ;;  %v1189_v55 = vld [vmem:[#allocation2 + $0x8c] sm:$0x1]  ;;  %v1462_v12 = vshrl.u32 %v1167_v59, 16  ;;  %v1465_v13 = vshll.u32 %v1167_v59, 16  ;;  %v566_v15 = vrot.slane %v564_v58, 7 }
  0x6b   : > { %v1277_v11 = vrot.slane %v1276_v53, 4  ;;  %v1481_v14 = vshll.u32 %v1189_v55, 16  ;;  %v773_v2 = vsel %vm7211_vm7, %v561_v63, %v772_v51  ;;  %v7500_v18 = vrot.slane %v437_v28, 7  ;;  %v723_v62 = vld [vmem:[#allocation2 + $0x3c] sm:$0xf] }
  0x6c   : > { %v1464_v23 = vrot.slane %v1462_v12, 4  ;;  %v1467_v3 = vrot.slane %v1465_v13, 5  ;;  %774 = vst [vmem:[#allocation2 + $0x90] sm:$0xf] %v773_v2  ;;  %v7506_v0 = vpack.c.bf16 %v263_v10, %v263_v10  ;;  %v569_v35 = vor.u32 %v567_v4, %v566_v15 }
  0x6d   : > { %v1282_v22 = vsel %vm7322_vm13, %v1277_v11, %v7458_v56  ;;  %v826_v19 = vld [vmem:[#allocation2 + $0x30] sm:$0x1]  ;;  %v1483_v33 = vrot.slane %v1481_v14, 5  ;;  %v7512_v5 = vpack.c.bf16 %v264_v24, %v264_v24  ;;  %v571_v48 = vrot.slane %v566_v15, 4 }
  0x6e   : > { %v959_v27 = vld [vmem:[#allocation2 + $0x30] sm:$0x1]  ;;  %v6078_v29 = vcombine.low %v1282_v22, %v1292_v6  ;;  %v861_v20 = vshrl.u32 %v826_v19, 16  ;;  %v7508_v25 = vld [vmem:[#allocation2 + $0x34] sm:$0xf]  ;;  %v1468_v39 = vor.u32 %v1467_v3, %v1464_v23  ;;  %v570_v38 = vsel %vm7202_vm6, %v562_v1, %v569_v35 }
  0x6f   : > { %v1005_v40 = vld [vmem:[#allocation2 + $0x38] sm:$0x1]  ;;  %v1303_v41 = vshll.u32 %v7508_v25, 16  ;;  %v1307_v56 = vshrl.u32 %v7508_v25, 16  ;;  %v1484_v36 = vsel %vm7322_vm13, %v7488_v49, %v1483_v33  ;;  %775 = vst.msk [vmem:[#allocation2 + $0x94] sm:$0xf] %vm689_vm3, %v570_v38  ;;  %v777_v58 = vsel %vm7219_vm8, %v571_v48, %v776_v37 }
  0x70   : > { %v1103_v9 = vld [vmem:[#allocation2 + $0x38] sm:$0x1]  ;;  %6616 = vmatmul.mubr.msk.bf16.gmra.mxu0 %vm1631_vm12, %v6078_v29  ;;  %v960_v42 = vsel %vm7219_vm8, %v861_v20, %v959_v27  ;;  %v1032_v43 = vshll.u32 %v1005_v40, 16  ;;  %v1469_v45 = vrot.slane %v1468_v39, 4  ;;  %v440_v49 = vshll.u32 %v7423_v31, 16 }
  0x71   : > { %961 = vst [vmem:[#allocation2 + $0x30] sm:$0x1] %v960_v42  ;;  %v7522_v46 = vrot.slane %v1303_v41, 5  ;;  %v1309_v47 = vrot.slane %v1307_v56, 4  ;;  %v443_v51 = vrot.slane %v7500_v18, 4  ;;  %v445_v52 = vshrl.u32 %v7425_v32, 16 }
  0x72   : > { %v1104_v50 = vsel %vm7256_vm9, %v1032_v43, %v1103_v9  ;;  %v1474_v53 = vsel %vm7322_vm13, %v1469_v45, %v7472_v34  ;;  %v448_v59 = vshll.u32 %v7425_v32, 16  ;;  %778 = vst [vmem:[#allocation2 + $0x98] sm:$0x1] %v777_v58  ;;  %v442_v4 = vor.u32 %v440_v49, %v7500_v18  ;;  %v727_v6 = vld [vmem:[#allocation2 + $0x44] sm:$0x1] }
  0x73   : > { %1105 = vst [vmem:[#allocation2 + $0x38] sm:$0x1] %v1104_v50  ;;  %v1310_v57 = vor.u32 %v1309_v47, %v7522_v46  ;;  %v6086_v63 = vcombine.low %v1474_v53, %v1484_v36  ;;  %v834_v1 = vld [vmem:[#allocation2 + $0x90] sm:$0x1]  ;;  %v447_v28 = vrot.slane %v445_v52, 7  ;;  %v573_v10 = vshrl.u32 %v7434_v21, 16 }
  0x74   : > { %v983_v31 = vld [vmem:[#allocation2 + $0x90] sm:$0x1]  ;;  %v901_v34 = vshrl.u32 %v834_v1, 16  ;;  %v576_v55 = vshll.u32 %v7434_v21, 16  ;;  %v581_v12 = vshrl.u32 %v7460_v61, 16  ;;  %v724_v14 = vsel %vm7211_vm7, %v442_v4, %v723_v62 }
  0x75   : > { %v7539_v11 = vrot.slane %v1310_v57, 4  ;;  %6632 = vmatmul.mubr.msk.bf16.gmra.mxu1 %vm1631_vm12, %v6086_v63  ;;  %v450_v32 = vor.u32 %v448_v59, %v447_v28  ;;  %v452_v13 = vrot.slane %v447_v28, 4  ;;  %v575_v15 = vrot.slane %v573_v10, 7  ;;  %725 = vst [vmem:[#allocation2 + $0x3c] sm:$0xf] %v724_v14 }
  0x76   : > { %v984_v2 = vsel %vm7219_vm8, %v901_v34, %v983_v31  ;;  %v583_v18 = vrot.slane %v581_v12, 7  ;;  %v584_v24 = vshll.u32 %v7460_v61, 16  ;;  %v779_v22 = vld [vmem:[#allocation2 + $0x9c] sm:$0xf]  ;;  %v454_v21 = vshrl.u32 %v7462_v7, 16 }
  0x77   : > { %985 = vst [vmem:[#allocation2 + $0x90] sm:$0x1] %v984_v2  ;;  %v7552_v3 = vld [vmem:[#allocation2 + $0x94] sm:$0xf]  ;;  %v451_v19 = vsel %vm7202_vm6, %v443_v51, %v450_v32  ;;  %v728_v27 = vsel %vm7219_vm8, %v452_v13, %v727_v6  ;;  %v578_v29 = vor.u32 %v576_v55, %v575_v15  ;;  %v579_v33 = vrot.slane %v575_v15, 4 }
  0x78   : > { %v7550_v23 = vld [vmem:[#allocation2 + $0x30] sm:$0xf]  ;;  %v1495_v35 = vshll.u32 %v7552_v3, 16  ;;  %v1499_v37 = vshrl.u32 %v7552_v3, 16  ;;  %726 = vst.msk [vmem:[#allocation2 + $0x40] sm:$0xf] %vm689_vm3, %v451_v19  ;;  %v586_v9 = vor.u32 %v584_v24, %v583_v18 }
  0x79   : > { %v1294_v20 = vshrl.u32 %v7550_v23, 16  ;;  %v1297_v61 = vshll.u32 %v7550_v23, 16  ;;  %729 = vst [vmem:[#allocation2 + $0x44] sm:$0x1] %v728_v27  ;;  %v783_v39 = vld [vmem:[#allocation2 + $0xa4] sm:$0x1]  ;;  %v780_v56 = vsel %vm7211_vm7, %v578_v29, %v779_v22 }
  0x7a   : > { %v7563_v40 = vld [vmem:[#allocation2 + $0x38] sm:$0x1]  ;;  %v588_v41 = vrot.slane %v583_v18, 4  ;;  %v7567_v36 = vrot.slane %v454_v21, 7  ;;  %v7570_v47 = vrot.slane %v1495_v35, 5  ;;  %v1501_v50 = vrot.slane %v1499_v37, 4 }
  0x7b   : > { %v1296_v42 = vrot.slane %v1294_v20, 4  ;;  %v1299_v43 = vrot.slane %v1297_v61, 5  ;;  %v1313_v38 = vshll.u32 %v7563_v40, 16  ;;  %v1013_v45 = vld [vmem:[#allocation2 + $0x98] sm:$0x1]  ;;  %v587_v49 = vsel %vm7202_vm6, %v579_v33, %v586_v9  ;;  %v249_v19 = vld [vmem:[%s7186_s9 + $0x60] sm:$0xff] }
  0x7c   : > { %781 = vst [vmem:[#allocation2 + $0x9c] sm:$0xf] %v780_v56  ;;  %v1056_v48 = vshll.u32 %v1013_v45, 16  ;;  %v1127_v62 = vld [vmem:[#allocation2 + $0x98] sm:$0x1]  ;;  %v784_v51 = vsel %vm7219_vm8, %v588_v41, %v783_v39  ;;  %v457_v57 = vshll.u32 %v7462_v7, 16  ;;  %v1502_v1 = vor.u32 %v1501_v50, %v7570_v47 }
  0x7d   : > { %v1300_v52 = vor.u32 %v1299_v43, %v1296_v42  ;;  %v1315_v53 = vrot.slane %v1313_v38, 5  ;;  %782 = vst.msk [vmem:[#allocation2 + $0xa0] sm:$0xf] %vm689_vm3, %v587_v49  ;;  %785 = vst [vmem:[#allocation2 + $0xa4] sm:$0x1] %v784_v51  ;;  %v460_v58 = vrot.slane %v7567_v36, 4  ;;  %v7611_v45 = vpack.c.bf16 %v249_v19, %v249_v19 }
  0x7e   : > { %v730_v59 = vld [vmem:[#allocation2 + $0x48] sm:$0xf]  ;;  %v1128_v63 = vsel %vm7256_vm9, %v1056_v48, %v1127_v62  ;;  %v827_v31 = vld [vmem:[#allocation2 + $0x3c] sm:$0x1]  ;;  %v462_v28 = vshrl.u32 %v7464_v8, 16  ;;  %v465_v10 = vshll.u32 %v7464_v8, 16  ;;  %v459_v12 = vor.u32 %v457_v57, %v7567_v36 }
  0x7f   : > { %v962_v4 = vld [vmem:[#allocation2 + $0x3c] sm:$0x1]  ;;  %v1301_v34 = vrot.slane %v1300_v52, 4  ;;  %v1316_v6 = vsel %vm7322_vm13, %v7539_v11, %v1315_v53  ;;  %1129 = vst [vmem:[#allocation2 + $0x98] sm:$0x1] %v1128_v63  ;;  %v866_v55 = vshrl.u32 %v827_v31, 16 }
  0x80   : > { %v7587_v7 = vld [vmem:[#allocation2 + $0x90] sm:$0xf]  ;;  %v7592_v14 = vrot.slane %v1502_v1, 4  ;;  %v1006_v15 = vld [vmem:[#allocation2 + $0x44] sm:$0x1]  ;;  %v464_v8 = vrot.slane %v462_v28, 7  ;;  %v731_v21 = vsel %vm7211_vm7, %v459_v12, %v730_v59 }
  0x81   : > { %v1486_v32 = vshrl.u32 %v7587_v7, 16  ;;  %v1489_v13 = vshll.u32 %v7587_v7, 16  ;;  %v1306_v2 = vsel %vm7322_vm13, %v1301_v34, %v7522_v46  ;;  %v963_v11 = vsel %vm7219_vm8, %v866_v55, %v962_v4  ;;  %v1106_v24 = vld [vmem:[#allocation2 + $0x44] sm:$0x1]  ;;  %v7599_v22 = vld [vmem:[#allocation2 + $0x40] sm:$0xf] }
  0x82   : > { %v1035_v18 = vshll.u32 %v1006_v15, 16  ;;  %v6079_v27 = vcombine.low %v1306_v2, %v1316_v6  ;;  %964 = vst [vmem:[#allocation2 + $0x3c] sm:$0x1] %v963_v11  ;;  %v1327_v20 = vshll.u32 %v7599_v22, 16  ;;  %732 = vst [vmem:[#allocation2 + $0x48] sm:$0xf] %v731_v21  ;;  %v467_v9 = vor.u32 %v465_v10, %v464_v8 }
  0x83   : > { %v1488_v29 = vrot.slane %v1486_v32, 4  ;;  %v1491_v33 = vrot.slane %v1489_v13, 5  ;;  %v835_v61 = vld [vmem:[#allocation2 + $0x9c] sm:$0x1]  ;;  %v1331_v35 = vshrl.u32 %v7599_v22, 16  ;;  %v469_v38 = vrot.slane %v464_v8, 4 }
  0x84   : > { %v1107_v46 = vsel %vm7256_vm9, %v1035_v18, %v1106_v24  ;;  %v906_v37 = vshrl.u32 %v835_v61, 16  ;;  %v986_v39 = vld [vmem:[#allocation2 + $0x9c] sm:$0x1]  ;;  %v734_v41 = vld [vmem:[#allocation2 + $0x50] sm:$0x1]  ;;  %6619 = vmatprep.mubr.msk.bf16.mxu0 %vm1631_vm12, %v6079_v27  ;;  %v7609_v36 = vrot.slane %v1327_v20, 5  ;;  %v468_v51 = vsel %vm7202_vm6, %v460_v58, %v467_v9 }
  0x85   : > { %v1492_v56 = vor.u32 %v1491_v33, %v1488_v29  ;;  %1108 = vst [vmem:[#allocation2 + $0x44] sm:$0x1] %v1107_v46  ;;  %v1014_v42 = vld [vmem:[#allocation2 + $0xa4] sm:$0x1]  ;;  %v1333_v48 = vrot.slane %v1331_v35, 4  ;;  %v250_v52 = vld [vmem:[%s7186_s9 + $0x68] sm:$0xff]  ;;  %v735_v1 = vsel %vm7219_vm8, %v469_v38, %v734_v41 }
  0x86   : > { %v1130_v43 = vld [vmem:[#allocation2 + $0xa4] sm:$0x1]  ;;  %v987_v62 = vsel %vm7219_vm8, %v906_v37, %v986_v39  ;;  %v1059_v50 = vshll.u32 %v1014_v42, 16  ;;  %v7615_v49 = vld [vmem:[#allocation2 + $0xa0] sm:$0xf]  ;;  %v590_v10 = vshrl.u32 %v7506_v0, 16  ;;  %v7641_v2 = vpack.c.bf16 %v250_v52, %v250_v52 }
  0x87   : > { %10125 = vst [vmem:[#allocation10_spill] sm:$0xff] %v7615_v49  ;;  %v7620_v53 = vld [vmem:[#allocation2 + $0x98] sm:$0x1]  ;;  %v1493_v57 = vrot.slane %v1492_v56, 4  ;;  %988 = vst [vmem:[#allocation2 + $0x9c] sm:$0x1] %v987_v62  ;;  %v1334_v28 = vor.u32 %v1333_v48, %v7609_v36 }
  0x88   : > { %v1519_v59 = vshll.u32 %v7615_v49, 16  ;;  %v1523_v63 = vshrl.u32 %v7615_v49, 16  ;;  %733 = vst.msk [vmem:[#allocation2 + $0x4c] sm:$0xf] %vm689_vm3, %v468_v51  ;;  %v265_v31 = vld [vmem:[%s7186_s9 + $0xe0] sm:$0xff]  ;;  %v1505_v4 = vshll.u32 %v7620_v53, 16  ;;  %v1131_v58 = vsel %vm7256_vm9, %v1059_v50, %v1130_v43 }
  0x89   : > { %736 = vst [vmem:[#allocation2 + $0x50] sm:$0x1] %v735_v1  ;;  %v1498_v34 = vsel %vm7322_vm13, %v1493_v57, %v7570_v47  ;;  %1132 = vst [vmem:[#allocation2 + $0xa4] sm:$0x1] %v1131_v58  ;;  %v593_v12 = vshll.u32 %v7506_v0, 16  ;;  %v1335_v15 = vrot.slane %v1334_v28, 4  ;;  %v7643_v11 = vpack.c.bf16 %v265_v31, %v265_v31 }
  0x8a   : > { %v7636_v6 = vrot.slane %v1519_v59, 5  ;;  %v1525_v55 = vrot.slane %v1523_v63, 4  ;;  %v1507_v32 = vrot.slane %v1505_v4, 5  ;;  %v7639_v13 = vld [vmem:[#allocation2 + $0x3c] sm:$0xf]  ;;  %v7653_v29 = vrot.slane %v590_v10, 7 }
  0x8b   : > { %v828_v8 = vld [vmem:[#allocation2 + $0x48] sm:$0x1]  ;;  %v1318_v18 = vshrl.u32 %v7639_v13, 16  ;;  %v1321_v47 = vshll.u32 %v7639_v13, 16  ;;  %v598_v33 = vshrl.u32 %v7512_v5, 16  ;;  %v601_v20 = vshll.u32 %v7512_v5, 16 }
  0x8c   : > { %v1526_v24 = vor.u32 %v1525_v55, %v7636_v6  ;;  %v871_v21 = vshrl.u32 %v828_v8, 16  ;;  %v965_v19 = vld [vmem:[#allocation2 + $0x48] sm:$0x1]  ;;  %v1508_v0 = vsel %vm7322_vm13, %v7592_v14, %v1507_v32  ;;  %v7651_v27 = vld [vmem:[#allocation2 + $0x44] sm:$0x1]  ;;  %v595_v43 = vor.u32 %v593_v12, %v7653_v29 }
  0x8d   : > { %v6087_v61 = vcombine.low %v1498_v34, %v1508_v0  ;;  %v1320_v46 = vrot.slane %v1318_v18, 4  ;;  %v1323_v35 = vrot.slane %v1321_v47, 5  ;;  %v1337_v37 = vshll.u32 %v7651_v27, 16  ;;  %v786_v39 = vld [vmem:[#allocation2 + $0xa8] sm:$0xf] }
  0x8e   : > { %v266_v9 = vld [vmem:[%s7186_s9 + $0xe8] sm:$0xff]  ;;  %v7659_v41 = vld [vmem:[#allocation2 + $0x9c] sm:$0xf]  ;;  %v1527_v56 = vrot.slane %v1526_v24, 4  ;;  %v966_v14 = vsel %vm7219_vm8, %v871_v21, %v965_v19  ;;  %v596_v38 = vrot.slane %v7653_v29, 4  ;;  %v787_v1 = vsel %vm7211_vm7, %v595_v43, %v786_v39 }
  0x8f   : > { %10126 = vst [vmem:[#allocation11_spill] sm:$0xff] %v7659_v41  ;;  %v7663_v42 = vld [vmem:[#allocation2 + $0x4c] sm:$0xf]  ;;  %6635 = vmatprep.mubr.msk.bf16.mxu1 %vm1631_vm12, %v6087_v61  ;;  %v1324_v5 = vor.u32 %v1323_v35, %v1320_v46  ;;  %v1339_v48 = vrot.slane %v1337_v37, 5  ;;  %v1510_v62 = vshrl.u32 %v7659_v41, 16  ;;  %v1513_v50 = vshll.u32 %v7659_v41, 16 }
  0x90   : > { %967 = vst [vmem:[#allocation2 + $0x48] sm:$0x1] %v966_v14  ;;  %v1007_v51 = vld [vmem:[#allocation2 + $0x50] sm:$0x1]  ;;  %v7670_v52 = vld [vmem:[#allocation2 + $0xa4] sm:$0x1]  ;;  %v7675_v31 = vpack.c.bf16 %v266_v9, %v266_v9 }
  0x91   : > { %v1038_v57 = vshll.u32 %v1007_v51, 16  ;;  %v1109_v59 = vld [vmem:[#allocation2 + $0x50] sm:$0x1]  ;;  %v1351_v63 = vshll.u32 %v7663_v42, 16  ;;  %v1325_v4 = vrot.slane %v1324_v5, 4  ;;  %v1340_v28 = vsel %vm7322_vm13, %v1335_v15, %v1339_v48 }
  0x92   : > { %v1512_v58 = vrot.slane %v1510_v62, 4  ;;  %v1515_v10 = vrot.slane %v1513_v50, 5  ;;  %788 = vst [vmem:[#allocation2 + $0xa8] sm:$0xf] %v787_v1  ;;  %v1529_v34 = vshll.u32 %v7670_v52, 16  ;;  %v1355_v32 = vshrl.u32 %v7663_v42, 16 }
  0x93   : > { %v1110_v55 = vsel %vm7256_vm9, %v1038_v57, %v1109_v59  ;;  %v7682_v12 = vrot.slane %v1351_v63, 5  ;;  %v1330_v8 = vsel %vm7322_vm13, %v1325_v4, %v7609_v36  ;;  %v600_v47 = vrot.slane %v598_v33, 7  ;;  %v790_v35 = vld [vmem:[#allocation2 + $0xb0] sm:$0x1]  ;;  %v737_v43 = vld [vmem:[#allocation2 + $0x54] sm:$0xf] }
  0x94   : > { %v1516_v18 = vor.u32 %v1515_v10, %v1512_v58  ;;  %1111 = vst [vmem:[#allocation2 + $0x50] sm:$0x1] %v1110_v55  ;;  %v471_v15 = vshrl.u32 %v7611_v45, 16  ;;  %v6080_v24 = vcombine.low %v1330_v8, %v1340_v28  ;;  %v1531_v21 = vrot.slane %v1529_v34, 5  ;;  %v741_v8 = vld [vmem:[#allocation2 + $0x5c] sm:$0x1] }
  0x95   : > { %v1357_v19 = vrot.slane %v1355_v32, 4  ;;  %v474_v0 = vshll.u32 %v7611_v45, 16  ;;  %v603_v61 = vor.u32 %v601_v20, %v600_v47  ;;  %v605_v46 = vrot.slane %v600_v47, 4  ;;  %v2149_v26 = vld [vmem:[#allocation2 + $0x90] sm:$0xe] }
  0x96   : > { %v1517_v29 = vrot.slane %v1516_v18, 4  ;;  %v473_v37 = vrot.slane %v471_v15, 7  ;;  %6620 = vmatmul.mubr.msk.bf16.gmra.mxu0 %vm1631_vm12, %v6080_v24  ;;  %v1532_v36 = vsel %vm7322_vm13, %v1527_v56, %v1531_v21  ;;  %v479_v9 = vshrl.u32 %v7641_v2, 16 }
  0x97   : > { %v7693_v39 = vld [vmem:[#allocation2 + $0x48] sm:$0xf]  ;;  %v1358_v33 = vor.u32 %v1357_v19, %v7682_v12  ;;  %v482_v14 = vshll.u32 %v7641_v2, 16  ;;  %v604_v56 = vsel %vm7202_vm6, %v596_v38, %v603_v61  ;;  %v791_v50 = vsel %vm7219_vm8, %v605_v46, %v790_v35  ;;  %v793_v19 = vld [vmem:[#allocation2 + $0xb4] sm:$0xf] }
  0x98   : > { %v1522_v45 = vsel %vm7322_vm13, %v1517_v29, %v7636_v6  ;;  %v1342_v20 = vshrl.u32 %v7693_v39, 16  ;;  %v1345_v5 = vshll.u32 %v7693_v39, 16  ;;  %789 = vst.msk [vmem:[#allocation2 + $0xac] sm:$0xf] %vm689_vm3, %v604_v56  ;;  %v476_v57 = vor.u32 %v474_v0, %v473_v37  ;;  %792 = vst [vmem:[#allocation2 + $0xb0] sm:$0x1] %v791_v50 }
  0x99   : > { %v6088_v48 = vcombine.low %v1522_v45, %v1532_v36  ;;  %v1359_v62 = vrot.slane %v1358_v33, 4  ;;  %v836_v2 = vld [vmem:[#allocation2 + $0xa8] sm:$0x1]  ;;  %v477_v1 = vrot.slane %v473_v37, 4  ;;  %v481_v38 = vrot.slane %v479_v9, 7 }
  0x9a   : > { %v989_v51 = vld [vmem:[#allocation2 + $0xa8] sm:$0x1]  ;;  %v1344_v59 = vrot.slane %v1342_v20, 4  ;;  %v1347_v63 = vrot.slane %v1345_v5, 5  ;;  %v911_v6 = vshrl.u32 %v836_v2, 16  ;;  %v738_v28 = vsel %vm7211_vm7, %v476_v57, %v737_v43 }
  0x9b   : > { %6636 = vmatmul.mubr.msk.bf16.gmra.mxu1 %vm1631_vm12, %v6088_v48  ;;  %v7709_v4 = vld [vmem:[#allocation2 + $0x50] sm:$0x1]  ;;  %v607_v58 = vshrl.u32 %v7643_v11, 16  ;;  %v610_v10 = vshll.u32 %v7643_v11, 16  ;;  %739 = vst [vmem:[#allocation2 + $0x54] sm:$0xf] %v738_v28  ;;  %v484_v47 = vor.u32 %v482_v14, %v481_v38 }
  0x9c   : > { %v1348_v34 = vor.u32 %v1347_v63, %v1344_v59  ;;  %v1361_v55 = vshll.u32 %v7709_v4, 16  ;;  %v990_v32 = vsel %vm7219_vm8, %v911_v6, %v989_v51  ;;  %v615_v18 = vshrl.u32 %v7675_v31, 16  ;;  %v797_v36 = vld [vmem:[#allocation2 + $0xbc] sm:$0x1] }
  0x9d   : > { %991 = vst [vmem:[#allocation2 + $0xa8] sm:$0x1] %v990_v32  ;;  %v486_v15 = vrot.slane %v481_v38, 4  ;;  %v609_v24 = vrot.slane %v607_v58, 7  ;;  %v618_v21 = vshll.u32 %v7675_v31, 16  ;;  %v485_v61 = vsel %vm7202_vm6, %v477_v1, %v484_v47 }
  0x9e   : > { %v1349_v0 = vrot.slane %v1348_v34, 4  ;;  %v1363_v29 = vrot.slane %v1361_v55, 5  ;;  %v617_v11 = vrot.slane %v615_v18, 7  ;;  %740 = vst.msk [vmem:[#allocation2 + $0x58] sm:$0xf] %vm689_vm3, %v485_v61  ;;  %vm2185_vm14 = vcmask 1042432  }
  0x9f   : > { %v742_v46 = vsel %vm7219_vm8, %v486_v15, %v741_v8  ;;  %v612_v35 = vor.u32 %v610_v10, %v609_v24  ;;  %v613_v37 = vrot.slane %v609_v24, 4  ;;  %v7729_v9 = vld [vmem:[#allocation2 + $0xac] sm:$0xf]  ;;  %v1015_v20 = vld [vmem:[#allocation2 + $0xb0] sm:$0x1]  ;;  %vm2186_vm15 = vcmask 1046532  }
  0xa0   : > { %v1354_v33 = vsel %vm7322_vm13, %v1349_v0, %v7682_v12  ;;  %v1364_v31 = vsel %vm7322_vm13, %v1359_v62, %v1363_v29  ;;  %10127 = vst [vmem:[#allocation12_spill] sm:$0xff] %v7729_v9  ;;  %743 = vst [vmem:[#allocation2 + $0x5c] sm:$0x1] %v742_v46  ;;  %v620_v14 = vor.u32 %v618_v21, %v617_v11  ;;  %v622_v43 = vrot.slane %v617_v11, 4  ;;  %v1133_v5 = vld [vmem:[#allocation2 + $0xb0] sm:$0x1] }
  0xa1   : > { %v6081_v45 = vcombine.low %v1354_v33, %v1364_v31  ;;  %v1543_v56 = vshll.u32 %v7729_v9, 16  ;;  %v1547_v48 = vshrl.u32 %v7729_v9, 16  ;;  %v794_v12 = vsel %vm7211_vm7, %v612_v35, %v793_v19  ;;  %v6999_v34 = vld [vmem:[#allocation2 + $0x8] sm:$0x1]  ;;  %v2137_v47 = vld [vmem:[#allocation2] sm:$0xe]  ;;  %vm7777_vm1 = vmor %vm2185_vm14, %vm2186_vm15 }
  0xa2   : > { %v1062_v50 = vshll.u32 %v1015_v20, 16  ;;  %v621_v62 = vsel %vm7202_vm6, %v613_v37, %v620_v14  ;;  %795 = vst [vmem:[#allocation2 + $0xb4] sm:$0xf] %v794_v12  ;;  %v798_v2 = vsel %vm7219_vm8, %v622_v43, %v797_v36  ;;  %v829_v51 = vld [vmem:[#allocation2 + $0x54] sm:$0x1]  ;;  %v2193_v55 = vrot.slane %v6999_v34, 5 }
  0xa3   : > { %6623 = vmatprep.mubr.msk.bf16.mxu0 %vm1631_vm12, %v6081_v45  ;;  %v968_v57 = vld [vmem:[#allocation2 + $0x54] sm:$0x1]  ;;  %796 = vst.msk [vmem:[#allocation2 + $0xb8] sm:$0xf] %vm689_vm3, %v621_v62  ;;  %799 = vst [vmem:[#allocation2 + $0xbc] sm:$0x1] %v798_v2 }
  0xa4   : > { %v1134_v59 = vsel %vm7256_vm9, %v1062_v50, %v1133_v5  ;;  %v7744_v63 = vld [vmem:[#allocation2 + $0xa8] sm:$0xf]  ;;  %v876_v6 = vshrl.u32 %v829_v51, 16  ;;  %v7748_v28 = vrot.slane %v1543_v56, 5  ;;  %v1549_v58 = vrot.slane %v1547_v48, 4 }
  0xa5   : > { %10128 = vst [vmem:[#allocation13_spill] sm:$0xff] %v7744_v63  ;;  %1135 = vst [vmem:[#allocation2 + $0xb0] sm:$0x1] %v1134_v59  ;;  %v1534_v1 = vshrl.u32 %v7744_v63, 16  ;;  %v1537_v38 = vshll.u32 %v7744_v63, 16  ;;  %v6139_v2 = vrot.slane %v2137_v47, 9 }
  0xa6   : > { %v969_v10 = vsel %vm7219_vm8, %v876_v6, %v968_v57  ;;  %v7752_v21 = vld [vmem:[#allocation2 + $0x58] sm:$0xf]  ;;  %v7754_v19 = vld [vmem:[#allocation2 + $0x4] sm:$0xf]  ;;  %v1550_v11 = vor.u32 %v1549_v58, %v7748_v28  ;;  %vm5907_vm2 = vcmask 58368  }
  0xa7   : > { %v1536_v32 = vrot.slane %v1534_v1, 4  ;;  %v1539_v8 = vrot.slane %v1537_v38, 5  ;;  %970 = vst [vmem:[#allocation2 + $0x54] sm:$0x1] %v969_v10  ;;  %v1008_v18 = vld [vmem:[#allocation2 + $0x5c] sm:$0x1] }
  0xa8   : > { %v1041_v15 = vshll.u32 %v1008_v18, 16  ;;  %v1112_v24 = vld [vmem:[#allocation2 + $0x5c] sm:$0x1]  ;;  %v2190_v0 = vrot.slane %v7754_v19, 5  ;;  %v1375_v61 = vshll.u32 %v7752_v21, 16  ;;  %v1379_v46 = vshrl.u32 %v7752_v21, 16 }
  0xa9   : > { %v1540_v29 = vor.u32 %v1539_v8, %v1536_v32  ;;  %v837_v35 = vld [vmem:[#allocation2 + $0xb4] sm:$0x1]  ;;  %v1551_v51 = vrot.slane %v1550_v11, 4  ;;  %v7796_v11 = vld [vmem:[#allocation2 + $0x1c] sm:$0xf] }
  0xaa   : > { %v992_v37 = vld [vmem:[#allocation2 + $0xb4] sm:$0x1]  ;;  %v1113_v36 = vsel %vm7256_vm9, %v1041_v15, %v1112_v24  ;;  %v916_v33 = vshrl.u32 %v837_v35, 16  ;;  %v1016_v31 = vld [vmem:[#allocation2 + $0xbc] sm:$0x1]  ;;  %v7762_v45 = vrot.slane %v1375_v61, 5 }
  0xab   : > { %v1136_v14 = vld [vmem:[#allocation2 + $0xbc] sm:$0x1]  ;;  %v1541_v43 = vrot.slane %v1540_v29, 4  ;;  %1114 = vst [vmem:[#allocation2 + $0x5c] sm:$0x1] %v1113_v36  ;;  %v1381_v20 = vrot.slane %v1379_v46, 4 }
  0xac   : > { %v1065_v5 = vshll.u32 %v1016_v31, 16  ;;  %v7764_v56 = vld [vmem:[#allocation2 + $0xb8] sm:$0xf]  ;;  %v7766_v48 = vld [vmem:[#allocation2 + $0xb0] sm:$0x1]  ;;  %v993_v12 = vsel %vm7219_vm8, %v916_v33, %v992_v37  ;;  %v2192_v1 = vrot.slane %v2190_v0, 4 }
  0xad   : > { %10129 = vst [vmem:[#allocation14_spill] sm:$0xff] %v7764_v56  ;;  %v1567_v50 = vshll.u32 %v7764_v56, 16  ;;  %v1571_v62 = vshrl.u32 %v7764_v56, 16  ;;  %v1553_v57 = vshll.u32 %v7766_v48, 16  ;;  %994 = vst [vmem:[#allocation2 + $0xb4] sm:$0x1] %v993_v12  ;;  %v1546_v38 = vsel %vm7322_vm13, %v1541_v43, %v7748_v28 }
  0xae   : > { %v1137_v59 = vsel %vm7256_vm9, %v1065_v5, %v1136_v14  ;;  %v7784_v58 = vld [vmem:[#allocation2 + $0x54] sm:$0xf]  ;;  %v1382_v47 = vor.u32 %v1381_v20, %v7762_v45  ;;  %v7791_v15 = vld [vmem:[#allocation2 + $0x10] sm:$0xf]  ;;  %v2191_v28 = vsel %vm7777_vm1, %v6139_v2, %v2190_v0  ;;  %v2138_v29 = vld [vmem:[#allocation2 + $0xc] sm:$0xe]  ;;  %v2194_v36 = vsel %vm7777_vm1, %v2192_v1, %v2193_v55 }
  0xaf   : > { %1138 = vst [vmem:[#allocation2 + $0xbc] sm:$0x1] %v1137_v59  ;;  %v7786_v10 = vrot.slane %v1567_v50, 5  ;;  %v1573_v34 = vrot.slane %v1571_v62, 4  ;;  %v1555_v32 = vrot.slane %v1553_v57, 5  ;;  %v1366_v8 = vshrl.u32 %v7784_v58, 16 }
  0xb0   : > { %v1369_v18 = vshll.u32 %v7784_v58, 16  ;;  %v2197_v24 = vrot.slane %v7791_v15, 5  ;;  %v2204_v61 = vrot.slane %v7796_v11, 5  ;;  %v2139_v33 = vld [vmem:[#allocation2 + $0x18] sm:$0xe]  ;;  %v1383_v12 = vrot.slane %v1382_v47, 4 }
  0xb1   : > { %v1556_v46 = vsel %vm7322_vm13, %v1551_v51, %v1555_v32  ;;  %v1368_v35 = vrot.slane %v1366_v8, 4  ;;  %v7003_v31 = vld [vmem:[#allocation2 + $0x14] sm:$0x1]  ;;  %v1574_v0 = vor.u32 %v1573_v34, %v7786_v10  ;;  %v6140_v62 = vrot.slane %v2138_v29, 9  ;;  %v7004_v29 = vld [vmem:[#allocation2 + $0x20] sm:$0x1] }
  0xb2   : > { %v1371_v37 = vrot.slane %v1369_v18, 5  ;;  %v2200_v14 = vrot.slane %v7003_v31, 5  ;;  %v6089_v43 = vcombine.low %v1546_v38, %v1556_v46  ;;  %v7803_v20 = vld [vmem:[#allocation2 + $0x5c] sm:$0x1]  ;;  %v6156_v51 = vcombine.low %v2191_v28, %v2194_v36  ;;  %v2140_v31 = vld [vmem:[#allocation2 + $0x24] sm:$0xe] }
  0xb3   : > { %v1385_v50 = vshll.u32 %v7803_v20, 16  ;;  %v2199_v57 = vrot.slane %v2197_v24, 4  ;;  %v6141_v55 = vrot.slane %v2139_v33, 9  ;;  %v2206_v59 = vrot.slane %v2204_v61, 4 }
  0xb4   : > { %v1372_v5 = vor.u32 %v1371_v37, %v1368_v35  ;;  %6639 = vmatprep.mubr.msk.bf16.mxu1 %vm1631_vm12, %v6089_v43  ;;  %v7808_v2 = vld [vmem:[#allocation2 + $0xb4] sm:$0xf]  ;;  %v1575_v18 = vrot.slane %v1574_v0, 4  ;;  %v2207_v46 = vrot.slane %v7004_v29, 5  ;;  %v2211_v35 = vrot.slane %v7432_v44, 5 }
  0xb5   : > { %10132 = vst [vmem:[#allocation15_spill] sm:$0xff] %v7808_v2  ;;  %v1387_v32 = vrot.slane %v1385_v50, 5  ;;  %v1558_v8 = vshrl.u32 %v7808_v2, 16  ;;  %v1561_v34 = vshll.u32 %v7808_v2, 16  ;;  %v7821_v43 = vld [vmem:[#allocation2 + $0x68] sm:$0x1]  ;;  %v6107_v29 = vcombine.low %v7006_v16, %v7754_v19 }
  0xb6   : > { %v1373_v1 = vrot.slane %v1372_v5, 4  ;;  %v7810_v38 = vld [vmem:[#allocation2 + $0xbc] sm:$0x1]  ;;  %v2141_v44 = vld [vmem:[#allocation2 + $0x30] sm:$0xe]  ;;  %v2208_v16 = vsel %vm7777_vm1, %v2206_v59, %v2207_v46  ;;  %v6142_v19 = vrot.slane %v2140_v31, 9 }
  0xb7   : > { %v1577_v47 = vshll.u32 %v7810_v38, 16  ;;  %v1388_v37 = vsel %vm7322_vm13, %v1383_v12, %v1387_v32  ;;  %v1560_v36 = vrot.slane %v1558_v8, 4  ;;  %v1563_v33 = vrot.slane %v1561_v34, 5  ;;  %v7009_v31 = vld [vmem:[%s10080_s3 + $0x10] sm:$0xf] }
  0xb8   : > { %v1378_v28 = vsel %vm7322_vm13, %v1373_v1, %v7762_v45  ;;  %v2198_v45 = vsel %vm7777_vm1, %v6140_v62, %v2197_v24  ;;  %v2218_v1 = vrot.slane %v7508_v25, 5  ;;  %v2201_v32 = vsel %vm7777_vm1, %v2199_v57, %v2200_v14  ;;  %v7964_v57 = vld [vmem:[#allocation2 + $0x88] sm:$0xf] }
  0xb9   : > { %v6082_v5 = vcombine.low %v1378_v28, %v1388_v37  ;;  %v1579_v50 = vrot.slane %v1577_v47, 5  ;;  %v1564_v30 = vor.u32 %v1563_v33, %v1560_v36  ;;  %v2205_v8 = vsel %vm7777_vm1, %v6141_v55, %v2204_v61  ;;  %v2142_v28 = vld [vmem:[#allocation2 + $0x3c] sm:$0xe]  ;;  %v7841_v37 = vld [vmem:[#allocation2 + $0xc] sm:$0xf] }
  0xba   : > { %v2213_v62 = vrot.slane %v2211_v35, 4  ;;  %v2214_v47 = vrot.slane %v7476_v60, 5  ;;  %v6108_v14 = vcombine.low %v7841_v37, %v7791_v15  ;;  %v7845_v61 = vld [vmem:[#allocation2 + $0x18] sm:$0xf]  ;;  %v2225_v55 = vrot.slane %v7599_v22, 5 }
  0xbb   : > { %6624 = vmatmul.mubr.msk.bf16.gmra.mxu0 %vm1631_vm12, %v6082_v5  ;;  %v1565_v34 = vrot.slane %v1564_v30, 4  ;;  %v1580_v24 = vsel %vm7322_vm13, %v1575_v18, %v1579_v50  ;;  %v6143_v30 = vrot.slane %v2141_v44, 9  ;;  %v2220_v59 = vrot.slane %v2218_v1, 4  ;;  %v2143_v18 = vld [vmem:[#allocation2 + $0x48] sm:$0xe] }
  0xbc   : > { %6679 = vmatprep.mubr.msk.bf16.mxu0 %vm1631_vm12, %v6156_v51  ;;  %v2221_v60 = vrot.slane %v7563_v40, 5  ;;  %v2232_v46 = vrot.slane %v7663_v42, 5  ;;  %v6157_v33 = vcombine.low %v2198_v45, %v2201_v32  ;;  %v3483_v5 = vsel %vm1680_vm0, %v7009_v31, 0  ;;  %v2144_v44 = vld [vmem:[#allocation2 + $0x54] sm:$0xe] }
  0xbd   : > { %v1570_v51 = vsel %vm7322_vm13, %v1565_v34, %v7786_v10  ;;  %v6158_v50 = vcombine.low %v2205_v8, %v2208_v16  ;;  %v7861_v12 = vsel %vm7777_vm1, %v6142_v19, %v2211_v35  ;;  %v7865_v40 = vsel %vm7777_vm1, %v2213_v62, %v2214_v47  ;;  %v7874_v35 = vld [vmem:[%s10080_s3 + $0x18] sm:$0xf]  ;;  %v7905_v31 = vld [vmem:[#allocation2 + $0x70] sm:$0xf] }
  0xbe   : > { %v6090_v36 = vcombine.low %v1570_v51, %v1580_v24  ;;  %v6144_v10 = vrot.slane %v2142_v28, 9  ;;  %v2239_v34 = vrot.slane %v7752_v21, 5  ;;  %v2227_v45 = vrot.slane %v2225_v55, 4  ;;  %v2145_v51 = vld [vmem:[#allocation2 + $0x60] sm:$0xe] }
  0xbf   : > { %v2228_v32 = vrot.slane %v7651_v27, 5  ;;  %v6145_v24 = vrot.slane %v2143_v18, 9  ;;  %v2235_v8 = vrot.slane %v7709_v4, 5  ;;  %v7879_v16 = vsel %vm7777_vm1, %v6143_v30, %v2218_v1  ;;  %v7010_v4 = vld [vmem:[%s10080_s3 + $0xc] sm:$0xf] }
  0xc0   : > { %6640 = vmatmul.mubr.msk.bf16.gmra.mxu1 %vm1631_vm12, %v6090_v36  ;;  %v7883_v19 = vsel %vm7777_vm1, %v2220_v59, %v2221_v60  ;;  %v2234_v62 = vrot.slane %v2232_v46, 4  ;;  %v6146_v27 = vrot.slane %v2144_v44, 9  ;;  %v2757_v47 = vsel %vm1680_vm0, %v7010_v4, 0  ;;  %v7891_v1 = vld [vmem:[#allocation2 + $0x64] sm:$0xf] }
  0xc1   : > { %6645 = vmatprep.mubr.msk.bf16.mxu1 %vm1631_vm12, %v6107_v29  ;;  %v2241_v28 = vrot.slane %v2239_v34, 4  ;;  %v2242_v29 = vrot.slane %v7803_v20, 5  ;;  %v2246_v30 = vrot.slane %v7891_v1, 5  ;;  %v7895_v59 = vld [vmem:[#allocation2 + $0x28] sm:$0xf]  ;;  %v6159_v36 = vcombine.low %v7861_v12, %v7865_v40 }
  0xc2   : > { %v7897_v60 = vld [vmem:[#allocation2 + $0x24] sm:$0xf]  ;;  %v7912_v44 = vsel %vm7777_vm1, %v6144_v10, %v2225_v55  ;;  %v7916_v4 = vsel %vm7777_vm1, %v2227_v45, %v2228_v32  ;;  %v7924_v40 = vsel %vm7777_vm1, %v6145_v24, %v2232_v46  ;;  %v7932_v55 = vsel %vm7777_vm1, %v6146_v27, %v2239_v34  ;;  %v2147_v45 = vld [vmem:[#allocation2 + $0x78] sm:$0xe]  ;;  %v7937_v32 = vld [vmem:[%s10080_s3 + $0x14] sm:$0xf] }
  0xc3   : > { %6680 = vmatmul.mubr.msk.bf16.vlgmr.msra.gmra.mxu0 %vm1631_vm12, %v6157_v33  ;;  %v2146_v33 = vld [vmem:[#allocation2 + $0x6c] sm:$0xe]  ;;  %v6147_v10 = vrot.slane %v2145_v51, 9  ;;  %v2248_v46 = vrot.slane %v2246_v30, 4  ;;  %v7943_v12 = vld [vmem:[#allocation2 + $0x7c] sm:$0xf]  ;;  %v10133_v15 = vcombine.low %v7845_v61, %v7796_v11 }
  0xc4   : > { %6746 = vmatpush3.bf16.msra.mxu0 %v3483_v5  ;;  %6683 = vmatprep.mubr.msk.bf16.mxu0 %vm1631_vm12, %v6158_v50  ;;  %v2253_v5 = vrot.slane %v7905_v31, 5  ;;  %v6160_v50 = vcombine.low %v7879_v16, %v7883_v19  ;;  %v7928_v16 = vsel %vm7777_vm1, %v2234_v62, %v2235_v8  ;;  %v7941_v19 = vsel %vm7777_vm1, %v2241_v28, %v2242_v29  ;;  %v2148_v62 = vld [vmem:[#allocation2 + $0x84] sm:$0xe]  ;;  %v2151_v34 = vld [vmem:[#allocation2 + $0xa8] sm:$0xe] }
  0xc5   : > { %6924 = vmatprep.subr.msk.bf16.mxu0 %vm1680_vm0, %v7874_v35  ;;  %v6148_v24 = vrot.slane %v2146_v33, 9  ;;  %v2260_v8 = vrot.slane %v7943_v12, 5  ;;  %v7016_v18 = vld [vmem:[#allocation2 + $0x74] sm:$0x1]  ;;  %v7956_v29 = vld [vmem:[#allocation2 + $0x60] sm:$0xf] }
  0xc6   : > { %v2255_v20 = vrot.slane %v2253_v5, 4  ;;  %v2256_v0 = vrot.slane %v7016_v18, 5  ;;  %v7960_v27 = vld [vmem:[#allocation2 + $0x6c] sm:$0xf]  ;;  %v2267_v18 = vrot.slane %v7964_v57, 5  ;;  %v6149_v28 = vrot.slane %v2147_v45, 9 }
  0xc7   : > { %v7977_v33 = vld [vmem:[#allocation2 + $0x78] sm:$0xf]  ;;  %v2262_v61 = vrot.slane %v2260_v8, 4  ;;  %v6150_v45 = vrot.slane %v2148_v62, 9  ;;  %v7022_v51 = vld [vmem:[#allocation2 + $0x8c] sm:$0x1] }
  0xc8   : > { %6646 = vmatmul.mubr.msk.bf16.vlgmr.msra.gmra.mxu1 %vm1631_vm12, %v6108_v14  ;;  %v7975_v14 = vsel %vm7777_vm1, %v6147_v10, %v2246_v30  ;;  %v2150_v30 = vld [vmem:[#allocation2 + $0x9c] sm:$0xe]  ;;  %v2270_v17 = vrot.slane %v7022_v51, 5  ;;  %v2288_v10 = vrot.slane %v7729_v9, 5  ;;  %v2291_v63 = vrot.slane %v7766_v48, 5 }
  0xc9   : > { %6712 = vmatpush3.bf16.msra.mxu1 %v2757_v47  ;;  %6649 = vmatprep.mubr.msk.bf16.mxu1 %vm1631_vm12, %v10133_v15  ;;  %v10134_v47 = vrot.slane %v7821_v43, 5  ;;  %v7021_v15 = vld [vmem:[#allocation2 + $0x80] sm:$0x1]  ;;  %v7995_v43 = vsel %vm7777_vm1, %v6148_v24, %v2253_v5  ;;  %v8007_v5 = vsel %vm7777_vm1, %v6149_v28, %v2260_v8  ;;  %v8009_v24 = vld [vmem:[#allocation2 + $0x84] sm:$0xf]  ;;  %v10136_v48 = vcombine.low %v7897_v60, %v7895_v59 }
  0xca   : > { %v2263_v37 = vrot.slane %v7021_v15, 5  ;;  %6923 = vmatprep.subr.msk.bf16.mxu1 %vm1680_vm0, %v7937_v32  ;;  %v2269_v15 = vrot.slane %v2267_v18, 4  ;;  %v8015_v62 = vld [vmem:[#allocation2 + $0x10] sm:$0xf]  ;;  %v2290_v8 = vrot.slane %v2288_v10, 4 }
  0xcb   : > { %6684 = vmatmul.mubr.msk.bf16.gmra.mxu0 %vm1631_vm12, %v6159_v36  ;;  %v7986_v11 = vsel %vm7777_vm1, %v2248_v46, %v10134_v47  ;;  %v7999_v36 = vsel %vm7777_vm1, %v2255_v20, %v2256_v0  ;;  %v6153_v46 = vrot.slane %v2151_v34, 9  ;;  %v2952_v47 = vld [vmem:[#allocation2 + $0xc] sm:$0xf]  ;;  %10135 = vst [vmem:[#allocation16_spill] sm:$0xff] %v8015_v62  ;;  %v2274_v34 = vrot.slane %v7552_v3, 5 }
  0xcc   : > { %6687 = vmatprep.mubr.msk.bf16.mxu0 %vm1631_vm12, %v6160_v50  ;;  %v8026_v28 = vsel %vm7777_vm1, %v2262_v61, %v2263_v37  ;;  %v8030_v0 = vsel %vm7777_vm1, %v6150_v45, %v2267_v18  ;;  %v6151_v20 = vrot.slane %v2149_v26, 9  ;;  %v6152_v50 = vrot.slane %v2150_v30, 9  ;;  %v2955_v30 = vld [vmem:[#allocation2 + $0x18] sm:$0xf]  ;;  %v2958_v26 = vld [vmem:[#allocation2 + $0x24] sm:$0xf] }
  0xcd   : > { %v8022_v51 = vsel %vm7777_vm1, %v6153_v46, %v2288_v10  ;;  %v8038_v46 = vsel %vm7777_vm1, %v2269_v15, %v2270_v17  ;;  %v8042_v10 = vsel %vm7777_vm1, %v2290_v8, %v2291_v63  ;;  %v3001_v37 = vshrl.u32 %v2952_v47, 16 }
  0xce   : > { %10137 = vst [vmem:[#allocation17_spill] sm:$0xff] %v8042_v10  ;;  %v3004_v61 = vshll.u32 %v2952_v47, 16  ;;  %v10138_v18 = vcombine.low %v7550_v23, %v7508_v25  ;;  %v3010_v17 = vshll.u32 %v8015_v62, 16  ;;  %v3014_v60 = vshrl.u32 %v8015_v62, 16  ;;  %v2959_v62 = vld [vmem:[#allocation2 + $0x28] sm:$0xf] }
  0xcf   : > { %v10139_v63 = vcombine.low %v7912_v44, %v7916_v4  ;;  %v2276_v23 = vrot.slane %v2274_v34, 4  ;;  %v2277_v45 = vrot.slane %v7620_v53, 5  ;;  %v2281_v47 = vrot.slane %v7615_v49, 5  ;;  %v2961_v10 = vld [vmem:[#allocation2 + $0x30] sm:$0xf] }
  0xd0   : > { %6650 = vmatmul.mubr.msk.bf16.gmra.mxu1 %vm1631_vm12, %v10136_v48  ;;  %v10140_v15 = vcombine.low %v7924_v40, %v7928_v16  ;;  %v2284_v4 = vrot.slane %v7670_v52, 5  ;;  %v2295_v8 = vrot.slane %v7764_v56, 5  ;;  %v8074_v53 = vsel %vm7777_vm1, %v6151_v20, %v2274_v34  ;;  %v2152_v16 = vld [vmem:[#allocation2 + $0xb4] sm:$0xe] }
  0xd1   : > { %6653 = vmatprep.mubr.msk.bf16.mxu1 %vm1631_vm12, %v10138_v18  ;;  %v2954_v18 = vld [vmem:[#allocation2 + $0x14] sm:$0x1]  ;;  %v8078_v40 = vsel %vm7777_vm1, %v6152_v50, %v2281_v47  ;;  %v3006_v59 = vrot.slane %v3004_v61, 5  ;;  %v8080_v48 = vrot.slane %v3010_v17, 5  ;;  %v3016_v44 = vrot.slane %v3014_v60, 4 }
  0xd2   : > { %v3025_v52 = vshrl.u32 %v2955_v30, 16  ;;  %v3028_v25 = vshll.u32 %v2955_v30, 16  ;;  %v8084_v56 = vsel %vm7777_vm1, %v2276_v23, %v2277_v45  ;;  %v2283_v20 = vrot.slane %v2281_v47, 4  ;;  %v2957_v47 = vld [vmem:[#allocation2 + $0x20] sm:$0x1] }
  0xd3   : > { %6688 = vmatmul.mubr.msk.bf16.gmra.mxu0 %vm1631_vm12, %v10139_v63  ;;  %v2956_v63 = vld [vmem:[#allocation2 + $0x1c] sm:$0xf]  ;;  %v6154_v9 = vrot.slane %v2152_v16, 9  ;;  %v2297_v50 = vrot.slane %v2295_v8, 4  ;;  %v2298_v49 = vrot.slane %v7810_v38, 5  ;;  %v10141_v61 = vcombine.low %v7639_v13, %v7599_v22 }
  0xd4   : > { %6691 = vmatprep.mubr.msk.bf16.mxu0 %vm1631_vm12, %v10140_v15  ;;  %v3003_v15 = vrot.slane %v3001_v37, 4  ;;  %v3034_v34 = vshll.u32 %v2956_v63, 16  ;;  %v3038_v2 = vshrl.u32 %v2956_v63, 16  ;;  %v3049_v37 = vshrl.u32 %v2958_v26, 16 }
  0xd5   : > { %v3020_v60 = vshll.u32 %v2954_v18, 16  ;;  %v3052_v30 = vshll.u32 %v2958_v26, 16  ;;  %v3058_v41 = vshll.u32 %v2959_v62, 16  ;;  %v10142_v23 = vcombine.low %v7693_v39, %v7663_v42 }
  0xd6   : > { %v3007_v17 = vor.u32 %v3006_v59, %v3003_v15  ;;  %v3017_v45 = vor.u32 %v3016_v44, %v8080_v48  ;;  %v3027_v38 = vrot.slane %v3025_v52, 4  ;;  %v3030_v63 = vrot.slane %v3028_v25, 5  ;;  %v2960_v59 = vld [vmem:[#allocation2 + $0x2c] sm:$0x1] }
  0xd7   : > { %v3062_v16 = vshrl.u32 %v2959_v62, 16  ;;  %v10143_v22 = vcombine.low %v7932_v55, %v7941_v19  ;;  %v8100_v13 = vrot.slane %v3034_v34, 5  ;;  %v3040_v26 = vrot.slane %v3038_v2, 4  ;;  %v8112_v19 = vld [vmem:[#allocation2 + $0x34] sm:$0xf] }
  0xd8   : > { %6654 = vmatmul.mubr.msk.bf16.gmra.mxu1 %vm1631_vm12, %v10141_v61  ;;  %v3051_v18 = vrot.slane %v3049_v37, 4  ;;  %v3054_v15 = vrot.slane %v3052_v30, 5  ;;  %v10144_v42 = vcombine.low %v7975_v14, %v7986_v11  ;;  %v8108_v39 = vsel %vm7777_vm1, %v2283_v20, %v2284_v4 }
  0xd9   : > { %6657 = vmatprep.mubr.msk.bf16.mxu1 %vm1631_vm12, %v10142_v23  ;;  %v8110_v62 = vrot.slane %v3058_v41, 5  ;;  %v3064_v55 = vrot.slane %v3062_v16, 4  ;;  %v3073_v25 = vshrl.u32 %v2961_v10, 16  ;;  %v8116_v2 = vsel %vm7777_vm1, %v6154_v9, %v2295_v8  ;;  %v2964_v41 = vld [vmem:[#allocation2 + $0x3c] sm:$0xf] }
  0xda   : > { %v8120_v44 = vsel %vm7777_vm1, %v2297_v50, %v2298_v49  ;;  %v3022_v14 = vrot.slane %v3020_v60, 5  ;;  %v3076_v11 = vshll.u32 %v2961_v10, 16  ;;  %v3008_v52 = vrot.slane %v3007_v17, 4 }
  0xdb   : > { %6692 = vmatmul.mubr.msk.bf16.gmra.mxu0 %vm1631_vm12, %v10143_v22  ;;  %v3018_v34 = vrot.slane %v3017_v45, 4  ;;  %v3031_v4 = vor.u32 %v3030_v63, %v3027_v38  ;;  %v3044_v20 = vshll.u32 %v2957_v47, 16  ;;  %v3041_v37 = vor.u32 %v3040_v26, %v8100_v13 }
  0xdc   : > { %6695 = vmatprep.mubr.msk.bf16.mxu0 %vm1631_vm12, %v10144_v42  ;;  %v3055_v61 = vor.u32 %v3054_v15, %v3051_v18  ;;  %v3068_v30 = vshll.u32 %v2960_v59, 16  ;;  %v3082_v23 = vshll.u32 %v8112_v19, 16  ;;  %v3065_v9 = vor.u32 %v3064_v55, %v8110_v62  ;;  %v2967_v59 = vld [vmem:[#allocation2 + $0x48] sm:$0xf]  ;;  %v8155_v15 = vld [vmem:[#allocation2 + $0x38] sm:$0x1] }
  0xdd   : > { %v3075_v8 = vrot.slane %v3073_v25, 4  ;;  %v3078_v16 = vrot.slane %v3076_v11, 5  ;;  %v3086_v49 = vshrl.u32 %v8112_v19, 16  ;;  %v10145_v10 = vcombine.low %v7784_v58, %v7752_v21 }
  0xde   : > { %v6168_v50 = vcombine.low %v8074_v53, %v8084_v56  ;;  %v6169_v17 = vcombine.low %v8078_v40, %v8108_v39  ;;  %v3097_v60 = vshrl.u32 %v2964_v41, 16  ;;  %v3100_v45 = vshll.u32 %v2964_v41, 16  ;;  %v8145_v53 = vld [vmem:[#allocation2 + $0x40] sm:$0xf] }
  0xdf   : > { %v10146_v47 = vcombine.low %v7956_v29, %v7891_v1  ;;  %v6171_v38 = vcombine.low %v8116_v2, %v8120_v44  ;;  %v3013_v21 = vsel %vm7322_vm13, %v3008_v52, %v8080_v48  ;;  %v3023_v56 = vsel %vm7322_vm13, %v3018_v34, %v3022_v14 }
  0xe0   : > { %6658 = vmatmul.mubr.msk.bf16.gmra.mxu1 %vm1631_vm12, %v10145_v10  ;;  %v3046_v58 = vrot.slane %v3044_v20, 5  ;;  %v10147_v63 = vcombine.low %v7995_v43, %v7999_v36  ;;  %v3032_v1 = vrot.slane %v3031_v4, 4  ;;  %v3042_v29 = vrot.slane %v3041_v37, 4 }
  0xe1   : > { %6661 = vmatprep.mubr.msk.bf16.mxu1 %vm1631_vm12, %v10146_v47  ;;  %v3056_v22 = vrot.slane %v3055_v61, 4  ;;  %v3070_v26 = vrot.slane %v3068_v30, 5  ;;  %v10148_v18 = vcombine.low %v8007_v5, %v8026_v28  ;;  %v3066_v48 = vrot.slane %v3065_v9, 4  ;;  %v8169_v28 = vld [vmem:[#allocation2 + $0x4c] sm:$0xf] }
  0xe2   : > { %v3079_v42 = vor.u32 %v3078_v16, %v3075_v8  ;;  %v8157_v55 = vrot.slane %v3082_v23, 5  ;;  %v3088_v25 = vrot.slane %v3086_v49, 4  ;;  %v3099_v43 = vrot.slane %v3097_v60, 4  ;;  %v8187_v9 = vld [vmem:[#allocation2 + $0x44] sm:$0x1] }
  0xe3   : > { %6696 = vmatmul.mubr.msk.bf16.gmra.mxu0 %vm1631_vm12, %v10147_v63  ;;  %v3102_v36 = vrot.slane %v3100_v45, 5  ;;  %v3106_v14 = vshll.u32 %v8145_v53, 16  ;;  %v3110_v11 = vshrl.u32 %v8145_v53, 16  ;;  %v8163_v52 = vsel %vm1680_vm0, %v7937_v32, 0  ;;  %v2970_v8 = vld [vmem:[#allocation2 + $0x54] sm:$0xf] }
  0xe4   : > { %6699 = vmatprep.mubr.msk.bf16.mxu0 %vm1631_vm12, %v10148_v18  ;;  %v8167_v5 = vsel %vm1680_vm0, %v7874_v35, 0  ;;  %v3121_v34 = vshrl.u32 %v2967_v59, 16  ;;  %v3124_v4 = vshll.u32 %v2967_v59, 16  ;;  %v8171_v20 = vcombine.low %v3013_v21, %v3023_v56  ;;  %v8196_v60 = vld [vmem:[#allocation2 + $0x58] sm:$0xf] }
  0xe5   : > { %v3037_v41 = vsel %vm7322_vm13, %v3032_v1, %v8100_v13  ;;  %v3047_v37 = vsel %vm7322_vm13, %v3042_v29, %v3046_v58  ;;  %v3092_v32 = vshll.u32 %v8155_v15, 16  ;;  %v3061_v35 = vsel %vm7322_vm13, %v3056_v22, %v8110_v62  ;;  %v2973_v22 = vld [vmem:[#allocation2 + $0x60] sm:$0xf]  ;;  %v8215_v18 = vld [vmem:[#allocation2 + $0x64] sm:$0xf] }
  0xe6   : > { %v3071_v61 = vsel %vm7322_vm13, %v3066_v48, %v3070_v26  ;;  %v8184_v30 = vrot.slane %v3079_v42, 4  ;;  %v3089_v23 = vor.u32 %v3088_v25, %v8157_v55  ;;  %v10149_v13 = vcombine.low %v7960_v27, %v7905_v31 }
  0xe7   : > { %v3103_v16 = vor.u32 %v3102_v36, %v3099_v43  ;;  %v8193_v49 = vrot.slane %v3106_v14, 5  ;;  %v3112_v10 = vrot.slane %v3110_v11, 4  ;;  %v3130_v62 = vshll.u32 %v8169_v28, 16 }
  0xe8   : > { %6662 = vmatmul.mubr.msk.bf16.gmra.mxu1 %vm1631_vm12, %v10149_v13  ;;  %v10150_v45 = vcombine.low %v7977_v33, %v7943_v12  ;;  %v8202_v47 = vcombine.low %v3037_v41, %v3047_v37  ;;  %v3123_v21 = vrot.slane %v3121_v34, 4  ;;  %v3126_v56 = vrot.slane %v3124_v4, 5  ;;  %v8228_v4 = vld [vmem:[#allocation2 + $0x68] sm:$0x1]  ;;  %v2976_v37 = vld [vmem:[#allocation2 + $0x6c] sm:$0xf] }
  0xe9   : > { %v3134_v31 = vshrl.u32 %v8169_v28, 16  ;;  %v10151_v27 = vcombine.low %v8030_v0, %v8038_v46  ;;  %v8209_v58 = vcombine.low %v3061_v35, %v3071_v61  ;;  %v3094_v63 = vrot.slane %v3092_v32, 5  ;;  %v8236_v61 = vld [vmem:[#allocation2 + $0x5c] sm:$0x1] }
  0xea   : > { %6665 = vmatprep.mubr.msk.bf16.mxu1 %vm1631_vm12, %v10150_v45  ;;  %v3145_v1 = vshrl.u32 %v2970_v8, 16  ;;  %v3148_v29 = vshll.u32 %v2970_v8, 16  ;;  %v3090_v12 = vrot.slane %v3089_v23, 4  ;;  %v3116_v33 = vshll.u32 %v8187_v9, 16  ;;  %v8246_v45 = vld [vmem:[#allocation2 + $0x70] sm:$0xf] }
  0xeb   : > { %6700 = vmatmul.mubr.msk.bf16.gmra.mxu0 %vm1631_vm12, %v10151_v27  ;;  %v3154_v26 = vshll.u32 %v8196_v60, 16  ;;  %v3158_v59 = vshrl.u32 %v8196_v60, 16  ;;  %v3085_v0 = vsel %vm7322_vm13, %v8184_v30, %v8157_v55  ;;  %v8221_v46 = vrot.slane %v3103_v16, 4 }
  0xec   : > { %6703 = vmatprep.mubr.msk.bf16.mxu0 %vm1631_vm12, %v6168_v50  ;;  %v3113_v48 = vor.u32 %v3112_v10, %v8193_v49  ;;  %v8224_v42 = vrot.slane %v3130_v62, 5  ;;  %v8226_v50 = vld [vmem:[#allocation2 + $0x50] sm:$0x1]  ;;  %v3127_v25 = vor.u32 %v3126_v56, %v3123_v21  ;;  %v3136_v43 = vrot.slane %v3134_v31, 4 }
  0xed   : > { %v3169_v36 = vshrl.u32 %v2973_v22, 16  ;;  %v3172_v14 = vshll.u32 %v2973_v22, 16  ;;  %v3147_v11 = vrot.slane %v3145_v1, 4  ;;  %v3150_v34 = vrot.slane %v3148_v29, 5 }
  0xee   : > { %v3178_v41 = vshll.u32 %v8215_v18, 16  ;;  %v3182_v55 = vshrl.u32 %v8215_v18, 16  ;;  %v3095_v32 = vsel %vm7322_vm13, %v3090_v12, %v3094_v63  ;;  %v8234_v35 = vrot.slane %v3116_v33, 5 }
  0xef   : > { %v8238_v30 = vrot.slane %v3154_v26, 5  ;;  %v3160_v23 = vrot.slane %v3158_v59, 4  ;;  %v10152_v8 = vcombine.low %v8009_v24, %v7964_v57  ;;  %v3171_v13 = vrot.slane %v3169_v36, 4  ;;  %v8278_v59 = vld [vmem:[#allocation2 + $0x74] sm:$0x1] }
  0xf0   : > { %v3174_v16 = vrot.slane %v3172_v14, 5  ;;  %v8244_v10 = vrot.slane %v3178_v41, 5  ;;  %v3184_v62 = vrot.slane %v3182_v55, 4  ;;  %v10153_v21 = vcombine.low %v7587_v7, %v7552_v3  ;;  %v10154_v7 = vld [vmem:[#allocation17_spill] sm:$0xff]  ;;  %v8292_v55 = vld [vmem:[#allocation2 + $0x7c] sm:$0xf] }
  0xf1   : > { %6666 = vmatmul.mubr.msk.bf16.gmra.mxu1 %vm1631_vm12, %v10152_v8  ;;  %v3137_v56 = vor.u32 %v3136_v43, %v8224_v42  ;;  %v3140_v31 = vshll.u32 %v8226_v50, 16  ;;  %v3193_v27 = vshrl.u32 %v2976_v37, 16  ;;  %v3196_v57 = vshll.u32 %v2976_v37, 16  ;;  %v2979_v14 = vld [vmem:[#allocation2 + $0x78] sm:$0xf] }
  0xf2   : > { %6669 = vmatprep.mubr.msk.bf16.mxu1 %vm1631_vm12, %v10153_v21  ;;  %v8258_v24 = vrot.slane %v3113_v48, 4  ;;  %v8260_v63 = vrot.slane %v3127_v25, 4  ;;  %v3151_v1 = vor.u32 %v3150_v34, %v3147_v11  ;;  %v3164_v3 = vshll.u32 %v8236_v61, 16 }
  0xf3   : > { %6704 = vmatmul.mubr.msk.bf16.gmra.mxu0 %vm1631_vm12, %v6169_v17  ;;  %v10155_v29 = vcombine.low %v8022_v51, %v10154_v7  ;;  %v3161_v22 = vor.u32 %v3160_v23, %v8238_v30  ;;  %v3188_v12 = vshll.u32 %v8228_v4, 16  ;;  %v3202_v40 = vshll.u32 %v8246_v45, 16 }
  0xf4   : > { %v3206_v39 = vshrl.u32 %v8246_v45, 16  ;;  %v8271_v17 = vcombine.low %v3085_v0, %v3095_v32  ;;  %v3109_v33 = vsel %vm7322_vm13, %v8221_v46, %v8193_v49  ;;  %v3175_v26 = vor.u32 %v3174_v16, %v3171_v13  ;;  %v2982_v13 = vld [vmem:[#allocation2 + $0x84] sm:$0xf] }
  0xf5   : > { %6707 = vmatprep.mubr.msk.bf16.mxu0 %vm1631_vm12, %v10155_v29  ;;  %v3185_v51 = vor.u32 %v3184_v62, %v8244_v10  ;;  %v8280_v48 = vrot.slane %v3137_v56, 4  ;;  %v8282_v25 = vrot.slane %v3140_v31, 5  ;;  %v3195_v43 = vrot.slane %v3193_v27, 4  ;;  %v10156_v16 = vld [vmem:[#allocation11_spill] sm:$0xff]  ;;  %v10157_v62 = vld [vmem:[#allocation10_spill] sm:$0xff] }
  0xf6   : > { %v3198_v36 = vrot.slane %v3196_v57, 5  ;;  %v3119_v0 = vsel %vm7322_vm13, %v8258_v24, %v8234_v35  ;;  %v3133_v11 = vsel %vm7322_vm13, %v8260_v63, %v8224_v42  ;;  %v3152_v34 = vrot.slane %v3151_v1, 4  ;;  %v8301_v27 = vld [vmem:[#allocation2 + $0x88] sm:$0xf]  ;;  %v10159_v57 = vld [vmem:[#allocation13_spill] sm:$0xff]  ;;  %v10160_v24 = vld [vmem:[#allocation12_spill] sm:$0xff] }
  0xf7   : > { %v3166_v41 = vrot.slane %v3164_v3, 5  ;;  %v3162_v37 = vrot.slane %v3161_v22, 4  ;;  %v3190_v32 = vrot.slane %v3188_v12, 5  ;;  %v8294_v23 = vrot.slane %v3202_v40, 5 }
  0xf8   : > { %v3208_v8 = vrot.slane %v3206_v39, 4  ;;  %v10158_v21 = vcombine.low %v10156_v16, %v10157_v62  ;;  %v3176_v35 = vrot.slane %v3175_v26, 4  ;;  %v3186_v56 = vrot.slane %v3185_v51, 4  ;;  %v2985_v26 = vld [vmem:[#allocation2 + $0x90] sm:$0xf] }
  0xf9   : > { %v3212_v31 = vshll.u32 %v8278_v59, 16  ;;  %v3217_v42 = vshrl.u32 %v2979_v14, 16  ;;  %v10161_v63 = vcombine.low %v10159_v57, %v10160_v24  ;;  %v3143_v1 = vsel %vm7322_vm13, %v8280_v48, %v8282_v25 }
  0xfa   : > { %6670 = vmatmul.mubr.msk.bf16.gmra.mxu1 %vm1631_vm12, %v10158_v21  ;;  %v3199_v3 = vor.u32 %v3198_v36, %v3195_v43  ;;  %v3220_v7 = vshll.u32 %v2979_v14, 16  ;;  %v3226_v29 = vshll.u32 %v8292_v55, 16  ;;  %v3157_v22 = vsel %vm7322_vm13, %v3152_v34, %v8238_v30  ;;  %v8332_v36 = vld [vmem:[#allocation2 + $0x80] sm:$0x1] }
  0xfb   : > { %6673 = vmatprep.mubr.msk.bf16.mxu1 %vm1631_vm12, %v10161_v63  ;;  %6708 = vmatmul.mubr.msk.bf16.gmra.mxu0 %vm1631_vm12, %v6171_v38  ;;  %v3230_v12 = vshrl.u32 %v8292_v55, 16  ;;  %v3241_v40 = vshrl.u32 %v2982_v13, 16  ;;  %v3244_v39 = vshll.u32 %v2982_v13, 16  ;;  %v3167_v51 = vsel %vm7322_vm13, %v3162_v37, %v3166_v41  ;;  %v6967_v38 = vld [vmem:[#allocation2 + $0xc] sm:$0xff]   ;;  %v8336_v37 = vld [vmem:[#allocation2 + $0x94] sm:$0xf] }
  0xfc   : > { %6747 = vmatprep.mubr.msk.bf16.mxu0 %vm1631_vm12, %v8171_v20  ;;  %v3209_v48 = vor.u32 %v3208_v8, %v8294_v23  ;;  %v3250_v2 = vshll.u32 %v8301_v27, 16  ;;  %v3254_v44 = vshrl.u32 %v8301_v27, 16  ;;  %v3181_v30 = vsel %vm7322_vm13, %v3176_v35, %v8244_v10  ;;  %v8339_v35 = vld [vmem:[#allocation2 + $0x8c] sm:$0x1] }
  0xfd   : > { %v3191_v25 = vsel %vm7322_vm13, %v3186_v56, %v3190_v32  ;;  %v3214_v43 = vrot.slane %v3212_v31, 5  ;;  %v3219_v20 = vrot.slane %v3217_v42, 4  ;;  %v3200_v14 = vrot.slane %v3199_v3, 4  ;;  %v10162_v31 = vld [vmem:[#allocation15_spill] sm:$0xff]  ;;  %v10163_v42 = vld [vmem:[#allocation14_spill] sm:$0xff] }
  0xfe   : > { %v3222_v34 = vrot.slane %v3220_v7, 5  ;;  %v8334_v41 = vrot.slane %v3226_v29, 5  ;;  %v3265_v8 = vshrl.u32 %v2985_v26, 16  ;;  %v3232_v13 = vrot.slane %v3230_v12, 4 }
  0xff   : > { %v3243_v16 = vrot.slane %v3241_v40, 4  ;;  %v3246_v62 = vrot.slane %v3244_v39, 5  ;;  %v3268_v21 = vshll.u32 %v2985_v26, 16  ;;  %v3210_v57 = vrot.slane %v3209_v48, 4  ;;  %v2988_v48 = vld [vmem:[#allocation2 + $0x9c] sm:$0xf] }
 0x100   : > { %v3236_v10 = vshll.u32 %v8332_v36, 16  ;;  %v8341_v32 = vrot.slane %v3250_v2, 5  ;;  %v3256_v56 = vrot.slane %v3254_v44, 4  ;;  %v10164_v24 = vcombine.low %v10162_v31, %v10163_v42  ;;  %v8362_v2 = vld [vmem:[%s10080_s3 + $0x20] sm:$0xf] }
 0x101   : > { %v3267_v63 = vrot.slane %v3265_v8, 4  ;;  %v3270_v3 = vrot.slane %v3268_v21, 5  ;;  %v3274_v7 = vshll.u32 %v8336_v37, 16  ;;  %v3278_v29 = vshrl.u32 %v8336_v37, 16  ;;  %10165 = vst [vmem:[#allocation17_spill] sm:$0xff] %v8362_v2 }
 0x102   : > { %6674 = vmatmul.mubr.msk.bf16.gmra.mxu1 %vm1631_vm12, %v10164_v24  ;;  %v6226_v12 = vcombine.low %v3109_v33, %v3119_v0  ;;  %v8355_v40 = vcombine.low %v3133_v11, %v3143_v1  ;;  %v8357_v39 = vcombine.low %v3157_v22, %v3167_v51  ;;  %v3223_v26 = vor.u32 %v3222_v34, %v3219_v20  ;;  %v8370_v33 = vld [vmem:[#allocation2 + $0xa0] sm:$0xf]  ;;  %v8383_v22 = vld [vmem:[#allocation2 + $0x98] sm:$0x1]  ;;  %v2991_v51 = vld [vmem:[#allocation2 + $0xa8] sm:$0xf] }
 0x103   : > { %6713 = vmatprep.mubr.msk.bf16.mxu1 %vm1631_vm12, %v6967_v38  ;;  %6748 = vmatmul.mubr.msk.bf16.vlgmr.msra.gmra.mxu0 %vm1631_vm12, %v8202_v47  ;;  %v8366_v44 = vcombine.low %v3181_v30, %v3191_v25  ;;  %v3233_v38 = vor.u32 %v3232_v13, %v8334_v41  ;;  %v3247_v49 = vor.u32 %v3246_v62, %v3243_v16  ;;  %v3260_v46 = vshll.u32 %v8339_v35, 16  ;;  %v6968_v30 = vld [vmem:[#allocation2 + $0x18] sm:$0xff]   ;;  %v8387_v34 = vld [vmem:[#allocation2 + $0xac] sm:$0xf] }
 0x104   : > { %10166 = vst [vmem:[#allocation11_spill] sm:$0xff] %v8370_v33  ;;  %6814 = vmatpush3.bf16.msra.mxu0 %v8167_v5  ;;  %6751 = vmatprep.mubr.msk.bf16.mxu0 %vm1631_vm12, %v8209_v58  ;;  %v3205_v0 = vsel %vm7322_vm13, %v3200_v14, %v8294_v23  ;;  %v3215_v47 = vsel %vm7322_vm13, %v3210_v57, %v3214_v43  ;;  %v8380_v11 = vrot.slane %v3236_v10, 5  ;;  %10167 = vst [vmem:[#allocation10_spill] sm:$0xff] %v8383_v22  ;;  %v6969_v23 = vld [vmem:[#allocation2 + $0x24] sm:$0xff]   ;;  %v8408_v24 = vld [vmem:[%s10080_s3 + $0x1c] sm:$0xf] }
 0x105   : > { %v3257_v1 = vor.u32 %v3256_v56, %v8341_v32  ;;  %v3271_v25 = vor.u32 %v3270_v3, %v3267_v63  ;;  %v8385_v5 = vrot.slane %v3274_v7, 5  ;;  %v3280_v20 = vrot.slane %v3278_v29, 4  ;;  %10168 = vst [vmem:[#allocation13_spill] sm:$0xff] %v8387_v34  ;;  %6926 = vmatprep.subr.msk.bf16.mxu0 %vm1680_vm0, %v8362_v2  ;;  %10169 = vst [vmem:[#allocation12_spill] sm:$0xff] %v8408_v24 }
 0x106   : > { %v3289_v58 = vshrl.u32 %v2988_v48, 16  ;;  %v8391_v43 = vrot.slane %v3223_v26, 4  ;;  %v3292_v14 = vshll.u32 %v2988_v48, 16  ;;  %v3298_v8 = vshll.u32 %v8370_v33, 16  ;;  %v8418_v26 = vld [vmem:[#allocation2 + $0xa4] sm:$0x1] }
 0x107   : > { %v3302_v13 = vshrl.u32 %v8370_v33, 16  ;;  %v8395_v16 = vcombine.low %v3205_v0, %v3215_v47  ;;  %v8397_v62 = vrot.slane %v3233_v38, 4  ;;  %v8399_v21 = vrot.slane %v3247_v49, 4  ;;  %10170 = vst [vmem:[#allocation15_spill] sm:$0xff] %v8418_v26 }
 0x108   : > { %v8401_v57 = vrot.slane %v3260_v46, 5  ;;  %v3284_v10 = vshll.u32 %v8383_v22, 16  ;;  %v3313_v56 = vshrl.u32 %v2991_v51, 16  ;;  %v3316_v31 = vshll.u32 %v2991_v51, 16  ;;  %v267_v51 = vld [vmem:[%s7186_s9 + $0xf0] sm:$0xff] }
 0x109   : > { %v3322_v42 = vshll.u32 %v8387_v34, 16  ;;  %v8411_v63 = vrot.slane %v3257_v1, 4  ;;  %v8413_v3 = vrot.slane %v3271_v25, 4  ;;  %v3281_v7 = vor.u32 %v3280_v20, %v8385_v5  ;;  %v8437_v1 = vld [vmem:[#allocation2 + $0xb0] sm:$0x1] }
 0x10a   : > { %6714 = vmatmul.mubr.msk.bf16.vlgmr.msra.gmra.mxu1 %vm1631_vm12, %v6968_v30  ;;  %v3291_v29 = vrot.slane %v3289_v58, 4  ;;  %v3294_v48 = vrot.slane %v3292_v14, 5  ;;  %v8420_v38 = vrot.slane %v3298_v8, 5  ;;  %v3304_v49 = vrot.slane %v3302_v13, 4  ;;  %10171 = vst [vmem:[#allocation14_spill] sm:$0xff] %v8437_v1  ;;  %v268_v30 = vld [vmem:[%s7186_s9 + $0xf8] sm:$0xff] }
 0x10b   : > { %6780 = vmatpush3.bf16.msra.mxu1 %v8163_v52  ;;  %6717 = vmatprep.mubr.msk.bf16.mxu1 %vm1631_vm12, %v6969_v23  ;;  %v3326_v46 = vshrl.u32 %v8387_v34, 16  ;;  %v3318_v25 = vrot.slane %v3316_v31, 5  ;;  %v8444_v20 = vrot.slane %v3322_v42, 5  ;;  %v2994_v23 = vld [vmem:[#allocation2 + $0xb4] sm:$0xf]  ;;  %v3263_v8 = vsel %vm7322_vm13, %v8411_v63, %v8401_v57 }
 0x10c   : > { %6752 = vmatmul.mubr.msk.bf16.gmra.mxu0 %vm1631_vm12, %v8271_v17  ;;  %6925 = vmatprep.subr.msk.bf16.mxu1 %vm1680_vm0, %v8408_v24  ;;  %v3315_v17 = vrot.slane %v3313_v56, 4  ;;  %v6970_v14 = vld [vmem:[#allocation2 + $0x30] sm:$0xff]   ;;  %v8450_v13 = vrot.slane %v3281_v7, 4  ;;  %v8452_v47 = vrot.slane %v3284_v10, 5  ;;  %v3308_v0 = vshll.u32 %v8418_v26, 16 }
 0x10d   : > { %6755 = vmatprep.mubr.msk.bf16.mxu0 %vm1631_vm12, %v6226_v12  ;;  %v3328_v58 = vrot.slane %v3326_v46, 4  ;;  %v8455_v52 = vld [vmem:[#allocation2 + $0xb8] sm:$0xf]  ;;  %v6971_v12 = vld [vmem:[#allocation2 + $0x3c] sm:$0xff]   ;;  %v3277_v56 = vsel %vm7322_vm13, %v8413_v3, %v8385_v5  ;;  %v3295_v31 = vor.u32 %v3294_v48, %v3291_v29  ;;  %v3305_v42 = vor.u32 %v3304_v49, %v8420_v38 }
 0x10e   : > { %10172 = vst [vmem:[#allocation18_spill] sm:$0xff] %v8455_v52  ;;  %v3332_v46 = vshll.u32 %v8437_v1, 16  ;;  %v3337_v57 = vshrl.u32 %v2994_v23, 16  ;;  %v3340_v63 = vshll.u32 %v2994_v23, 16  ;;  %v6454_v7 = vpack.c.bf16 %v267_v51, %v267_v51  ;;  %v8468_v51 = vld [vmem:[#allocation2 + $0xbc] sm:$0x1] }
 0x10f   : > { %v6455_v10 = vpack.c.bf16 %v268_v30, %v268_v30  ;;  %v3319_v24 = vor.u32 %v3318_v25, %v3315_v17  ;;  %v3329_v2 = vor.u32 %v3328_v58, %v8444_v20  ;;  %v3346_v34 = vshll.u32 %v8455_v52, 16 }
 0x110   : > { %v3350_v26 = vshrl.u32 %v8455_v52, 16  ;;  %v3310_v33 = vrot.slane %v3308_v0, 5  ;;  %v624_v5 = vshrl.u32 %v6454_v7, 16  ;;  %v627_v3 = vshll.u32 %v6454_v7, 16 }
 0x111   : > { %v632_v29 = vshrl.u32 %v6455_v10, 16  ;;  %v3296_v48 = vrot.slane %v3295_v31, 4  ;;  %v3306_v49 = vrot.slane %v3305_v42, 4  ;;  %v3334_v23 = vrot.slane %v3332_v46, 5  ;;  %v819_v42 = vld [vmem:[#allocation2 + $0xd4] sm:$0x1] }
 0x112   : > { %6718 = vmatmul.mubr.msk.bf16.gmra.mxu1 %vm1631_vm12, %v6970_v14  ;;  %v635_v30 = vshll.u32 %v6455_v10, 16  ;;  %v3339_v17 = vrot.slane %v3337_v57, 4  ;;  %v3342_v25 = vrot.slane %v3340_v63, 5  ;;  %v626_v58 = vrot.slane %v624_v5, 7  ;;  %v800_v14 = vld [vmem:[#allocation2 + $0xc0] sm:$0xf] }
 0x113   : > { %6721 = vmatprep.mubr.msk.bf16.mxu1 %vm1631_vm12, %v6971_v12  ;;  %v634_v52 = vrot.slane %v632_v29, 7  ;;  %v3320_v0 = vrot.slane %v3319_v24, 4  ;;  %v3330_v7 = vrot.slane %v3329_v2, 4  ;;  %v8474_v12 = vrot.slane %v3346_v34, 5  ;;  %v6972_v46 = vld [vmem:[#allocation2 + $0x48] sm:$0xff]   ;;  %v6973_v63 = vld [vmem:[#allocation2 + $0x54] sm:$0xff]  }
 0x114   : > { %6756 = vmatmul.mubr.msk.bf16.gmra.mxu0 %vm1631_vm12, %v8355_v40  ;;  %v3352_v31 = vrot.slane %v3350_v26, 4  ;;  %v8476_v1 = vor.u32 %v627_v3, %v626_v58  ;;  %v630_v10 = vrot.slane %v626_v58, 4  ;;  %v804_v57 = vld [vmem:[#allocation2 + $0xc8] sm:$0x1]  ;;  %v3287_v5 = vsel %vm7322_vm13, %v8450_v13, %v8452_v47  ;;  %v3681_v13 = vld [vmem:[#allocation2 + $0x30] sm:$0xe] }
 0x115   : > { %6759 = vmatprep.mubr.msk.bf16.mxu0 %vm1631_vm12, %v8357_v39  ;;  %v637_v22 = vor.u32 %v635_v30, %v634_v52  ;;  %v639_v40 = vrot.slane %v634_v52, 4  ;;  %v3301_v39 = vsel %vm7322_vm13, %v3296_v48, %v8420_v38  ;;  %v3311_v2 = vsel %vm7322_vm13, %v3306_v49, %v3310_v33  ;;  %v10179_v58 = vld [vmem:[#allocation16_spill] sm:$0xff]  ;;  %v3684_v26 = vld [vmem:[#allocation2 + $0x54] sm:$0xe] }
 0x116   : > { %v3356_v34 = vshll.u32 %v8468_v51, 16  ;;  %v3343_v24 = vor.u32 %v3342_v25, %v3339_v17  ;;  %v801_v29 = vsel %vm7211_vm7, %v8476_v1, %v800_v14  ;;  %v10176_v38 = vsel %vm7322_vm13, %v8397_v62, %v8380_v11  ;;  %v3682_v11 = vld [vmem:[#allocation2 + $0x3c] sm:$0xe] }
 0x117   : > { %v638_v52 = vsel %vm7202_vm6, %v630_v10, %v637_v22  ;;  %v820_v47 = vsel %vm7219_vm8, %v639_v40, %v819_v42  ;;  %v10177_v33 = vsel %vm7322_vm13, %v8391_v43, %v8334_v41  ;;  %v10178_v22 = vsel %vm7322_vm13, %v8399_v21, %v8341_v32  ;;  %802 = vst [vmem:[#allocation2 + $0xc0] sm:$0xf] %v801_v29 }
 0x118   : > { %v8505_v48 = vcombine.low %v10177_v33, %v10176_v38  ;;  %v8512_v49 = vcombine.low %v10178_v22, %v3263_v8  ;;  %v3353_v17 = vor.u32 %v3352_v31, %v8474_v12  ;;  %803 = vst.msk [vmem:[#allocation2 + $0xc4] sm:$0xf] %vm689_vm3, %v638_v52  ;;  %821 = vst [vmem:[#allocation2 + $0xd4] sm:$0x1] %v820_v47  ;;  %v8529_v8 = vld [vmem:[#allocation2 + $0xc] sm:$0xe] }
 0x119   : > { %818 = vst.msk [vmem:[#allocation2 + $0xd0] sm:$0xf] %vm689_vm3, %v638_v52  ;;  %v805_v41 = vsel %vm7219_vm8, %v639_v40, %v804_v57  ;;  %v8520_v43 = vcombine.low %v3277_v56, %v3287_v5  ;;  %v8522_v62 = vcombine.low %v3301_v39, %v3311_v2  ;;  %v3325_v32 = vsel %vm7322_vm13, %v3320_v0, %v8444_v20  ;;  %v815_v40 = vld [vmem:[#allocation2 + $0xcc] sm:$0xf]  ;;  %v6974_v57 = vld [vmem:[#allocation2 + $0x60] sm:$0xff]  }
 0x11a   : > { %6722 = vmatmul.mubr.msk.bf16.gmra.mxu1 %vm1631_vm12, %v6972_v46  ;;  %v3335_v21 = vsel %vm7322_vm13, %v3330_v7, %v3334_v23  ;;  %806 = vst [vmem:[#allocation2 + $0xc8] sm:$0x1] %v805_v41  ;;  %v8532_v25 = vrot.slane %v3356_v34, 5  ;;  %v3744_v14 = vrot.slane %v10179_v58, 5  ;;  %v6257_v56 = vrot.slane %v3681_v13, 9 }
 0x11b   : > { %6725 = vmatprep.mubr.msk.bf16.mxu1 %vm1631_vm12, %v6973_v63  ;;  %v3765_v31 = vrot.slane %v8112_v19, 5  ;;  %v8538_v42 = vrot.slane %v3343_v24, 4  ;;  %v3768_v20 = vrot.slane %v8155_v15, 5  ;;  %v6258_v23 = vrot.slane %v3682_v11, 9  ;;  %v3683_v7 = vld [vmem:[#allocation2 + $0x48] sm:$0xe] }
 0x11c   : > { %6760 = vmatmul.mubr.msk.bf16.gmra.mxu0 %vm1631_vm12, %v8366_v44  ;;  %v3772_v0 = vrot.slane %v8145_v53, 5  ;;  %v8544_v46 = vcombine.low %v3325_v32, %v3335_v21  ;;  %v8546_v10 = vrot.slane %v3353_v17, 4  ;;  %v6254_v19 = vrot.slane %v8529_v8, 9  ;;  %v6975_v15 = vld [vmem:[#allocation2 + $0x6c] sm:$0xff]   ;;  %v3685_v38 = vld [vmem:[#allocation2 + $0x60] sm:$0xe] }
 0x11d   : > { %6763 = vmatprep.mubr.msk.bf16.mxu0 %vm1631_vm12, %v8395_v16  ;;  %v8551_v44 = vsel %vm7777_vm1, %v6257_v56, %v3765_v31  ;;  %v3767_v63 = vrot.slane %v3765_v31, 4  ;;  %v3775_v16 = vrot.slane %v8187_v9, 5  ;;  %v8560_v39 = vrot.slane %v3744_v14, 4  ;;  %v3686_v32 = vld [vmem:[#allocation2 + $0x6c] sm:$0xe] }
 0x11e   : > { %v8555_v53 = vsel %vm7777_vm1, %v6258_v23, %v3772_v0  ;;  %v3774_v5 = vrot.slane %v3772_v0, 4  ;;  %v6259_v2 = vrot.slane %v3683_v7, 9  ;;  %v3779_v34 = vrot.slane %v8169_v28, 5  ;;  %v838_v29 = vld [vmem:[#allocation2 + $0xc0] sm:$0x1] }
 0x11f   : > { %v3782_v24 = vrot.slane %v8226_v50, 5  ;;  %v3349_v52 = vsel %vm7322_vm13, %v8538_v42, %v8474_v12  ;;  %v995_v47 = vld [vmem:[#allocation2 + $0xc0] sm:$0x1]  ;;  %v8570_v9 = vsel %vm7777_vm1, %v3767_v63, %v3768_v20  ;;  %v816_v28 = vsel %vm7211_vm7, %v8476_v1, %v815_v40  ;;  %v8588_v3 = vld [vmem:[#allocation2 + $0xc4] sm:$0xf]  ;;  %v10184_v42 = vld [vmem:[#allocation13_spill] sm:$0xff] }
 0x120   : > { %v8574_v13 = vsel %vm7777_vm1, %v3774_v5, %v3775_v16  ;;  %v921_v50 = vshrl.u32 %v838_v29, 16  ;;  %v6274_v17 = vcombine.low %v8551_v44, %v8570_v9  ;;  %v8585_v11 = vsel %vm7777_vm1, %v6259_v2, %v3779_v34  ;;  %817 = vst [vmem:[#allocation2 + $0xcc] sm:$0xf] %v816_v28  ;;  %v3687_v2 = vld [vmem:[#allocation2 + $0x78] sm:$0xe] }
 0x121   : > { %v1017_v33 = vld [vmem:[#allocation2 + $0xc8] sm:$0x1]  ;;  %v6275_v41 = vcombine.low %v8555_v53, %v8574_v13  ;;  %v3781_v1 = vrot.slane %v3779_v34, 4  ;;  %v6260_v56 = vrot.slane %v3684_v26, 9  ;;  %v3786_v31 = vrot.slane %v8196_v60, 5  ;;  %v6976_v34 = vld [vmem:[#allocation2 + $0x78] sm:$0xff]  }
 0x122   : > { %v1139_v22 = vld [vmem:[#allocation2 + $0xc8] sm:$0x1]  ;;  %6726 = vmatmul.mubr.msk.bf16.gmra.mxu1 %vm1631_vm12, %v6974_v57  ;;  %v1068_v21 = vshll.u32 %v1017_v33, 16  ;;  %v996_v20 = vsel %vm7219_vm8, %v921_v50, %v995_v47  ;;  %v3370_v23 = vshll.u32 %v8588_v3, 16  ;;  %v3374_v0 = vshrl.u32 %v8588_v3, 16 }
 0x123   : > { %6729 = vmatprep.mubr.msk.bf16.mxu1 %vm1631_vm12, %v6975_v15  ;;  %v3789_v7 = vrot.slane %v8236_v61, 5  ;;  %997 = vst [vmem:[#allocation2 + $0xc0] sm:$0x1] %v996_v20  ;;  %v8603_v60 = vsel %vm7777_vm1, %v3781_v1, %v3782_v24  ;;  %v8607_v15 = vsel %vm7777_vm1, %v6260_v56, %v3786_v31  ;;  %v3788_v63 = vrot.slane %v3786_v31, 4 }
 0x124   : > { %6764 = vmatmul.mubr.msk.bf16.gmra.mxu0 %vm1631_vm12, %v8505_v48  ;;  %v1140_v57 = vsel %vm7256_vm9, %v1068_v21, %v1139_v22  ;;  %v8611_v61 = vrot.slane %v3370_v23, 5  ;;  %v3376_v48 = vrot.slane %v3374_v0, 4  ;;  %v6261_v16 = vrot.slane %v3685_v38, 9  ;;  %v3688_v22 = vld [vmem:[#allocation2 + $0x84] sm:$0xe] }
 0x125   : > { %6767 = vmatprep.mubr.msk.bf16.mxu0 %vm1631_vm12, %v8512_v49  ;;  %1141 = vst [vmem:[#allocation2 + $0xc8] sm:$0x1] %v1140_v57  ;;  %v8617_v24 = vsel %vm7777_vm1, %v3788_v63, %v3789_v7  ;;  %v3793_v26 = vrot.slane %v8215_v18, 5  ;;  %v3796_v29 = vrot.slane %v8228_v4, 5  ;;  %v6262_v47 = vrot.slane %v3686_v32, 9  ;;  %v6977_v49 = vld [vmem:[#allocation2 + $0x84] sm:$0xff]  }
 0x126   : > { %v3377_v28 = vor.u32 %v3376_v48, %v8611_v61  ;;  %v3800_v33 = vrot.slane %v8246_v45, 5  ;;  %v3803_v38 = vrot.slane %v8278_v59, 5  ;;  %v6263_v18 = vrot.slane %v3687_v2, 9 }
 0x127   : > { %v8628_v21 = vsel %vm7777_vm1, %v6261_v16, %v3793_v26  ;;  %v3795_v1 = vrot.slane %v3793_v26, 4  ;;  %v3807_v4 = vrot.slane %v8292_v55, 5  ;;  %v3359_v32 = vsel %vm7322_vm13, %v8546_v10, %v8532_v25  ;;  %v3689_v25 = vld [vmem:[#allocation2 + $0x90] sm:$0xe]  ;;  %v3690_v10 = vld [vmem:[#allocation2 + $0x9c] sm:$0xe] }
 0x128   : > { %v8637_v56 = vsel %vm7777_vm1, %v6262_v47, %v3800_v33  ;;  %v3802_v45 = vrot.slane %v3800_v33, 4  ;;  %v3810_v59 = vrot.slane %v8332_v36, 5  ;;  %v6264_v23 = vrot.slane %v3688_v22, 9 }
 0x129   : > { %v8643_v31 = vsel %vm7777_vm1, %v3795_v1, %v3796_v29  ;;  %v8647_v55 = vsel %vm7777_vm1, %v6263_v18, %v3807_v4  ;;  %v3809_v20 = vrot.slane %v3807_v4, 4  ;;  %v8650_v7 = vrot.slane %v3377_v28, 4  ;;  %v6979_v28 = vld [vmem:[#allocation2 + $0x9c] sm:$0xff]  }
 0x12a   : > { %6730 = vmatmul.mubr.msk.bf16.gmra.mxu1 %vm1631_vm12, %v6976_v34  ;;  %v2997_v0 = vld [vmem:[#allocation2 + $0xc0] sm:$0xf]  ;;  %v8656_v57 = vsel %vm7777_vm1, %v3802_v45, %v3803_v38  ;;  %v3814_v63 = vrot.slane %v8301_v27, 5  ;;  %v3817_v22 = vrot.slane %v8339_v35, 5  ;;  %v6265_v1 = vrot.slane %v3689_v25, 9  ;;  %v10183_v34 = vld [vmem:[#allocation15_spill] sm:$0xff] }
 0x12b   : > { %6733 = vmatprep.mubr.msk.bf16.mxu1 %vm1631_vm12, %v6977_v49  ;;  %v3361_v16 = vshrl.u32 %v2997_v0, 16  ;;  %v3364_v2 = vshll.u32 %v2997_v0, 16  ;;  %v8667_v26 = vsel %vm7777_vm1, %v3809_v20, %v3810_v59  ;;  %v6978_v49 = vld [vmem:[#allocation2 + $0x90] sm:$0xff]   ;;  %v10181_v4 = vld [vmem:[#allocation10_spill] sm:$0xff]  ;;  %v6266_v59 = vrot.slane %v3690_v10, 9 }
 0x12c   : > { %6768 = vmatmul.mubr.msk.bf16.gmra.mxu0 %vm1631_vm12, %v8520_v43  ;;  %v8661_v48 = vld [vmem:[#allocation2 + $0xc8] sm:$0x1]  ;;  %v8676_v43 = vsel %vm7777_vm1, %v6264_v23, %v3814_v63  ;;  %v3816_v47 = vrot.slane %v3814_v63, 4  ;;  %v3824_v45 = vrot.slane %v10181_v4, 5  ;;  %v3691_v20 = vld [vmem:[#allocation2 + $0xa8] sm:$0xe]  ;;  %v3745_v30 = vsel %vm7777_vm1, %v6254_v19, %v3744_v14 }
 0x12d   : > { %6771 = vmatprep.mubr.msk.bf16.mxu0 %vm1631_vm12, %v8522_v62  ;;  %v3380_v29 = vshll.u32 %v8661_v48, 16  ;;  %v3363_v33 = vrot.slane %v3361_v16, 4  ;;  %v3366_v38 = vrot.slane %v3364_v2, 5  ;;  %v3821_v62 = vrot.slane %v8336_v37, 5  ;;  %v10182_v63 = vld [vmem:[#allocation11_spill] sm:$0xff] }
 0x12e   : > { %v8683_v23 = vsel %vm7777_vm1, %v3816_v47, %v3817_v22  ;;  %v3828_v27 = vrot.slane %v10182_v63, 5  ;;  %v3831_v16 = vrot.slane %v10183_v34, 5  ;;  %v3692_v2 = vld [vmem:[#allocation2 + $0xb4] sm:$0xe]  ;;  %v6236_v37 = vcombine.low %v3349_v52, %v3359_v32  ;;  %v10185_v32 = vld [vmem:[#allocation14_spill] sm:$0xff] }
 0x12f   : > { %v3382_v18 = vrot.slane %v3380_v29, 5  ;;  %v3367_v0 = vor.u32 %v3366_v38, %v3363_v33  ;;  %v8696_v25 = vsel %vm7777_vm1, %v6265_v1, %v3821_v62  ;;  %v3823_v10 = vrot.slane %v3821_v62, 4  ;;  %v3693_v1 = vld [vmem:[#allocation2 + $0xc0] sm:$0xe] }
 0x130   : > { %v8701_v34 = vsel %vm7777_vm1, %v6266_v59, %v3828_v27  ;;  %v3830_v47 = vrot.slane %v3828_v27, 4  ;;  %v6267_v33 = vrot.slane %v3691_v20, 9  ;;  %v3835_v52 = vrot.slane %v10184_v42, 5  ;;  %v10186_v62 = vld [vmem:[#allocation18_spill] sm:$0xff]  ;;  %v6980_v20 = vld [vmem:[#allocation2 + $0xa8] sm:$0xff]  }
 0x131   : > { %v3368_v29 = vrot.slane %v3367_v0, 4  ;;  %v8706_v12 = vsel %vm7777_vm1, %v3823_v10, %v3824_v45  ;;  %v3838_v38 = vrot.slane %v10185_v32, 5  ;;  %v6268_v22 = vrot.slane %v3692_v2, 9  ;;  %v839_v45 = vld [vmem:[#allocation2 + $0xcc] sm:$0x1]  ;;  %v6981_v10 = vld [vmem:[#allocation2 + $0xb4] sm:$0xff]  }
 0x132   : > { %6734 = vmatmul.mubr.msk.bf16.gmra.mxu1 %vm1631_vm12, %v6978_v49  ;;  %v3383_v27 = vsel %vm7322_vm13, %v8650_v7, %v3382_v18  ;;  %v3842_v4 = vrot.slane %v10186_v62, 5  ;;  %v8730_v7 = vsel %vm7777_vm1, %v6267_v33, %v3835_v52  ;;  %v3837_v18 = vrot.slane %v3835_v52, 4  ;;  %v7024_v52 = vld [vmem:[#allocation2 + $0x14] sm:$0x1]  ;;  %v7025_v62 = vld [vmem:[#allocation2 + $0x1c] sm:$0xf] }
 0x133   : > { %6737 = vmatprep.mubr.msk.bf16.mxu1 %vm1631_vm12, %v6979_v28  ;;  %v8719_v28 = vsel %vm7777_vm1, %v3830_v47, %v3831_v16  ;;  %v3845_v16 = vrot.slane %v8468_v51, 5  ;;  %v6269_v2 = vrot.slane %v3693_v1, 9  ;;  %v3852_v47 = vrot.slane %v8661_v48, 5  ;;  %v6983_v1 = vld [vmem:[#allocation2 + $0x18] sm:$0xff]  }
 0x134   : > { %6772 = vmatmul.mubr.msk.bf16.gmra.mxu0 %vm1631_vm12, %v8544_v46  ;;  %v3373_v46 = vsel %vm7322_vm13, %v3368_v29, %v8611_v61  ;;  %v8734_v0 = vsel %vm7777_vm1, %v6268_v22, %v3842_v4  ;;  %v3844_v63 = vrot.slane %v3842_v4, 4  ;;  %v8739_v61 = vsel %vm7777_vm1, %v3837_v18, %v3838_v38 }
 0x135   : > { %6775 = vmatprep.mubr.msk.bf16.mxu0 %vm1631_vm12, %v6236_v37  ;;  %v998_v37 = vld [vmem:[#allocation2 + $0xcc] sm:$0x1]  ;;  %v3849_v29 = vrot.slane %v8588_v3, 5  ;;  %v926_v33 = vshrl.u32 %v839_v45, 16  ;;  %v6237_v42 = vcombine.low %v3373_v46, %v3383_v27  ;;  %v3747_v32 = vrot.slane %v7024_v52, 5 }
 0x136   : > { %v8747_v51 = vsel %vm7777_vm1, %v3844_v63, %v3845_v16  ;;  %v3751_v4 = vrot.slane %v7025_v62, 5  ;;  %v3679_v45 = vld [vmem:[#allocation2 + $0x18] sm:$0xe] }
 0x137   : > { %v8753_v3 = vsel %vm7777_vm1, %v6269_v2, %v3849_v29  ;;  %v3851_v48 = vrot.slane %v3849_v29, 4  ;;  %v999_v27 = vsel %vm7219_vm8, %v926_v33, %v998_v37  ;;  %v3748_v18 = vsel %vm7777_vm1, %v8560_v39, %v3747_v32  ;;  %v3680_v2 = vld [vmem:[#allocation2 + $0x24] sm:$0xe]  ;;  %v7027_v29 = vld [vmem:[#allocation2 + $0x20] sm:$0x1]  ;;  %v6985_v39 = vld [vmem:[#allocation2 + $0x30] sm:$0xff]  }
 0x138   : > { %1000 = vst [vmem:[#allocation2 + $0xcc] sm:$0x1] %v999_v27  ;;  %v6982_v37 = vld [vmem:[#allocation2 + $0xc0] sm:$0xff]   ;;  %v3753_v58 = vrot.slane %v3751_v4, 4  ;;  %v3754_v8 = vrot.slane %v7027_v29, 5  ;;  %v6256_v14 = vrot.slane %v3680_v2, 9 }
 0x139   : > { %v8761_v46 = vsel %vm7777_vm1, %v3851_v48, %v3852_v47  ;;  %v6271_v47 = vcombine.low %v3745_v30, %v3748_v18  ;;  %v6984_v33 = vld [vmem:[#allocation2 + $0x24] sm:$0xff]   ;;  %v10187_v48 = vld [vmem:[#allocation17_spill] sm:$0xff] }
 0x13a   : > { %6738 = vmatmul.mubr.msk.bf16.gmra.mxu1 %vm1631_vm12, %v6980_v20  ;;  %v7026_v20 = vld [vmem:[#allocation2 + $0x28] sm:$0xf]  ;;  %v5508_v27 = vsel %vm1680_vm0, %v10187_v48, 0  ;;  %v4507_v62 = vld [vmem:[#allocation2 + $0x18] sm:$0xf] }
 0x13b   : > { %6741 = vmatprep.mubr.msk.bf16.mxu1 %vm1631_vm12, %v6981_v10  ;;  %v3758_v63 = vrot.slane %v7026_v20, 5  ;;  %v6255_v10 = vrot.slane %v3679_v45, 9  ;;  %v8784_v45 = vld [vmem:[#allocation2 + $0x1c] sm:$0xf]  ;;  %v4510_v20 = vld [vmem:[#allocation2 + $0x24] sm:$0xf] }
 0x13c   : > { %6776 = vmatmul.mubr.msk.bf16.gmra.mxu0 %vm1631_vm12, %v6237_v42  ;;  %v7028_v42 = vld [vmem:[#allocation2 + $0x2c] sm:$0x1]  ;;  %v8792_v2 = vld [vmem:[#allocation2 + $0x28] sm:$0xf]  ;;  %v4569_v29 = vshrl.u32 %v8784_v45, 16 }
 0x13d   : > { %6815 = vmatprep.mubr.msk.bf16.mxu0 %vm1631_vm12, %v6983_v1  ;;  %v3760_v19 = vrot.slane %v3758_v63, 4  ;;  %v3761_v52 = vrot.slane %v7028_v42, 5  ;;  %v3752_v32 = vsel %vm7777_vm1, %v6255_v10, %v3751_v4  ;;  %v3755_v1 = vsel %vm7777_vm1, %v3753_v58, %v3754_v8  ;;  %v10188_v8 = vld [vmem:[#allocation12_spill] sm:$0xff] }
 0x13e   : > { %v3759_v30 = vsel %vm7777_vm1, %v6256_v14, %v3758_v63  ;;  %v6272_v4 = vcombine.low %v3752_v32, %v3755_v1  ;;  %v4559_v10 = vshll.u32 %v4507_v62, 16  ;;  %v4565_v58 = vshll.u32 %v8784_v45, 16  ;;  %v4509_v32 = vld [vmem:[#allocation2 + $0x20] sm:$0x1] }
 0x13f   : > { %v3762_v18 = vsel %vm7777_vm1, %v3760_v19, %v3761_v52  ;;  %v4580_v14 = vshrl.u32 %v4510_v20, 16  ;;  %v4583_v19 = vshll.u32 %v4510_v20, 16  ;;  %v4589_v42 = vshll.u32 %v8792_v2, 16 }
 0x140   : > { %v6273_v63 = vcombine.low %v3759_v30, %v3762_v18  ;;  %v4593_v52 = vshrl.u32 %v8792_v2, 16  ;;  %v4561_v48 = vrot.slane %v4559_v10, 5  ;;  %v8805_v30 = vpop.f32.mrf.mxu0  ;;  %v4512_v18 = vld [vmem:[#allocation2 + $0x2c] sm:$0x1]  ;;  %v5306_v22 = vrot.slane %v8792_v2, 5  ;;  %v8824_v2 = vpop.f32.mrf.mxu1 }
 0x141   : > { %10189 = vst [vmem:[#allocation6_spill] sm:$0xff] %v8805_v30  ;;  %v4582_v20 = vrot.slane %v4580_v14, 4  ;;  %v8807_v16 = vrot.slane %v4589_v42, 5  ;;  %v6988_v14 = vld [vmem:[#allocation2 + $0x54] sm:$0xff]   ;;  %10191 = vst [vmem:[#allocation8_spill] sm:$0xff] %v8824_v2  ;;  %v5302_v36 = vrot.slane %v4509_v32, 5 }
 0x142   : > { %6742 = vmatmul.mubr.msk.bf16.gmra.mxu1 %vm1631_vm12, %v6982_v37  ;;  %v4556_v37 = vshrl.u32 %v4507_v62, 16  ;;  %v4571_v62 = vrot.slane %v4569_v29, 4  ;;  %v4595_v38 = vrot.slane %v4593_v52, 4  ;;  %v5233_v29 = vld [vmem:[#allocation2 + $0x18] sm:$0xe]  ;;  %v5309_v50 = vrot.slane %v4512_v18, 5  ;;  %v8836_v13 = vpop.f32.mrf.mxu1 }
 0x143   : > { %6781 = vmatprep.mubr.msk.bf16.mxu1 %vm1631_vm12, %v6271_v47  ;;  %v5038_v47 = vsel %vm1680_vm0, %v10188_v8, 0  ;;  %v4585_v8 = vrot.slane %v4583_v19, 5  ;;  %v8815_v19 = vpop.f32.mrf.mxu0  ;;  %10193 = vst [vmem:[#allocation10_spill] sm:$0xff] %v8836_v13  ;;  %vm5905_vm0 = vcmask 1040384  }
 0x144   : > { %6816 = vmatmul.mubr.msk.bf16.vlgmr.msra.gmra.mxu0 %vm1631_vm12, %v6984_v33  ;;  %v6986_v33 = vld [vmem:[#allocation2 + $0x3c] sm:$0xff]   ;;  %v4558_v1 = vrot.slane %v4556_v37, 4  ;;  %v4513_v37 = vld [vmem:[#allocation2 + $0x30] sm:$0xf]  ;;  %10190 = vst [vmem:[#allocation7_spill] sm:$0xff] %v8815_v19  ;;  %v4596_v52 = vor.u32 %v4595_v38, %v8807_v16 }
 0x145   : > { %6882 = vmatpush3.bf16.msra.mxu0 %v5508_v27  ;;  %6819 = vmatprep.mubr.msk.bf16.mxu0 %vm1631_vm12, %v6985_v39  ;;  %v6987_v39 = vld [vmem:[#allocation2 + $0x48] sm:$0xff]   ;;  %v8801_v27 = vrot.slane %v4565_v58, 5  ;;  %v4586_v42 = vor.u32 %v4585_v8, %v4582_v20  ;;  %v4604_v59 = vshrl.u32 %v4513_v37, 16  ;;  %v4607_v49 = vshll.u32 %v4513_v37, 16  ;;  %v8831_v44 = vpop.f32.mrf.mxu0 }
 0x146   : > { %v4562_v10 = vor.u32 %v4561_v48, %v4558_v1  ;;  %v6989_v1 = vld [vmem:[#allocation2 + $0x60] sm:$0xff]   ;;  %10192 = vst [vmem:[#allocation16_spill] sm:$0xff] %v8831_v44 }
 0x147   : > { %v4572_v58 = vor.u32 %v4571_v62, %v8801_v27  ;;  %v6369_v62 = vrot.slane %v5233_v29, 9  ;;  %v5308_v29 = vrot.slane %v5306_v22, 4  ;;  %v4587_v9 = vrot.slane %v4586_v42, 4  ;;  %v8951_v44 = vld [vmem:[#allocation2 + $0x64] sm:$0xf] }
 0x148   : > { %v4563_v20 = vrot.slane %v4562_v10, 4  ;;  %v4606_v5 = vrot.slane %v4604_v59, 4  ;;  %v4609_v10 = vrot.slane %v4607_v49, 5  ;;  %v4516_v49 = vld [vmem:[#allocation2 + $0x3c] sm:$0xf] }
 0x149   : > { %v4573_v8 = vrot.slane %v4572_v58, 4 }
 0x14a   : > { %6782 = vmatmul.mubr.msk.bf16.vlgmr.msra.gmra.mxu1 %vm1631_vm12, %v6272_v4  ;;  %v4575_v4 = vshll.u32 %v4509_v32, 16  ;;  %v4515_v32 = vld [vmem:[#allocation2 + $0x38] sm:$0x1] }
 0x14b   : > { %6848 = vmatpush3.bf16.msra.mxu1 %v5038_v47  ;;  %6785 = vmatprep.mubr.msk.bf16.mxu1 %vm1631_vm12, %v6273_v63  ;;  %v5299_v47 = vrot.slane %v8784_v45, 5  ;;  %v8812_v63 = vld [vmem:[#allocation2 + $0x34] sm:$0xf] }
 0x14c   : > { %6820 = vmatmul.mubr.msk.bf16.gmra.mxu0 %vm1631_vm12, %v6986_v33  ;;  %v4599_v33 = vshll.u32 %v4512_v18, 16  ;;  %v4577_v48 = vrot.slane %v4575_v4, 5  ;;  %v4613_v35 = vshll.u32 %v8812_v63, 16  ;;  %v4617_v45 = vshrl.u32 %v8812_v63, 16 }
 0x14d   : > { %6823 = vmatprep.mubr.msk.bf16.mxu0 %vm1631_vm12, %v6987_v39  ;;  %v5234_v39 = vld [vmem:[#allocation2 + $0x24] sm:$0xe]  ;;  %v5301_v38 = vrot.slane %v5299_v47, 4  ;;  %v5313_v59 = vrot.slane %v8812_v63, 5  ;;  %v8862_v63 = vpop.f32.mrf.mxu0 }
 0x14e   : > { %v4601_v4 = vrot.slane %v4599_v33, 5  ;;  %v6370_v37 = vrot.slane %v5234_v39, 9  ;;  %v8834_v58 = vrot.slane %v4613_v35, 5  ;;  %v4619_v53 = vrot.slane %v4617_v45, 4  ;;  %v5235_v33 = vld [vmem:[#allocation2 + $0x30] sm:$0xe] }
 0x14f   : > { %v8844_v18 = vsel %vm7777_vm1, %v5301_v38, %v5302_v36  ;;  %v4568_v35 = vsel %vm7322_vm13, %v4563_v20, %v8801_v27  ;;  %v8860_v36 = vld [vmem:[#allocation2 + $0x40] sm:$0xf]  ;;  %10194 = vst [vmem:[#allocation11_spill] sm:$0xff] %v8862_v63  ;;  %v4592_v27 = vsel %vm7322_vm13, %v4587_v9, %v8807_v16  ;;  %v6371_v45 = vrot.slane %v5235_v33, 9  ;;  %v8874_v38 = vpop.f32.mrf.mxu1  ;;  %v4522_v33 = vld [vmem:[#allocation2 + $0x54] sm:$0xf] }
 0x150   : > { %v8854_v42 = vsel %vm7777_vm1, %v6370_v37, %v5306_v22  ;;  %v6991_v22 = vld [vmem:[#allocation2 + $0x78] sm:$0xff]   ;;  %v4628_v20 = vshrl.u32 %v4516_v49, 16  ;;  %10196 = vst [vmem:[#allocation15_spill] sm:$0xff] %v8874_v38  ;;  %v5315_v37 = vrot.slane %v5313_v59, 4  ;;  %v4631_v16 = vshll.u32 %v4516_v49, 16 }
 0x151   : > { %v4676_v38 = vshrl.u32 %v4522_v33, 16  ;;  %v8943_v63 = vld [vmem:[#allocation2 + $0x50] sm:$0x1] }
 0x152   : > { %6786 = vmatmul.mubr.msk.bf16.gmra.mxu1 %vm1631_vm12, %v6274_v17  ;;  %v4597_v17 = vrot.slane %v4596_v52, 4  ;;  %v6990_v52 = vld [vmem:[#allocation2 + $0x6c] sm:$0xff]  }
 0x153   : > { %6789 = vmatprep.mubr.msk.bf16.mxu1 %vm1631_vm12, %v6275_v41  ;;  %v8840_v41 = vsel %vm7777_vm1, %v6369_v62, %v5299_v47  ;;  %v8858_v47 = vsel %vm7777_vm1, %v5308_v29, %v5309_v50  ;;  %v4620_v62 = vor.u32 %v4619_v53, %v8834_v58  ;;  %v5316_v50 = vrot.slane %v4515_v32, 5 }
 0x154   : > { %6824 = vmatmul.mubr.msk.bf16.gmra.mxu0 %vm1631_vm12, %v6988_v14  ;;  %v4578_v14 = vsel %vm7322_vm13, %v4573_v8, %v4577_v48  ;;  %v4602_v39 = vsel %vm7322_vm13, %v4597_v17, %v4601_v4  ;;  %v4623_v48 = vshll.u32 %v4515_v32, 16  ;;  %v10195_v8 = vcombine.low %v8585_v11, %v8603_v60  ;;  %v4519_v17 = vld [vmem:[#allocation2 + $0x48] sm:$0xf]  ;;  %v8885_v11 = vpop.f32.mrf.mxu0 }
 0x155   : > { %6827 = vmatprep.mubr.msk.bf16.mxu0 %vm1631_vm12, %v6989_v1  ;;  %v4610_v1 = vor.u32 %v4609_v10, %v4606_v5  ;;  %v4637_v29 = vshll.u32 %v8860_v36, 16  ;;  %v4641_v5 = vshrl.u32 %v8860_v36, 16  ;;  %v10197_v4 = vcombine.low %v8607_v15, %v8617_v24  ;;  %10198 = vst [vmem:[#allocation13_spill] sm:$0xff] %v8885_v11  ;;  %v8895_v15 = vld [vmem:[#allocation2 + $0x44] sm:$0x1] }
 0x156   : > { %v8887_v60 = vcombine.low %v4568_v35, %v4578_v14  ;;  %v8889_v10 = vcombine.low %v4592_v27, %v4602_v39  ;;  %v8893_v53 = vrot.slane %v4623_v48, 5  ;;  %v8897_v24 = vld [vmem:[#allocation2 + $0x4c] sm:$0xf]  ;;  %v8906_v35 = vsel %vm7777_vm1, %v6371_v45, %v5313_v59  ;;  %v8908_v27 = vld [vmem:[#allocation2 + $0x58] sm:$0xf]  ;;  %v8910_v39 = vpop.f32.mrf.mxu1  ;;  %v6992_v45 = vld [vmem:[#allocation2 + $0x84] sm:$0xff]  }
 0x157   : > { %v8900_v49 = vrot.slane %v4610_v1, 4  ;;  %10200 = vst [vmem:[#allocation18_spill] sm:$0xff] %v8906_v35  ;;  %v4630_v14 = vrot.slane %v4628_v20, 4  ;;  %10201 = vst [vmem:[#allocation17_spill] sm:$0xff] %v8910_v39  ;;  %v8914_v48 = vsel %vm7777_vm1, %v5315_v37, %v5316_v50  ;;  %v4643_v1 = vrot.slane %v4641_v5, 4  ;;  %v8920_v20 = vpop.f32.mrf.mxu0  ;;  %v6993_v37 = vld [vmem:[#allocation2 + $0x90] sm:$0xff]  }
 0x158   : > { %10199 = vst [vmem:[#allocation14_spill] sm:$0xff] %v8889_v10  ;;  %10202 = vst [vmem:[#allocation12_spill] sm:$0xff] %v8914_v48  ;;  %v4655_v32 = vshll.u32 %v4519_v17, 16  ;;  %v4661_v9 = vshll.u32 %v8897_v24, 16  ;;  %v4665_v59 = vshrl.u32 %v8897_v24, 16  ;;  %v4679_v39 = vshll.u32 %v4522_v33, 16  ;;  %v8937_v2 = vpop.f32.mrf.mxu1 }
 0x159   : > { %10203 = vst [vmem:[#allocation19_spill] sm:$0xff] %v8920_v20  ;;  %v4685_v13 = vshll.u32 %v8908_v27, 16  ;;  %v4689_v50 = vshrl.u32 %v8908_v27, 16  ;;  %v4647_v5 = vshll.u32 %v8895_v15, 16  ;;  %v10204_v33 = vcombine.low %v8628_v21, %v8643_v31  ;;  %10205 = vst [vmem:[#allocation20_spill] sm:$0xff] %v8937_v2 }
 0x15a   : > { %6790 = vmatmul.mubr.msk.bf16.gmra.mxu1 %vm1631_vm12, %v10195_v8  ;;  %v4633_v8 = vrot.slane %v4631_v16, 5  ;;  %v5320_v11 = vrot.slane %v8860_v36, 5  ;;  %v4657_v31 = vrot.slane %v4655_v32, 5  ;;  %v4667_v2 = vrot.slane %v4665_v59, 4  ;;  %v8964_v59 = vpop.f32.mrf.mxu1  ;;  %v5238_v35 = vld [vmem:[#allocation2 + $0x54] sm:$0xe] }
 0x15b   : > { %6793 = vmatprep.mubr.msk.bf16.mxu1 %vm1631_vm12, %v10197_v4  ;;  %v8916_v4 = vrot.slane %v4637_v29, 5  ;;  %v4525_v29 = vld [vmem:[#allocation2 + $0x60] sm:$0xf]  ;;  %v4678_v36 = vrot.slane %v4676_v38, 4  ;;  %v4691_v40 = vrot.slane %v4689_v50, 4  ;;  %10208 = vst [vmem:[#allocation22_spill] sm:$0xff] %v8964_v59 }
 0x15c   : > { %6828 = vmatmul.mubr.msk.bf16.gmra.mxu0 %vm1631_vm12, %v6990_v52  ;;  %v8902_v52 = vrot.slane %v4620_v62, 4  ;;  %v4652_v62 = vshrl.u32 %v4519_v17, 16  ;;  %v4634_v20 = vor.u32 %v4633_v8, %v4630_v14  ;;  %v8954_v14 = vpop.f32.mrf.mxu0  ;;  %v4681_v8 = vrot.slane %v4679_v39, 5 }
 0x15d   : > { %6831 = vmatprep.mubr.msk.bf16.mxu0 %vm1631_vm12, %v6991_v22  ;;  %v5236_v22 = vld [vmem:[#allocation2 + $0x3c] sm:$0xe]  ;;  %v4644_v16 = vor.u32 %v4643_v1, %v8916_v4  ;;  %10207 = vst [vmem:[#allocation21_spill] sm:$0xff] %v8954_v14  ;;  %v8956_v1 = vrot.slane %v4685_v13, 5  ;;  %v4700_v32 = vshrl.u32 %v4525_v29, 16  ;;  %v4671_v38 = vshll.u32 %v8943_v63, 16 }
 0x15e   : > { %v6372_v17 = vrot.slane %v5236_v22, 9  ;;  %v10206_v22 = vcombine.low %v8637_v56, %v8656_v57  ;;  %v4654_v21 = vrot.slane %v4652_v62, 4  ;;  %v8959_v56 = vrot.slane %v4647_v5, 5  ;;  %v5237_v5 = vld [vmem:[#allocation2 + $0x48] sm:$0xe]  ;;  %v8977_v59 = vpop.f32.mrf.mxu0 }
 0x15f   : > { %v5323_v57 = vrot.slane %v8895_v15, 5  ;;  %v4703_v62 = vshll.u32 %v4525_v29, 16  ;;  %v4709_v13 = vshll.u32 %v8951_v44, 16  ;;  %v4713_v39 = vshrl.u32 %v8951_v44, 16  ;;  %10209 = vst [vmem:[#allocation23_spill] sm:$0xff] %v8977_v59 }
 0x160   : > { %v8973_v50 = vsel %vm7777_vm1, %v6372_v17, %v5320_v11  ;;  %v5327_v29 = vrot.slane %v8897_v24, 5  ;;  %v5322_v14 = vrot.slane %v5320_v11, 4  ;;  %v4682_v19 = vor.u32 %v4681_v8, %v4678_v36  ;;  %v8986_v24 = vpop.f32.mrf.mxu1 }
 0x161   : > { %v4692_v30 = vor.u32 %v4691_v40, %v8956_v1  ;;  %v4645_v48 = vrot.slane %v4644_v16, 4  ;;  %v5334_v17 = vrot.slane %v8908_v27, 5  ;;  %v4673_v59 = vrot.slane %v4671_v38, 5 }
 0x162   : > { %6794 = vmatmul.mubr.msk.bf16.gmra.mxu1 %vm1631_vm12, %v10204_v33  ;;  %v8949_v33 = vrot.slane %v4661_v9, 5  ;;  %v8962_v9 = vld [vmem:[#allocation2 + $0x5c] sm:$0x1]  ;;  %v6373_v11 = vrot.slane %v5237_v5, 9  ;;  %v8988_v36 = vrot.slane %v4709_v13, 5  ;;  %v4715_v40 = vrot.slane %v4713_v39, 4 }
 0x163   : > { %6797 = vmatprep.mubr.msk.bf16.mxu1 %vm1631_vm12, %v10206_v22  ;;  %v6994_v22 = vld [vmem:[#allocation2 + $0x9c] sm:$0xff]   ;;  %v4695_v10 = vshll.u32 %v8962_v9, 16  ;;  %v10211_v16 = vcombine.low %v8676_v43, %v8683_v23  ;;  %v4683_v38 = vrot.slane %v4682_v19, 4  ;;  %v4693_v13 = vrot.slane %v4692_v30, 4 }
 0x164   : > { %6832 = vmatmul.mubr.msk.bf16.gmra.mxu0 %vm1631_vm12, %v6992_v45  ;;  %v8966_v45 = vrot.slane %v4634_v20, 4  ;;  %v4668_v15 = vor.u32 %v4667_v2, %v8949_v33  ;;  %v6995_v20 = vld [vmem:[#allocation2 + $0xa8] sm:$0xff]   ;;  %v10210_v2 = vcombine.low %v8647_v55, %v8667_v26  ;;  %v8998_v26 = vpop.f32.mrf.mxu0  ;;  %v6374_v39 = vrot.slane %v5238_v35, 9 }
 0x165   : > { %6835 = vmatprep.mubr.msk.bf16.mxu0 %vm1631_vm12, %v6993_v37  ;;  %v4658_v37 = vor.u32 %v4657_v31, %v4654_v21  ;;  %v4702_v21 = vrot.slane %v4700_v32, 4  ;;  %v4705_v31 = vrot.slane %v4703_v62, 5  ;;  %v5329_v32 = vrot.slane %v5327_v29, 4  ;;  %v8995_v55 = vld [vmem:[#allocation2 + $0x68] sm:$0x1] }
 0x166   : > { %v4669_v8 = vrot.slane %v4668_v15, 4  ;;  %v5330_v62 = vrot.slane %v8943_v63, 5  ;;  %v4697_v5 = vrot.slane %v4695_v10, 5  ;;  %v4640_v43 = vsel %vm7322_vm13, %v8966_v45, %v8916_v4  ;;  %v9006_v15 = vpop.f32.mrf.mxu1 }
 0x167   : > { %v4659_v27 = vrot.slane %v4658_v37, 4  ;;  %v5336_v23 = vrot.slane %v5334_v17, 4  ;;  %v5337_v63 = vrot.slane %v8962_v9, 5  ;;  %v4706_v37 = vor.u32 %v4705_v31, %v4702_v21  ;;  %10212 = vst [vmem:[#allocation24_spill] sm:$0xff] %v9006_v15  ;;  %v6997_v21 = vld [vmem:[#allocation2 + $0xc0] sm:$0xff]  }
 0x168   : > { %v4650_v19 = vsel %vm7322_vm13, %v4645_v48, %v8959_v56  ;;  %v9013_v30 = vsel %vm7777_vm1, %v5322_v14, %v5323_v57  ;;  %v4716_v10 = vor.u32 %v4715_v40, %v8988_v36  ;;  %v4719_v35 = vshll.u32 %v8995_v55, 16  ;;  %v9030_v14 = vld [vmem:[#allocation2 + $0x70] sm:$0xf]  ;;  %v6996_v56 = vld [vmem:[#allocation2 + $0xb4] sm:$0xff]   ;;  %v9032_v57 = vpop.f32.mrf.mxu0 }
 0x169   : > { %v4664_v4 = vsel %vm7322_vm13, %v4659_v27, %v8949_v33  ;;  %v4674_v9 = vsel %vm7322_vm13, %v4669_v8, %v4673_v59  ;;  %v9024_v45 = vsel %vm7777_vm1, %v6373_v11, %v5327_v29  ;;  %v9028_v48 = vsel %vm7777_vm1, %v5329_v32, %v5330_v62  ;;  %v5239_v11 = vld [vmem:[#allocation2 + $0x60] sm:$0xe]  ;;  %v9052_v27 = vpop.f32.mrf.mxu1  ;;  %v9207_v15 = vld [vmem:[#allocation2 + $0x98] sm:$0x1] }
 0x16a   : > { %6798 = vmatmul.mubr.msk.bf16.gmra.mxu1 %vm1631_vm12, %v10210_v2  ;;  %v4688_v33 = vsel %vm7322_vm13, %v4683_v38, %v8956_v1  ;;  %v4698_v59 = vsel %vm7322_vm13, %v4693_v13, %v4697_v5  ;;  %v9041_v29 = vsel %vm7777_vm1, %v6374_v39, %v5334_v17  ;;  %v9046_v31 = vsel %vm7777_vm1, %v5336_v23, %v5337_v63  ;;  %v9079_v39 = vpop.f32.mrf.mxu0 }
 0x16b   : > { %6801 = vmatprep.mubr.msk.bf16.mxu1 %vm1631_vm12, %v10211_v16  ;;  %v4707_v2 = vrot.slane %v4706_v37, 4  ;;  %v10213_v1 = vcombine.low %v8696_v25, %v8706_v12  ;;  %10214 = vst [vmem:[#allocation25_spill] sm:$0xff] %v9052_v27  ;;  %v4717_v17 = vrot.slane %v4716_v10, 4  ;;  %v4721_v8 = vrot.slane %v4719_v35, 5  ;;  %v9091_v37 = vld [vmem:[#allocation2 + $0x74] sm:$0x1] }
 0x16c   : > { %6836 = vmatmul.mubr.msk.bf16.gmra.mxu0 %vm1631_vm12, %v6994_v22  ;;  %v4528_v22 = vld [vmem:[#allocation2 + $0x6c] sm:$0xf]  ;;  %v4737_v32 = vshrl.u32 %v9030_v14, 16  ;;  %v10215_v62 = vcombine.low %v8701_v34, %v8719_v28  ;;  %v10216_v25 = vsel %vm7322_vm13, %v8902_v52, %v8893_v53  ;;  %v10217_v12 = vsel %vm7322_vm13, %v8900_v49, %v8834_v58  ;;  %v4531_v28 = vld [vmem:[#allocation2 + $0x78] sm:$0xf] }
 0x16d   : > { %6839 = vmatprep.mubr.msk.bf16.mxu0 %vm1631_vm12, %v6995_v20  ;;  %v5341_v20 = vrot.slane %v8951_v44, 5  ;;  %v4724_v40 = vshrl.u32 %v4528_v22, 16  ;;  %v4727_v16 = vshll.u32 %v4528_v22, 16  ;;  %v4733_v44 = vshll.u32 %v9030_v14, 16  ;;  %v9084_v49 = vld [vmem:[#allocation2 + $0x7c] sm:$0xf]  ;;  %v9093_v22 = vpop.f32.mrf.mxu1 }
 0x16e   : > { %v9070_v38 = vcombine.low %v10217_v12, %v10216_v25  ;;  %v9072_v13 = vcombine.low %v4640_v43, %v4650_v19  ;;  %v9081_v53 = vcombine.low %v4664_v4, %v4674_v9  ;;  %v6375_v52 = vrot.slane %v5239_v11, 9  ;;  %v5240_v35 = vld [vmem:[#allocation2 + $0x6c] sm:$0xe]  ;;  %10218 = vst [vmem:[#allocation26_spill] sm:$0xff] %v9093_v22 }
 0x16f   : > { %v5343_v23 = vrot.slane %v5341_v20, 4  ;;  %v5344_v58 = vrot.slane %v8995_v55, 5  ;;  %v9087_v43 = vcombine.low %v4688_v33, %v4698_v59  ;;  %v4726_v19 = vrot.slane %v4724_v40, 4  ;;  %v4534_v33 = vld [vmem:[#allocation2 + $0x84] sm:$0xf]  ;;  %v9122_v63 = vpop.f32.mrf.mxu1 }
 0x170   : > { %v4729_v10 = vrot.slane %v4727_v16, 5  ;;  %v4712_v55 = vsel %vm7322_vm13, %v4707_v2, %v8988_v36  ;;  %v4722_v4 = vsel %vm7322_vm13, %v4717_v17, %v4721_v8  ;;  %v9100_v9 = vrot.slane %v4733_v44, 5  ;;  %v9104_v16 = vld [vmem:[#allocation2 + $0x88] sm:$0xf]  ;;  %10220 = vst [vmem:[#allocation27_spill] sm:$0xff] %v9122_v63 }
 0x171   : > { %v4748_v59 = vshrl.u32 %v4531_v28, 16  ;;  %v4757_v11 = vshll.u32 %v9084_v49, 16  ;;  %v4761_v40 = vshrl.u32 %v9084_v49, 16  ;;  %v9110_v36 = vsel %vm7777_vm1, %v6375_v52, %v5341_v20 }
 0x172   : > { %6802 = vmatmul.mubr.msk.bf16.gmra.mxu1 %vm1631_vm12, %v10213_v1  ;;  %v9106_v1 = vpop.f32.mrf.mxu0  ;;  %v9114_v2 = vsel %vm7777_vm1, %v5343_v23, %v5344_v58  ;;  %v4743_v17 = vshll.u32 %v9091_v37, 16  ;;  %v6376_v8 = vrot.slane %v5240_v35, 9  ;;  %v4730_v44 = vor.u32 %v4729_v10, %v4726_v19  ;;  %v4533_v19 = vld [vmem:[#allocation2 + $0x80] sm:$0x1] }
 0x173   : > { %6805 = vmatprep.mubr.msk.bf16.mxu1 %vm1631_vm12, %v10215_v62  ;;  %v6998_v62 = vld [vmem:[#allocation2 + $0xcc] sm:$0xff]   ;;  %v4772_v25 = vshrl.u32 %v4534_v33, 16  ;;  %v4775_v12 = vshll.u32 %v4534_v33, 16  ;;  %v9124_v20 = vcombine.low %v4712_v55, %v4722_v4  ;;  %v4781_v23 = vshll.u32 %v9104_v16, 16 }
 0x174   : > { %6840 = vmatmul.mubr.msk.bf16.gmra.mxu0 %vm1631_vm12, %v6996_v56  ;;  %v4739_v56 = vrot.slane %v4737_v32, 4  ;;  %v5348_v32 = vrot.slane %v9030_v14, 5  ;;  %v4785_v58 = vshrl.u32 %v9104_v16, 16  ;;  %v10221_v14 = vcombine.low %v8734_v0, %v8747_v51  ;;  %v5241_v0 = vld [vmem:[#allocation2 + $0x78] sm:$0xe] }
 0x175   : > { %6843 = vmatprep.mubr.msk.bf16.mxu0 %vm1631_vm12, %v6997_v21  ;;  %v4751_v21 = vshll.u32 %v4531_v28, 16  ;;  %v10219_v28 = vcombine.low %v8730_v7, %v8739_v61  ;;  %v4750_v10 = vrot.slane %v4748_v59, 4  ;;  %v9133_v61 = vrot.slane %v4757_v11, 5 }
 0x176   : > { %v4740_v52 = vor.u32 %v4739_v56, %v9100_v9  ;;  %v4763_v35 = vrot.slane %v4761_v40, 4  ;;  %v9140_v4 = vrot.slane %v4743_v17, 5  ;;  %v5351_v56 = vrot.slane %v9091_v37, 5 }
 0x177   : > { %v4753_v7 = vrot.slane %v4751_v21, 5  ;;  %v5355_v51 = vrot.slane %v9084_v49, 5  ;;  %v10222_v59 = vcombine.low %v8840_v41, %v8844_v18  ;;  %v4731_v21 = vrot.slane %v4730_v44, 4 }
 0x178   : > { %v5350_v11 = vrot.slane %v5348_v32, 4  ;;  %v4774_v40 = vrot.slane %v4772_v25, 4  ;;  %v4741_v17 = vrot.slane %v4740_v52, 4  ;;  %v9154_v37 = vsel %vm7777_vm1, %v6376_v8, %v5348_v32  ;;  %v4536_v25 = vld [vmem:[#allocation2 + $0x8c] sm:$0x1] }
 0x179   : > { %v9156_v49 = vrot.slane %v4781_v23, 5  ;;  %v4787_v34 = vrot.slane %v4785_v58, 4  ;;  %v4754_v41 = vor.u32 %v4753_v7, %v4750_v10  ;;  %v4764_v18 = vor.u32 %v4763_v35, %v9133_v61 }
 0x17a   : > { %6806 = vmatmul.mubr.msk.bf16.gmra.mxu1 %vm1631_vm12, %v10219_v28  ;;  %v4777_v28 = vrot.slane %v4775_v12, 5  ;;  %v4767_v44 = vshll.u32 %v4533_v19, 16  ;;  %v9159_v12 = vld [vmem:[#allocation2 + $0x94] sm:$0xf]  ;;  %v5358_v63 = vrot.slane %v4533_v19, 5  ;;  %v4736_v8 = vsel %vm7322_vm13, %v4731_v21, %v9100_v9 }
 0x17b   : > { %6809 = vmatprep.mubr.msk.bf16.mxu1 %vm1631_vm12, %v10221_v14  ;;  %v9135_v33 = vpop.f32.mrf.mxu0  ;;  %v9148_v14 = vpop.f32.mrf.mxu1  ;;  %v9168_v32 = vsel %vm7777_vm1, %v5350_v11, %v5351_v56  ;;  %v5362_v58 = vrot.slane %v9104_v16, 5  ;;  %v10225_v7 = vcombine.low %v8753_v3, %v8761_v46  ;;  %v4788_v35 = vor.u32 %v4787_v34, %v9156_v49  ;;  %v5242_v9 = vld [vmem:[#allocation2 + $0x84] sm:$0xe] }
 0x17c   : > { %6844 = vmatmul.mubr.msk.bf16.gmra.mxu0 %vm1631_vm12, %v6998_v62  ;;  %v4537_v62 = vld [vmem:[#allocation2 + $0x90] sm:$0xf]  ;;  %10223 = vst [vmem:[#allocation28_spill] sm:$0xff] %v9148_v14  ;;  %v5357_v14 = vrot.slane %v5355_v51, 4  ;;  %v4778_v23 = vor.u32 %v4777_v28, %v4774_v40  ;;  %v4805_v21 = vshll.u32 %v9159_v12, 16  ;;  %v4809_v56 = vshrl.u32 %v9159_v12, 16 }
 0x17d   : > { %6883 = vmatprep.mubr.msk.bf16.mxu0 %vm1631_vm12, %v10222_v59  ;;  %v9150_v55 = vpop.f32.mrf.mxu0  ;;  %v6377_v59 = vrot.slane %v5241_v0, 9  ;;  %v4796_v52 = vshrl.u32 %v4537_v62, 16  ;;  %v4799_v22 = vshll.u32 %v4537_v62, 16  ;;  %v4791_v0 = vshll.u32 %v4536_v25, 16 }
 0x17e   : > { %v4746_v16 = vsel %vm7322_vm13, %v4741_v17, %v9140_v4  ;;  %v4755_v3 = vrot.slane %v4754_v41, 4  ;;  %v4765_v46 = vrot.slane %v4764_v18, 4  ;;  %v4769_v11 = vrot.slane %v4767_v44, 5  ;;  %v10228_v41 = vld [vmem:[#allocation18_spill] sm:$0xff]  ;;  %v10229_v18 = vld [vmem:[#allocation12_spill] sm:$0xff] }
 0x17f   : > { %v9161_v5 = vpop.f32.mrf.mxu0  ;;  %v10227_v34 = vcombine.low %v8854_v42, %v8858_v47  ;;  %v9195_v62 = vsel %vm7777_vm1, %v6377_v59, %v5355_v51  ;;  %v4798_v4 = vrot.slane %v4796_v52, 4  ;;  %v4801_v17 = vrot.slane %v4799_v22, 5 }
 0x180   : > { %v9171_v10 = vpop.f32.mrf.mxu1  ;;  %v10230_v44 = vcombine.low %v10228_v41, %v10229_v18  ;;  %v5364_v42 = vrot.slane %v5362_v58, 4  ;;  %v5365_v47 = vrot.slane %v4536_v25, 5  ;;  %v4789_v59 = vrot.slane %v4788_v35, 4 }
 0x181   : > { %10224 = vst [vmem:[#allocation29_spill] sm:$0xff] %v9171_v10  ;;  %v9177_v19 = vpop.f32.mrf.mxu0  ;;  %v4793_v27 = vrot.slane %v4791_v0, 5  ;;  %v4811_v22 = vrot.slane %v4809_v56, 4  ;;  %v4760_v25 = vsel %vm7322_vm13, %v4755_v3, %v9133_v61  ;;  %v5243_v56 = vld [vmem:[#allocation2 + $0x90] sm:$0xe] }
 0x182   : > { %6810 = vmatmul.mubr.msk.bf16.gmra.mxu1 %vm1631_vm12, %v10225_v7  ;;  %v9187_v40 = vpop.f32.mrf.mxu1  ;;  %v4779_v7 = vrot.slane %v4778_v23, 4  ;;  %v4770_v23 = vsel %vm7322_vm13, %v4765_v46, %v4769_v11  ;;  %v9235_v3 = vsel %vm7777_vm1, %v5364_v42, %v5365_v47  ;;  %v4815_v46 = vshll.u32 %v9207_v15, 16 }
 0x183   : > { %6849 = vmatprep.mubr.msk.bf16.mxu1 %vm1631_vm12, %v8887_v60  ;;  %10226 = vst [vmem:[#allocation30_spill] sm:$0xff] %v9187_v40  ;;  %v6681_v28 = vpop.f32.mrf.mxu0  ;;  %v9199_v60 = vsel %vm7777_vm1, %v5357_v14, %v5358_v63  ;;  %v6378_v40 = vrot.slane %v5242_v9, 9  ;;  %v9209_v63 = vrot.slane %v4805_v21, 5  ;;  %v9211_v14 = vcombine.low %v4736_v8, %v4746_v16  ;;  %v9220_v9 = vld [vmem:[#allocation2 + $0xa0] sm:$0xf]  ;;  %v10264_v54 = vld [vmem:[#allocation28_spill] sm:$0xff] }
 0x184   : > { %6884 = vmatmul.mubr.msk.bf16.vlgmr.msra.gmra.mxu0 %vm1631_vm12, %v10227_v34  ;;  %v4540_v34 = vld [vmem:[#allocation2 + $0x9c] sm:$0xf]  ;;  %v9205_v10 = vpop.f32.mrf.mxu1  ;;  %v4802_v8 = vor.u32 %v4801_v17, %v4798_v4  ;;  %v4784_v18 = vsel %vm7322_vm13, %v4779_v7, %v9156_v49  ;;  %v4794_v17 = vsel %vm7322_vm13, %v4789_v59, %v4793_v27  ;;  %v4829_v7 = vshll.u32 %v9220_v9, 16 }
 0x185   : > { %6887 = vmatprep.mubr.msk.bf16.mxu0 %vm1631_vm12, %v10230_v44  ;;  %10231 = vst [vmem:[#allocation18_spill] sm:$0xff] %v9205_v10  ;;  %v2435_v51 = vpop.f32.mrf.mxu0  ;;  %v4820_v16 = vshrl.u32 %v4540_v34, 16  ;;  %v4823_v41 = vshll.u32 %v4540_v34, 16  ;;  %v9231_v61 = vsel %vm7777_vm1, %v6378_v40, %v5362_v58  ;;  %v10233_v44 = vld [vmem:[#allocation14_spill] sm:$0xff]  ;;  %v4812_v49 = vor.u32 %v4811_v22, %v9209_v63 }
 0x186   : > { %v9222_v35 = vpop.f32.mrf.mxu1  ;;  %v4833_v58 = vshrl.u32 %v9220_v9, 16  ;;  %v10234_v40 = vld [vmem:[#allocation6_spill] sm:$0xff]  ;;  %v9248_v42 = vcombine.low %v4760_v25, %v4770_v23  ;;  %v6379_v47 = vrot.slane %v5243_v56, 9  ;;  %v10235_v27 = vcombine.low %v8973_v50, %v9013_v30  ;;  %v10237_v25 = vld [vmem:[#allocation7_spill] sm:$0xff] }
 0x187   : > { %10232 = vst [vmem:[#allocation12_spill] sm:$0xff] %v9222_v35  ;;  %v6682_v0 = vpop.f32.mrf.mxu0  ;;  %v9257_v22 = vrot.slane %v4802_v8, 4  ;;  %v9266_v56 = vcombine.low %v4784_v18, %v4794_v17  ;;  %v4817_v50 = vrot.slane %v4815_v46, 5  ;;  %v4543_v30 = vld [vmem:[#allocation2 + $0xa8] sm:$0xf]  ;;  %v4813_v59 = vrot.slane %v4812_v49, 4 }
 0x188   : > { %v6647_v11 = vpop.f32.mrf.mxu1  ;;  %v5372_v8 = vrot.slane %v9207_v15, 5  ;;  %v9280_v46 = vld [vmem:[#allocation2 + $0xa4] sm:$0x1] }
 0x189   : > { %v2438_v4 = vpop.f32.mrf.mxu0  ;;  %v2019_v34 = vadd.f32 %v6647_v11, %v10234_v40  ;;  %v4822_v11 = vrot.slane %v4820_v16, 4  ;;  %v4825_v40 = vrot.slane %v4823_v41, 5  ;;  %v9269_v16 = vrot.slane %v4829_v7, 5  ;;  %v9271_v41 = vld [vmem:[#allocation2 + $0xac] sm:$0xf] }
 0x18a   : > { %6850 = vmatmul.mubr.msk.bf16.vlgmr.msra.gmra.mxu1 %vm1631_vm12, %v10233_v44  ;;  %v5369_v44 = vrot.slane %v9159_v12, 5  ;;  %v2010_v21 = vpop.f32.mrf.mxu1  ;;  %v10238_v12 = vcombine.low %v9024_v45, %v9028_v48  ;;  %v4808_v15 = vsel %vm7322_vm13, %v9257_v22, %v9209_v63  ;;  %v4818_v63 = vsel %vm7322_vm13, %v4813_v59, %v4817_v50 }
 0x18b   : > { %6853 = vmatprep.mubr.msk.bf16.mxu1 %vm1631_vm12, %v9070_v38  ;;  %v6685_v52 = vpop.f32.mrf.mxu0  ;;  %v9259_v38 = vadd.f32 %v6681_v28, %v2019_v34  ;;  %v2011_v23 = vadd.f32 %v2010_v21, %v10237_v25  ;;  %v4835_v28 = vrot.slane %v4833_v58, 4  ;;  %v10240_v34 = vld [vmem:[#allocation16_spill] sm:$0xff]  ;;  %v4826_v7 = vor.u32 %v4825_v40, %v4822_v11  ;;  %v5244_v58 = vld [vmem:[#allocation2 + $0x9c] sm:$0xe] }
 0x18c   : > { %6888 = vmatmul.mubr.msk.bf16.gmra.mxu0 %vm1631_vm12, %v10235_v27  ;;  %v6648_v27 = vpop.f32.mrf.mxu1  ;;  %v9278_v48 = vsel %vm7777_vm1, %v6379_v47, %v5369_v44  ;;  %v5371_v18 = vrot.slane %v5369_v44, 4  ;;  %v4847_v25 = vshll.u32 %v4543_v30, 16  ;;  %v4853_v47 = vshll.u32 %v9271_v41, 16 }
 0x18d   : > { %10236 = vst [vmem:[#allocation14_spill] sm:$0xff] %v9259_v38  ;;  %6891 = vmatprep.mubr.msk.bf16.mxu0 %vm1631_vm12, %v10238_v12  ;;  %v2451_v35 = vpop.f32.mrf.mxu0  ;;  %v9273_v21 = vadd.f32 %v2435_v51, %v2011_v23  ;;  %v2022_v45 = vadd.f32 %v6648_v27, %v10240_v34  ;;  %v4844_v51 = vshrl.u32 %v4543_v30, 16  ;;  %v10242_v12 = vld [vmem:[#allocation11_spill] sm:$0xff]  ;;  %v4857_v44 = vshrl.u32 %v9271_v41, 16  ;;  %v1018_v34 = vld [vmem:[#allocation2 + $0xd4] sm:$0x1] }
 0x18e   : > { %v2013_v17 = vpop.f32.mrf.mxu1  ;;  %v4836_v22 = vor.u32 %v4835_v28, %v9269_v16  ;;  %v5376_v11 = vrot.slane %v9220_v9, 5  ;;  %v10244_v30 = vld [vmem:[#allocation13_spill] sm:$0xff]  ;;  %v10245_v59 = vcombine.low %v9041_v29, %v9046_v31  ;;  %v4827_v50 = vrot.slane %v4826_v7, 4 }
 0x18f   : > { %10239 = vst [vmem:[#allocation6_spill] sm:$0xff] %v9273_v21  ;;  %v6686_v49 = vpop.f32.mrf.mxu0  ;;  %v9286_v23 = vadd.f32 %v6682_v0, %v2022_v45  ;;  %v2014_v27 = vadd.f32 %v2013_v17, %v10242_v12  ;;  %v4839_v0 = vshll.u32 %v9280_v46, 16  ;;  %v6380_v17 = vrot.slane %v5244_v58, 9  ;;  %v1142_v12 = vld [vmem:[#allocation2 + $0xd4] sm:$0x1] }
 0x190   : > { %v6651_v21 = vpop.f32.mrf.mxu1  ;;  %v4846_v9 = vrot.slane %v4844_v51, 4  ;;  %v1071_v28 = vshll.u32 %v1018_v34, 16  ;;  %v4859_v58 = vrot.slane %v4857_v44, 4  ;;  %v4837_v31 = vrot.slane %v4836_v22, 4  ;;  %v4545_v51 = vld [vmem:[#allocation2 + $0xb0] sm:$0x1] }
 0x191   : > { %10241 = vst [vmem:[#allocation7_spill] sm:$0xff] %v9286_v23  ;;  %v2454_v38 = vpop.f32.mrf.mxu0  ;;  %v9298_v40 = vadd.f32 %v2438_v4, %v2014_v27  ;;  %v2035_v45 = vadd.f32 %v6651_v21, %v10244_v30  ;;  %v4849_v4 = vrot.slane %v4847_v25, 5  ;;  %v10246_v21 = vld [vmem:[#allocation19_spill] sm:$0xff]  ;;  %v5378_v7 = vrot.slane %v5376_v11, 4 }
 0x192   : > { %6854 = vmatmul.mubr.msk.bf16.gmra.mxu1 %vm1631_vm12, %v9072_v13  ;;  %v5379_v13 = vrot.slane %v9280_v46, 5  ;;  %v2026_v23 = vpop.f32.mrf.mxu1  ;;  %v9315_v46 = vrot.slane %v4853_v47, 5  ;;  %v4832_v22 = vsel %vm7322_vm13, %v4827_v50, %v9269_v16 }
 0x193   : > { %10243 = vst [vmem:[#allocation16_spill] sm:$0xff] %v9298_v40  ;;  %6857 = vmatprep.mubr.msk.bf16.mxu1 %vm1631_vm12, %v9081_v53  ;;  %v6689_v10 = vpop.f32.mrf.mxu0  ;;  %v9308_v27 = vadd.f32 %v6685_v52, %v2035_v45  ;;  %v2027_v30 = vadd.f32 %v2026_v23, %v10246_v21  ;;  %v10247_v53 = vcombine.low %v9110_v36, %v9114_v2  ;;  %v10249_v23 = vld [vmem:[#allocation21_spill] sm:$0xff]  ;;  %v5245_v2 = vld [vmem:[#allocation2 + $0xa8] sm:$0xe] }
 0x194   : > { %6892 = vmatmul.mubr.msk.bf16.gmra.mxu0 %vm1631_vm12, %v10245_v59  ;;  %v6652_v40 = vpop.f32.mrf.mxu1  ;;  %v4841_v59 = vrot.slane %v4839_v0, 5  ;;  %v1143_v52 = vsel %vm7256_vm9, %v1071_v28, %v1142_v12  ;;  %v9322_v21 = vcombine.low %v4808_v15, %v4818_v63  ;;  %v9326_v36 = vsel %vm7777_vm1, %v5371_v18, %v5372_v8  ;;  %v4546_v63 = vld [vmem:[#allocation2 + $0xb4] sm:$0xf]  ;;  %v10250_v8 = vld [vmem:[#allocation23_spill] sm:$0xff] }
 0x195   : > { %6895 = vmatprep.mubr.msk.bf16.mxu0 %vm1631_vm12, %v10247_v53  ;;  %v2467_v29 = vpop.f32.mrf.mxu0  ;;  %v9319_v34 = vadd.f32 %v2451_v35, %v2027_v30  ;;  %v2038_v45 = vadd.f32 %v6652_v40, %v10249_v23  ;;  %1144 = vst [vmem:[#allocation2 + $0xd4] sm:$0x1] %v1143_v52  ;;  %v9333_v35 = vsel %vm7777_vm1, %v6380_v17, %v5376_v11  ;;  %v5383_v15 = vrot.slane %v9271_v41, 5  ;;  %v9340_v30 = vld [vmem:[#allocation2 + $0xb8] sm:$0xf] }
 0x196   : > { %v2029_v47 = vpop.f32.mrf.mxu1  ;;  %v4850_v0 = vor.u32 %v4849_v4, %v4846_v9  ;;  %v4860_v12 = vor.u32 %v4859_v58, %v9315_v46  ;;  %v4863_v28 = vshll.u32 %v4545_v51, 16  ;;  %v4842_v11 = vsel %vm7322_vm13, %v4837_v31, %v4841_v59 }
 0x197   : > { %v6690_v44 = vpop.f32.mrf.mxu0  ;;  %v9336_v40 = vadd.f32 %v6686_v49, %v2038_v45  ;;  %v2030_v18 = vadd.f32 %v2029_v47, %v10250_v8  ;;  %v9348_v41 = vsel %vm7777_vm1, %v5378_v7, %v5379_v13  ;;  %v6381_v49 = vrot.slane %v5245_v2, 9  ;;  %v9378_v47 = vld [vmem:[#allocation2 + $0xbc] sm:$0x1]  ;;  %v4549_v8 = vld [vmem:[#allocation2 + $0xc0] sm:$0xf] }
 0x198   : > { %v6655_v53 = vpop.f32.mrf.mxu1  ;;  %v5386_v17 = vrot.slane %v4545_v51, 5  ;;  %v4868_v4 = vshrl.u32 %v4546_v63, 16  ;;  %v4871_v58 = vshll.u32 %v4546_v63, 16  ;;  %v10251_v31 = vcombine.low %v9154_v37, %v9168_v32 }
 0x199   : > { %v2470_v16 = vpop.f32.mrf.mxu0  ;;  %v9350_v50 = vadd.f32 %v2454_v38, %v2030_v18  ;;  %v2051_v9 = vadd.f32 %v6655_v53, %v8998_v26  ;;  %v4851_v13 = vrot.slane %v4850_v0, 4  ;;  %v5385_v59 = vrot.slane %v5383_v15, 4  ;;  %v9383_v18 = vld [vmem:[#allocation2 + $0xc4] sm:$0xf] }
 0x19a   : > { %6858 = vmatmul.mubr.msk.bf16.gmra.mxu1 %vm1631_vm12, %v9087_v43  ;;  %v2042_v43 = vpop.f32.mrf.mxu1  ;;  %v4877_v7 = vshll.u32 %v9340_v30, 16  ;;  %v4881_v38 = vshrl.u32 %v9340_v30, 16  ;;  %v4861_v52 = vrot.slane %v4860_v12, 4  ;;  %v4865_v23 = vrot.slane %v4863_v28, 5 }
 0x19b   : > { %6861 = vmatprep.mubr.msk.bf16.mxu1 %vm1631_vm12, %v9124_v20  ;;  %v6693_v25 = vpop.f32.mrf.mxu0  ;;  %v9361_v51 = vadd.f32 %v6689_v10, %v2051_v9  ;;  %v2043_v26 = vadd.f32 %v2042_v43, %v9032_v57  ;;  %v10252_v20 = vcombine.low %v9195_v62, %v9199_v60  ;;  %v6396_v45 = vcombine.low %v9278_v48, %v9326_v36 }
 0x19c   : > { %6896 = vmatmul.mubr.msk.bf16.gmra.mxu0 %vm1631_vm12, %v10251_v31  ;;  %v6656_v37 = vpop.f32.mrf.mxu1  ;;  %v9370_v2 = vcombine.low %v4832_v22, %v4842_v11  ;;  %v6397_v10 = vcombine.low %v9333_v35, %v9348_v41  ;;  %v9376_v57 = vsel %vm7777_vm1, %v6381_v49, %v5383_v15  ;;  %v4870_v0 = vrot.slane %v4868_v4, 4  ;;  %v5248_v35 = vld [vmem:[#allocation2 + $0xcc] sm:$0xe] }
 0x19d   : > { %6899 = vmatprep.mubr.msk.bf16.mxu0 %vm1631_vm12, %v10252_v20  ;;  %v2483_v32 = vpop.f32.mrf.mxu0  ;;  %v9380_v62 = vadd.f32 %v2467_v29, %v2043_v26  ;;  %v2054_v60 = vadd.f32 %v6656_v37, %v9079_v39  ;;  %v4873_v63 = vrot.slane %v4871_v58, 5  ;;  %v4856_v22 = vsel %vm7322_vm13, %v4851_v13, %v9315_v46  ;;  %v5246_v39 = vld [vmem:[#allocation2 + $0xb4] sm:$0xe] }
 0x19e   : > { %v2045_v48 = vpop.f32.mrf.mxu1  ;;  %v9390_v15 = vsel %vm7777_vm1, %v5385_v59, %v5386_v17  ;;  %v9392_v12 = vrot.slane %v4877_v7, 5  ;;  %v9394_v29 = vrot.slane %v4881_v38, 4  ;;  %v4866_v11 = vsel %vm7322_vm13, %v4861_v52, %v4865_v23 }
 0x19f   : > { %v6694_v36 = vpop.f32.mrf.mxu0  ;;  %v9396_v28 = vadd.f32 %v6690_v44, %v2054_v60  ;;  %v2046_v53 = vadd.f32 %v2045_v48, %v9106_v1  ;;  %v4887_v49 = vshll.u32 %v9378_v47, 16  ;;  %v4892_v17 = vshrl.u32 %v4549_v8, 16  ;;  %v4552_v48 = vld [vmem:[#allocation2 + $0xcc] sm:$0xf] }
 0x1a0   : > { %v6659_v9 = vpop.f32.mrf.mxu1  ;;  %v4895_v4 = vshll.u32 %v4549_v8, 16  ;;  %v4901_v58 = vshll.u32 %v9383_v18, 16  ;;  %v4905_v43 = vshrl.u32 %v9383_v18, 16  ;;  %v4874_v31 = vor.u32 %v4873_v63, %v4870_v0 }
 0x1a1   : > { %v2486_v46 = vpop.f32.mrf.mxu0  ;;  %v9406_v44 = vadd.f32 %v2470_v16, %v2046_v53  ;;  %v2067_v1 = vadd.f32 %v6659_v9, %v9135_v33  ;;  %v6382_v13 = vrot.slane %v5246_v39, 9  ;;  %v9415_v38 = vcombine.low %v4856_v22, %v4866_v11  ;;  %v9441_v11 = vld [vmem:[#allocation2 + $0xd0] sm:$0xf] }
 0x1a2   : > { %6862 = vmatmul.mubr.msk.bf16.gmra.mxu1 %vm1631_vm12, %v9211_v14  ;;  %v2058_v59 = vpop.f32.mrf.mxu1  ;;  %v10253_v14 = vcombine.low %v9231_v61, %v9235_v3  ;;  %v6398_v16 = vcombine.low %v9376_v57, %v9390_v15  ;;  %v4884_v33 = vor.u32 %v9394_v29, %v9392_v12  ;;  %v5390_v26 = vrot.slane %v9340_v30, 5  ;;  %v4551_v61 = vld [vmem:[#allocation2 + $0xc8] sm:$0x1]  ;;  %v5247_v3 = vld [vmem:[#allocation2 + $0xc0] sm:$0xe] }
 0x1a3   : > { %6865 = vmatprep.mubr.msk.bf16.mxu1 %vm1631_vm12, %v9248_v42  ;;  %v6697_v7 = vpop.f32.mrf.mxu0  ;;  %v9422_v42 = vadd.f32 %v6693_v25, %v2067_v1  ;;  %v2059_v20 = vadd.f32 %v2058_v59, %v9150_v55  ;;  %v9426_v52 = vrot.slane %v4887_v49, 5  ;;  %v5397_v23 = vrot.slane %v9383_v18, 5 }
 0x1a4   : > { %6900 = vmatmul.mubr.msk.bf16.gmra.mxu0 %vm1631_vm12, %v10253_v14  ;;  %v6660_v37 = vpop.f32.mrf.mxu1  ;;  %v4894_v57 = vrot.slane %v4892_v17, 4  ;;  %v4897_v0 = vrot.slane %v4895_v4, 5  ;;  %v9429_v63 = vrot.slane %v4901_v58, 5  ;;  %v4907_v8 = vrot.slane %v4905_v43, 4 }
 0x1a5   : > { %6903 = vmatprep.mubr.msk.bf16.mxu0 %vm1631_vm12, %v6396_v45  ;;  %v2499_v60 = vpop.f32.mrf.mxu0  ;;  %v9431_v30 = vadd.f32 %v2483_v32, %v2059_v20  ;;  %v2070_v25 = vadd.f32 %v6660_v37, %v9161_v5  ;;  %v9434_v55 = vrot.slane %v4874_v31, 4  ;;  %v9438_v45 = vsel %vm7777_vm1, %v6382_v13, %v5390_v26  ;;  %v10254_v13 = vld [vmem:[#allocation8_spill] sm:$0xff] }
 0x1a6   : > { %v2061_v22 = vpop.f32.mrf.mxu1  ;;  %v5392_v15 = vrot.slane %v5390_v26, 4  ;;  %v5393_v29 = vrot.slane %v9378_v47, 5  ;;  %v4911_v39 = vshll.u32 %v4551_v61, 16  ;;  %v6383_v53 = vrot.slane %v5247_v3, 9  ;;  %v10255_v3 = vld [vmem:[#allocation10_spill] sm:$0xff] }
 0x1a7   : > { %v6698_v18 = vpop.f32.mrf.mxu0  ;;  %v9443_v32 = vadd.f32 %v6694_v36, %v2070_v25  ;;  %v2062_v5 = vadd.f32 %v2061_v22, %v9177_v19  ;;  %v5399_v49 = vrot.slane %v5397_v23, 4  ;;  %v5400_v9 = vrot.slane %v4551_v61, 5 }
 0x1a8   : > { %v6663_v17 = vpop.f32.mrf.mxu1  ;;  %v4898_v58 = vor.u32 %v4897_v0, %v4894_v57  ;;  %v4908_v43 = vor.u32 %v4907_v8, %v9429_v63  ;;  %v4916_v1 = vshrl.u32 %v4552_v48, 16  ;;  %v4919_v47 = vshll.u32 %v4552_v48, 16 }
 0x1a9   : > { %v2502_v4 = vpop.f32.mrf.mxu0  ;;  %v9449_v31 = vadd.f32 %v2486_v46, %v2062_v5  ;;  %v2083_v59 = vadd.f32 %v6663_v17, %v10254_v13  ;;  %v4925_v19 = vshll.u32 %v9441_v11, 16  ;;  %v4929_v36 = vshrl.u32 %v9441_v11, 16 }
 0x1aa   : > { %6866 = vmatmul.mubr.msk.bf16.gmra.mxu1 %vm1631_vm12, %v9266_v56  ;;  %v2074_v14 = vpop.f32.mrf.mxu1  ;;  %v4885_v56 = vrot.slane %v4884_v33, 4  ;;  %v5394_v46 = vsel %vm7777_vm1, %v5392_v15, %v5393_v29  ;;  %v4913_v20 = vrot.slane %v4911_v39, 5  ;;  %v5398_v61 = vsel %vm7777_vm1, %v6383_v53, %v5397_v23 }
 0x1ab   : > { %6869 = vmatprep.mubr.msk.bf16.mxu1 %vm1631_vm12, %v9322_v21  ;;  %v6701_v26 = vpop.f32.mrf.mxu0  ;;  %v9464_v21 = vadd.f32 %v6697_v7, %v2083_v59  ;;  %v2075_v37 = vadd.f32 %v2074_v14, %v10255_v3  ;;  %v5401_v57 = vsel %vm7777_vm1, %v5399_v49, %v5400_v9  ;;  %v5404_v41 = vrot.slane %v9441_v11, 5  ;;  %v10256_v7 = vld [vmem:[#allocation15_spill] sm:$0xff]  ;;  %v4554_v49 = vld [vmem:[#allocation2 + $0xd4] sm:$0x1] }
 0x1ac   : > { %6904 = vmatmul.mubr.msk.bf16.gmra.mxu0 %vm1631_vm12, %v6397_v10  ;;  %v6664_v10 = vpop.f32.mrf.mxu1  ;;  %v4899_v0 = vrot.slane %v4898_v58, 4  ;;  %v4909_v8 = vrot.slane %v4908_v43, 4  ;;  %v4918_v25 = vrot.slane %v4916_v1, 4  ;;  %v4921_v48 = vrot.slane %v4919_v47, 5 }
 0x1ad   : > { %6907 = vmatprep.mubr.msk.bf16.mxu0 %vm1631_vm12, %v6398_v16  ;;  %v2515_v33 = vpop.f32.mrf.mxu0  ;;  %v9471_v22 = vadd.f32 %v2499_v60, %v2075_v37  ;;  %v2086_v23 = vadd.f32 %v6664_v10, %v10256_v7  ;;  %v4927_v15 = vrot.slane %v4925_v19, 5  ;;  %v4931_v29 = vrot.slane %v4929_v36, 4  ;;  %v10257_v60 = vld [vmem:[#allocation17_spill] sm:$0xff]  ;;  %v10258_v19 = vld [vmem:[#allocation20_spill] sm:$0xff] }
 0x1ae   : > { %v2077_v39 = vpop.f32.mrf.mxu1  ;;  %v4880_v53 = vsel %vm7322_vm13, %v9434_v55, %v9392_v12  ;;  %v6399_v11 = vcombine.low %v9438_v45, %v5394_v46  ;;  %v6400_v5 = vcombine.low %v5398_v61, %v5401_v57  ;;  %v6384_v9 = vrot.slane %v5248_v35, 9 }
 0x1af   : > { %v6702_v16 = vpop.f32.mrf.mxu0  ;;  %v9479_v17 = vadd.f32 %v6698_v18, %v2086_v23  ;;  %v2078_v58 = vadd.f32 %v2077_v39, %v10257_v60  ;;  %v5406_v43 = vrot.slane %v5404_v41, 4  ;;  %v5407_v1 = vrot.slane %v4554_v49, 5  ;;  %v10262_v60 = vld [vmem:[#allocation26_spill] sm:$0xff] }
 0x1b0   : > { %v4890_v12 = vsel %vm7322_vm13, %v4885_v56, %v9426_v52  ;;  %v4904_v55 = vsel %vm7322_vm13, %v4899_v0, %v9429_v63  ;;  %v4914_v45 = vsel %vm7322_vm13, %v4909_v8, %v4913_v20  ;;  %v4922_v18 = vor.u32 %v4921_v48, %v4918_v25  ;;  %v10259_v63 = vld [vmem:[#allocation22_spill] sm:$0xff] }
 0x1b1   : > { %v6667_v47 = vpop.f32.mrf.mxu1  ;;  %v2518_v13 = vpop.f32.mrf.mxu0  ;;  %v9492_v59 = vadd.f32 %v2502_v4, %v2078_v58  ;;  %v4935_v14 = vshll.u32 %v4554_v49, 16  ;;  %v5405_v4 = vsel %vm7777_vm1, %v6384_v9, %v5404_v41  ;;  %v5408_v20 = vsel %vm7777_vm1, %v5406_v43, %v5407_v1  ;;  %v10260_v41 = vld [vmem:[#allocation24_spill] sm:$0xff] }
 0x1b2   : > { %6870 = vmatmul.mubr.msk.bf16.gmra.mxu1 %vm1631_vm12, %v9370_v2  ;;  %v2099_v36 = vadd.f32 %v6667_v47, %v10258_v19  ;;  %v4932_v2 = vor.u32 %v4931_v29, %v4927_v15  ;;  %v6351_v57 = vcombine.low %v4904_v55, %v4914_v45  ;;  %v4923_v35 = vrot.slane %v4922_v18, 4 }
 0x1b3   : > { %6873 = vmatprep.mubr.msk.bf16.mxu1 %vm1631_vm12, %v9415_v38  ;;  %v2090_v46 = vpop.f32.mrf.mxu1  ;;  %v6705_v61 = vpop.f32.mrf.mxu0  ;;  %v6350_v38 = vcombine.low %v4880_v53, %v4890_v12  ;;  %v4937_v8 = vrot.slane %v4935_v14, 5  ;;  %v6401_v7 = vcombine.low %v5405_v4, %v5408_v20  ;;  %v10263_v12 = vld [vmem:[#allocation27_spill] sm:$0xff]  ;;  %v10266_v20 = vld [vmem:[#allocation30_spill] sm:$0xff] }
 0x1b4   : > { %6908 = vmatmul.mubr.msk.bf16.gmra.mxu0 %vm1631_vm12, %v6399_v11  ;;  %v9498_v52 = vadd.f32 %v6701_v26, %v2099_v36  ;;  %v2091_v56 = vadd.f32 %v2090_v46, %v10259_v63  ;;  %v4933_v0 = vrot.slane %v4932_v2, 4  ;;  %v10261_v11 = vld [vmem:[#allocation25_spill] sm:$0xff] }
 0x1b5   : > { %6911 = vmatprep.mubr.msk.bf16.mxu0 %vm1631_vm12, %v6400_v5  ;;  %v6668_v3 = vpop.f32.mrf.mxu1  ;;  %v2531_v37 = vpop.f32.mrf.mxu0  ;;  %v10265_v46 = vld [vmem:[#allocation29_spill] sm:$0xff] }
 0x1b6   : > { %v9506_v10 = vadd.f32 %v2515_v33, %v2091_v56  ;;  %v2102_v26 = vadd.f32 %v6668_v3, %v8986_v24  ;;  %v4928_v24 = vsel %vm7322_vm13, %v4923_v35, %v4927_v15  ;;  %v4938_v5 = vsel %vm7322_vm13, %v4933_v0, %v4937_v8  ;;  %v10267_v35 = vld [vmem:[#allocation18_spill] sm:$0xff] }
 0x1b7   : > { %v2093_v25 = vpop.f32.mrf.mxu1  ;;  %v6706_v48 = vpop.f32.mrf.mxu0  ;;  %v6352_v1 = vcombine.low %v4928_v24, %v4938_v5 }
 0x1b8   : > { %v9509_v23 = vadd.f32 %v6702_v16, %v2102_v26  ;;  %v2094_v29 = vadd.f32 %v2093_v25, %v10260_v41 }
 0x1b9   : > { %v2534_v39 = vpop.f32.mrf.mxu0 }
 0x1ba   : > { %v6671_v6 = vpop.f32.mrf.mxu1  ;;  %6874 = vmatmul.mubr.msk.bf16.gmra.mxu1 %vm1631_vm12, %v6350_v38  ;;  %v9513_v53 = vadd.f32 %v2518_v13, %v2094_v29 }
 0x1bb   : > { %v2115_v33 = vadd.f32 %v6671_v6, %v10261_v11  ;;  %6877 = vmatprep.mubr.msk.bf16.mxu1 %vm1631_vm12, %v6351_v57  ;;  %v6709_v49 = vpop.f32.mrf.mxu0 }
 0x1bc   : > { %v2106_v16 = vpop.f32.mrf.mxu1  ;;  %6912 = vmatmul.mubr.msk.bf16.gmra.mxu0 %vm1631_vm12, %v6401_v7 }
 0x1bd   : > { %v9522_v9 = vadd.f32 %v6705_v61, %v2115_v33  ;;  %v2107_v58 = vadd.f32 %v2106_v16, %v10262_v60  ;;  %v2547_v47 = vpop.f32.mrf.mxu0  ;;  %v10270_v16 = vld [vmem:[#allocation6_spill] sm:$0xff] }
 0x1be   : > { %v6672_v43 = vpop.f32.mrf.mxu1 }
 0x1bf   : > { %v9525_v13 = vadd.f32 %v2531_v37, %v2107_v58  ;;  %v2118_v55 = vadd.f32 %v6672_v43, %v10263_v12  ;;  %v6710_v15 = vpop.f32.mrf.mxu0 }
 0x1c0   : > { %v2109_v45 = vpop.f32.mrf.mxu1 }
 0x1c1   : > { %v9528_v18 = vadd.f32 %v6706_v48, %v2118_v55  ;;  %v2110_v19 = vadd.f32 %v2109_v45, %v10264_v54  ;;  %v2550_v2 = vpop.f32.mrf.mxu0  ;;  %v10268_v48 = vld [vmem:[#allocation12_spill] sm:$0xff] }
 0x1c2   : > { %v6675_v36 = vpop.f32.mrf.mxu1  ;;  %6878 = vmatmul.mubr.msk.bf16.gmra.mxu1 %vm1631_vm12, %v6352_v1  ;;  %v10271_v1 = vld [vmem:[#allocation7_spill] sm:$0xff] }
 0x1c3   : > { %v9532_v14 = vadd.f32 %v2534_v39, %v2110_v19  ;;  %v2131_v61 = vadd.f32 %v6675_v36, %v10265_v46  ;;  %v6749_v56 = vpop.f32.mrf.mxu0  ;;  %v10269_v39 = vld [vmem:[#allocation14_spill] sm:$0xff] }
 0x1c4   : > { %v2122_v63 = vpop.f32.mrf.mxu1 }
 0x1c5   : > { %v9535_v4 = vadd.f32 %v6709_v49, %v2131_v61  ;;  %v2123_v3 = vadd.f32 %v2122_v63, %v10266_v20  ;;  %v3519_v37 = vpop.f32.mrf.mxu0 }
 0x1c6   : > { %v6676_v38 = vpop.f32.mrf.mxu1 }
 0x1c7   : > { %v9538_v57 = vadd.f32 %v2547_v47, %v2123_v3  ;;  %v2134_v26 = vadd.f32 %v6676_v38, %v10267_v35  ;;  %v6750_v8 = vpop.f32.mrf.mxu0 }
 0x1c8   : > { %v2125_v0 = vpop.f32.mrf.mxu1 }
 0x1c9   : > { %v9541_v25 = vadd.f32 %v6710_v15, %v2134_v26  ;;  %v2126_v7 = vadd.f32 %v2125_v0, %v10268_v48  ;;  %v3522_v29 = vpop.f32.mrf.mxu0  ;;  %v10272_v15 = vld [vmem:[#allocation16_spill] sm:$0xff] }
 0x1ca   : > { %v6715_v41 = vpop.f32.mrf.mxu1 }
 0x1cb   : > { %v9544_v6 = vadd.f32 %v2550_v2, %v2126_v7  ;;  %v2922_v11 = vadd.f32 %v6715_v41, %v10269_v39 }
 0x1cc   : > { %v2793_v33 = vpop.f32.mrf.mxu1  ;;  %v6753_v24 = vpop.f32.mrf.mxu0 }
 0x1cd   : > { %v9547_v5 = vadd.f32 %v6749_v56, %v2922_v11  ;;  %v2920_v49 = vadd.f32 %v2793_v33, %v10270_v16 }
 0x1ce   : > { %v6716_v60 = vpop.f32.mrf.mxu1  ;;  %v3535_v58 = vpop.f32.mrf.mxu0 }
 0x1cf   : > { %v9550_v43 = vadd.f32 %v3519_v37, %v2920_v49  ;;  %v2923_v47 = vadd.f32 %v6716_v60, %v10271_v1 }
 0x1d0   : > { %v2796_v12 = vpop.f32.mrf.mxu1  ;;  %v6754_v55 = vpop.f32.mrf.mxu0 }
 0x1d1   : > { %v9553_v45 = vadd.f32 %v6750_v8, %v2923_v47  ;;  %v2921_v54 = vadd.f32 %v2796_v12, %v10272_v15 }
 0x1d2   : > { %v6719_v19 = vpop.f32.mrf.mxu1  ;;  %v3538_v36 = vpop.f32.mrf.mxu0 }
 0x1d3   : > { %v9556_v2 = vadd.f32 %v3522_v29, %v2921_v54  ;;  %v2926_v46 = vadd.f32 %v6719_v19, %v9308_v27 }
 0x1d4   : > { %v2809_v61 = vpop.f32.mrf.mxu1  ;;  %v6757_v63 = vpop.f32.mrf.mxu0 }
 0x1d5   : > { %v9559_v56 = vadd.f32 %v6753_v24, %v2926_v46  ;;  %v2924_v20 = vadd.f32 %v2809_v61, %v9319_v34 }
 0x1d6   : > { %v6720_v3 = vpop.f32.mrf.mxu1  ;;  %v3551_v38 = vpop.f32.mrf.mxu0 }
 0x1d7   : > { %v9562_v37 = vadd.f32 %v3535_v58, %v2924_v20  ;;  %v2927_v35 = vadd.f32 %v6720_v3, %v9336_v40 }
 0x1d8   : > { %v2812_v26 = vpop.f32.mrf.mxu1  ;;  %v6758_v0 = vpop.f32.mrf.mxu0 }
 0x1d9   : > { %v9565_v8 = vadd.f32 %v6754_v55, %v2927_v35  ;;  %v2925_v48 = vadd.f32 %v2812_v26, %v9350_v50 }
 0x1da   : > { %v6723_v7 = vpop.f32.mrf.mxu1  ;;  %v3554_v27 = vpop.f32.mrf.mxu0 }
 0x1db   : > { %v9568_v41 = vadd.f32 %v3538_v36, %v2925_v48  ;;  %v2930_v29 = vadd.f32 %v6723_v7, %v9361_v51 }
 0x1dc   : > { %v2825_v39 = vpop.f32.mrf.mxu1  ;;  %v6761_v34 = vpop.f32.mrf.mxu0 }
 0x1dd   : > { %v9571_v11 = vadd.f32 %v6757_v63, %v2930_v29  ;;  %v2928_v33 = vadd.f32 %v2825_v39, %v9380_v62 }
 0x1de   : > { %v6724_v24 = vpop.f32.mrf.mxu1  ;;  %v3567_v40 = vpop.f32.mrf.mxu0 }
 0x1df   : > { %v9574_v16 = vadd.f32 %v3551_v38, %v2928_v33  ;;  %v2931_v49 = vadd.f32 %v6724_v24, %v9396_v28 }
 0x1e0   : > { %v2828_v60 = vpop.f32.mrf.mxu1  ;;  %v6762_v50 = vpop.f32.mrf.mxu0 }
 0x1e1   : > { %v9577_v58 = vadd.f32 %v6758_v0, %v2931_v49  ;;  %v2929_v1 = vadd.f32 %v2828_v60, %v9406_v44 }
 0x1e2   : > { %v6727_v47 = vpop.f32.mrf.mxu1  ;;  %v3570_v51 = vpop.f32.mrf.mxu0 }
 0x1e3   : > { %v9580_v12 = vadd.f32 %v3554_v27, %v2929_v1  ;;  %v2934_v55 = vadd.f32 %v6727_v47, %v9422_v42 }
 0x1e4   : > { %v2841_v15 = vpop.f32.mrf.mxu1  ;;  %v6765_v62 = vpop.f32.mrf.mxu0 }
 0x1e5   : > { %v9583_v54 = vadd.f32 %v6761_v34, %v2934_v55  ;;  %v2932_v19 = vadd.f32 %v2841_v15, %v9431_v30 }
 0x1e6   : > { %v6728_v36 = vpop.f32.mrf.mxu1  ;;  %v3583_v28 = vpop.f32.mrf.mxu0 }
 0x1e7   : > { %v9586_v46 = vadd.f32 %v3567_v40, %v2932_v19  ;;  %v2935_v61 = vadd.f32 %v6728_v36, %v9443_v32 }
 0x1e8   : > { %v2844_v63 = vpop.f32.mrf.mxu1  ;;  %v6766_v44 = vpop.f32.mrf.mxu0 }
 0x1e9   : > { %v9589_v20 = vadd.f32 %v6762_v50, %v2935_v61  ;;  %v2933_v3 = vadd.f32 %v2844_v63, %v9449_v31 }
 0x1ea   : > { %v6731_v38 = vpop.f32.mrf.mxu1  ;;  %v3586_v42 = vpop.f32.mrf.mxu0 }
 0x1eb   : > { %v9592_v35 = vadd.f32 %v3570_v51, %v2933_v3  ;;  %v2938_v26 = vadd.f32 %v6731_v38, %v9464_v21 }
 0x1ec   : > { %v2857_v0 = vpop.f32.mrf.mxu1  ;;  %v6769_v30 = vpop.f32.mrf.mxu0 }
 0x1ed   : > { %v9595_v48 = vadd.f32 %v6765_v62, %v2938_v26  ;;  %v2936_v7 = vadd.f32 %v2857_v0, %v9471_v22 }
 0x1ee   : > { %v6732_v27 = vpop.f32.mrf.mxu1  ;;  %v3599_v32 = vpop.f32.mrf.mxu0 }
 0x1ef   : > { %v9598_v29 = vadd.f32 %v3583_v28, %v2936_v7  ;;  %v2939_v39 = vadd.f32 %v6732_v27, %v9479_v17 }
 0x1f0   : > { %v2860_v34 = vpop.f32.mrf.mxu1  ;;  %v6770_v31 = vpop.f32.mrf.mxu0 }
 0x1f1   : > { %v9601_v33 = vadd.f32 %v6766_v44, %v2939_v39  ;;  %v2937_v24 = vadd.f32 %v2860_v34, %v9492_v59 }
 0x1f2   : > { %v6735_v40 = vpop.f32.mrf.mxu1  ;;  %v3602_v21 = vpop.f32.mrf.mxu0 }
 0x1f3   : > { %v9604_v49 = vadd.f32 %v3586_v42, %v2937_v24  ;;  %v2942_v60 = vadd.f32 %v6735_v40, %v9498_v52 }
 0x1f4   : > { %v2873_v50 = vpop.f32.mrf.mxu1  ;;  %v6773_v22 = vpop.f32.mrf.mxu0 }
 0x1f5   : > { %10273 = vst [vmem:[#allocation11_spill] sm:$0xff] %v9604_v49  ;;  %v9607_v1 = vadd.f32 %v6769_v30, %v2942_v60  ;;  %v2940_v47 = vadd.f32 %v2873_v50, %v9506_v10 }
 0x1f6   : > { %v6736_v51 = vpop.f32.mrf.mxu1  ;;  %v3615_v17 = vpop.f32.mrf.mxu0 }
 0x1f7   : > { %10274 = vst [vmem:[#allocation13_spill] sm:$0xff] %v9607_v1  ;;  %v9610_v55 = vadd.f32 %v3599_v32, %v2940_v47  ;;  %v2943_v15 = vadd.f32 %v6736_v51, %v9509_v23 }
 0x1f8   : > { %v2876_v62 = vpop.f32.mrf.mxu1  ;;  %v6774_v59 = vpop.f32.mrf.mxu0 }
 0x1f9   : > { %10275 = vst [vmem:[#allocation19_spill] sm:$0xff] %v9610_v55  ;;  %v9613_v19 = vadd.f32 %v6770_v31, %v2943_v15  ;;  %v2941_v36 = vadd.f32 %v2876_v62, %v9513_v53 }
 0x1fa   : > { %v6739_v28 = vpop.f32.mrf.mxu1  ;;  %v3618_v52 = vpop.f32.mrf.mxu0 }
 0x1fb   : > { %10276 = vst [vmem:[#allocation9_spill] sm:$0xff] %v9613_v19  ;;  %v9616_v61 = vadd.f32 %v3602_v21, %v2941_v36  ;;  %v2946_v63 = vadd.f32 %v6739_v28, %v9522_v9 }
 0x1fc   : > { %v2889_v44 = vpop.f32.mrf.mxu1  ;;  %v6777_v10 = vpop.f32.mrf.mxu0 }
 0x1fd   : > { %10277 = vst [vmem:[#allocation21_spill] sm:$0xff] %v9616_v61  ;;  %v9619_v3 = vadd.f32 %v6773_v22, %v2946_v63  ;;  %v2944_v38 = vadd.f32 %v2889_v44, %v9525_v13 }
 0x1fe   : > { %v6740_v42 = vpop.f32.mrf.mxu1  ;;  %v3631_v23 = vpop.f32.mrf.mxu0 }
 0x1ff   : > { %10278 = vst [vmem:[#allocation23_spill] sm:$0xff] %v9619_v3  ;;  %v9622_v26 = vadd.f32 %v3615_v17, %v2944_v38  ;;  %v2947_v0 = vadd.f32 %v6740_v42, %v9528_v18 }
 0x200   : > { %v2892_v30 = vpop.f32.mrf.mxu1  ;;  %v6778_v53 = vpop.f32.mrf.mxu0 }
 0x201   : > { %10279 = vst [vmem:[#allocation8_spill] sm:$0xff] %v9622_v26  ;;  %v9625_v7 = vadd.f32 %v6774_v59, %v2947_v0  ;;  %v2945_v27 = vadd.f32 %v2892_v30, %v9532_v14 }
 0x202   : > { %v6743_v32 = vpop.f32.mrf.mxu1  ;;  %v3634_v9 = vpop.f32.mrf.mxu0 }
 0x203   : > { %10280 = vst [vmem:[#allocation10_spill] sm:$0xff] %v9625_v7  ;;  %v9628_v39 = vadd.f32 %v3618_v52, %v2945_v27  ;;  %v2950_v34 = vadd.f32 %v6743_v32, %v9535_v4 }
 0x204   : > { %v2905_v31 = vpop.f32.mrf.mxu1  ;;  %v9631_v13 = vpop.f32.mrf.mxu0 }
 0x205   : > { %10281 = vst [vmem:[#allocation15_spill] sm:$0xff] %v9628_v39  ;;  %v9633_v24 = vadd.f32 %v6777_v10, %v2950_v34  ;;  %v2948_v40 = vadd.f32 %v2905_v31, %v9538_v57 }
 0x206   : > { %v6744_v18 = vpop.f32.mrf.mxu1  ;;  %v9636_v21 = vpop.f32.mrf.mxu0 }
 0x207   : > { %10282 = vst [vmem:[#allocation17_spill] sm:$0xff] %v9633_v24  ;;  %v9638_v60 = vadd.f32 %v3631_v23, %v2948_v40  ;;  %v2951_v14 = vadd.f32 %v6744_v18, %v9541_v25 }
 0x208   : > { %v2908_v50 = vpop.f32.mrf.mxu1  ;;  %v9641_v22 = vpop.f32.mrf.mxu0 }
 0x209   : > { %10283 = vst [vmem:[#allocation20_spill] sm:$0xff] %v9638_v60  ;;  %v9643_v47 = vadd.f32 %v6778_v53, %v2951_v14  ;;  %v2949_v4 = vadd.f32 %v2908_v50, %v9544_v6 }
 0x20a   : > { %v6783_v51 = vpop.f32.mrf.mxu1  ;;  %v9646_v17 = vpop.f32.mrf.mxu0 }
 0x20b   : > { %10284 = vst [vmem:[#allocation22_spill] sm:$0xff] %v9643_v47  ;;  %v9648_v15 = vadd.f32 %v3634_v9, %v2949_v4 }
 0x20c   : > { %v3989_v57 = vpop.f32.mrf.mxu1  ;;  %v9650_v62 = vpop.f32.mrf.mxu0 }
 0x20d   : > { %10285 = vst [vmem:[#allocation24_spill] sm:$0xff] %v9648_v15 }
 0x20e   : > { %v6784_v59 = vpop.f32.mrf.mxu1  ;;  %v9652_v36 = vpop.f32.mrf.mxu0 }
 0x210   : > { %v3992_v28 = vpop.f32.mrf.mxu1  ;;  %v9654_v25 = vpop.f32.mrf.mxu0 }
 0x212   : > { %v6787_v52 = vpop.f32.mrf.mxu1  ;;  %v9656_v63 = vpop.f32.mrf.mxu0 }
 0x214   : > { %v4005_v44 = vpop.f32.mrf.mxu1  ;;  %v9658_v10 = vpop.f32.mrf.mxu0 }
 0x216   : > { %v9660_v6 = vpop.f32.mrf.mxu1  ;;  %v9662_v38 = vpop.f32.mrf.mxu0 }
 0x218   : > { %v9664_v42 = vpop.f32.mrf.mxu1  ;;  %v9666_v23 = vpop.f32.mrf.mxu0 }
 0x21a   : > { %v9668_v0 = vpop.f32.mrf.mxu1  ;;  %v9670_v30 = vpop.f32.mrf.mxu0 }
 0x21c   : > { %v9672_v53 = vpop.f32.mrf.mxu1  ;;  %v9674_v27 = vpop.f32.mrf.mxu0 }
 0x21e   : > { %v9676_v32 = vpop.f32.mrf.mxu1  ;;  %v9678_v9 = vpop.f32.mrf.mxu0 }
 0x220   : > { %v9680_v34 = vpop.f32.mrf.mxu1  ;;  %v9682_v31 = vpop.f32.mrf.mxu0 }
 0x221   : > { %10286 = vst [vmem:[#allocation25_spill] sm:$0xff] %v9682_v31  ;;  %v4120_v31 = vadd.f32 %v4005_v44, %v9562_v37  ;;  %v4126_v37 = vadd.f32 %v9668_v0, %v9571_v11  ;;  %v4125_v11 = vadd.f32 %v9680_v34, %v9580_v12 }
 0x222   : > { %v9684_v40 = vpop.f32.mrf.mxu1  ;;  %v9686_v18 = vpop.f32.mrf.mxu0 }
 0x223   : > { %10287 = vst [vmem:[#allocation26_spill] sm:$0xff] %v9686_v18 }
 0x224   : > { %v9688_v14 = vpop.f32.mrf.mxu1  ;;  %v9690_v50 = vpop.f32.mrf.mxu0 }
 0x225   : > { %10288 = vst [vmem:[#allocation27_spill] sm:$0xff] %v9690_v50 }
 0x226   : > { %v9692_v4 = vpop.f32.mrf.mxu1  ;;  %v9694_v15 = vpop.f32.mrf.mxu0 }
 0x227   : > { %10289 = vst [vmem:[#allocation28_spill] sm:$0xff] %v9694_v15 }
 0x228   : > { %v9696_v47 = vpop.f32.mrf.mxu1  ;;  %v9698_v60 = vpop.f32.mrf.mxu0  ;;  %v10316_v44 = vld [vmem:[#allocation25_spill] sm:$0xff] }
 0x229   : > { %10290 = vst [vmem:[#allocation29_spill] sm:$0xff] %v9698_v60 }
 0x22a   : > { %v9700_v24 = vpop.f32.mrf.mxu1  ;;  %v9702_v39 = vpop.f32.mrf.mxu0 }
 0x22b   : > { %10291 = vst [vmem:[#allocation30_spill] sm:$0xff] %v9702_v39 }
 0x22c   : > { %v9704_v7 = vpop.f32.mrf.mxu1  ;;  %v9706_v26 = vpop.f32.mrf.mxu0 }
 0x22d   : > { %10292 = vst [vmem:[#allocation18_spill] sm:$0xff] %v9706_v26 }
 0x22e   : > { %v9708_v3 = vpop.f32.mrf.mxu1  ;;  %v9710_v61 = vpop.f32.mrf.mxu0 }
 0x22f   : > { %10293 = vst [vmem:[#allocation12_spill] sm:$0xff] %v9710_v61 }
 0x230   : > { %v9712_v19 = vpop.f32.mrf.mxu1  ;;  %v9714_v55 = vpop.f32.mrf.mxu0 }
 0x231   : > { %10294 = vst [vmem:[#allocation14_spill] sm:$0xff] %v9712_v19  ;;  %10295 = vst [vmem:[#allocation6_spill] sm:$0xff] %v9714_v55 }
 0x232   : > { %v9716_v1 = vpop.f32.mrf.mxu1  ;;  %v9718_v49 = vpop.f32.mrf.mxu0 }
 0x233   : > { %10296 = vst [vmem:[#allocation7_spill] sm:$0xff] %v9716_v1  ;;  %10297 = vst [vmem:[#allocation16_spill] sm:$0xff] %v9718_v49 }
 0x234   : > { %v9720_v60 = vpop.f32.mrf.mxu1  ;;  %v9722_v15 = vpop.f32.mrf.mxu0 }
 0x235   : > { %10298 = vst [vmem:[#allocation31_spill] sm:$0xff] %v9720_v60  ;;  %10299 = vst [vmem:[#allocation32_spill] sm:$0xff] %v9722_v15 }
 0x236   : > { %v9724_v39 = vpop.f32.mrf.mxu1  ;;  %v9726_v50 = vpop.f32.mrf.mxu0 }
 0x237   : > { %10300 = vst [vmem:[#allocation33_spill] sm:$0xff] %v9724_v39  ;;  %10301 = vst [vmem:[#allocation34_spill] sm:$0xff] %v9726_v50 }
 0x238   : > { %v9728_v26 = vpop.f32.mrf.mxu1  ;;  %v9730_v18 = vpop.f32.mrf.mxu0 }
 0x239   : > { %10302 = vst [vmem:[#allocation35_spill] sm:$0xff] %v9728_v26  ;;  %10303 = vst [vmem:[#allocation36_spill] sm:$0xff] %v9730_v18 }
 0x23a   : > { %v9732_v61 = vpop.f32.mrf.mxu1  ;;  %v9734_v19 = vpop.f32.mrf.mxu0 }
 0x23b   : > { %10304 = vst [vmem:[#allocation37_spill] sm:$0xff] %v9732_v61  ;;  %10305 = vst [vmem:[#allocation38_spill] sm:$0xff] %v9734_v19  ;;  %v4118_v19 = vadd.f32 %v6783_v51, %v9547_v5 }
 0x23c   : > { %v9736_v55 = vpop.f32.mrf.mxu1  ;;  %v9738_v1 = vpop.f32.mrf.mxu0 }
 0x23d   : > { %10306 = vst [vmem:[#allocation39_spill] sm:$0xff] %v9736_v55  ;;  %10307 = vst [vmem:[#allocation40_spill] sm:$0xff] %v9738_v1 }
 0x23e   : > { %v9740_v49 = vpop.f32.mrf.mxu1  ;;  %v9742_v60 = vpop.f32.mrf.mxu0 }
 0x23f   : > { %10308 = vst [vmem:[#allocation41_spill] sm:$0xff] %v9740_v49  ;;  %10309 = vst [vmem:[#allocation42_spill] sm:$0xff] %v9742_v60  ;;  %v4116_v49 = vadd.f32 %v3989_v57, %v9550_v43  ;;  %v4119_v60 = vadd.f32 %v6784_v59, %v9553_v45  ;;  %v4121_v59 = vadd.f32 %v9664_v42, %v9568_v41  ;;  %v10318_v42 = vld [vmem:[#allocation27_spill] sm:$0xff] }
 0x240   : > { %v9744_v15 = vpop.f32.mrf.mxu1  ;;  %v9746_v39 = vpop.f32.mrf.mxu0 }
 0x241   : > { %10310 = vst [vmem:[#allocation43_spill] sm:$0xff] %v9744_v15  ;;  %10311 = vst [vmem:[#allocation44_spill] sm:$0xff] %v9746_v39  ;;  %v4117_v15 = vadd.f32 %v3992_v28, %v9556_v2  ;;  %v4122_v39 = vadd.f32 %v6787_v52, %v9559_v56  ;;  %v4478_v43 = vadd.f32 %v9641_v22, %v4119_v60 }
 0x242   : > { %v9748_v50 = vpop.f32.mrf.mxu1  ;;  %v9750_v26 = vpop.f32.mrf.mxu0  ;;  %v4123_v56 = vadd.f32 %v9660_v6, %v9565_v8  ;;  %v4127_v8 = vadd.f32 %v9676_v32, %v9577_v58  ;;  %v4130_v60 = vadd.f32 %v9684_v40, %v9583_v54  ;;  %v4128_v22 = vadd.f32 %v9688_v14, %v9586_v46  ;;  %v10317_v6 = vld [vmem:[#allocation26_spill] sm:$0xff]  ;;  %v10320_v32 = vld [vmem:[#allocation11_spill] sm:$0xff]  ;;  %v10322_v14 = vld [vmem:[#allocation29_spill] sm:$0xff] }
 0x243   : > { %10312 = vst [vmem:[#allocation45_spill] sm:$0xff] %v9748_v50  ;;  %10313 = vst [vmem:[#allocation46_spill] sm:$0xff] %v9750_v26  ;;  %v4476_v45 = vadd.f32 %v9646_v17, %v4117_v15  ;;  %v4481_v2 = vadd.f32 %v9650_v62, %v4122_v39  ;;  %v4124_v39 = vadd.f32 %v9672_v53, %v9574_v16 }
 0x244   : > { %v9752_v18 = vpop.f32.mrf.mxu1  ;;  %v6885_v61 = vpop.f32.mrf.mxu0  ;;  %v4131_v16 = vadd.f32 %v9692_v4, %v9589_v20  ;;  %v4129_v58 = vadd.f32 %v9696_v47, %v9592_v35  ;;  %v4482_v12 = vadd.f32 %v9654_v25, %v4123_v56  ;;  %v4480_v54 = vadd.f32 %v9656_v63, %v4121_v59  ;;  %v10324_v56 = vld [vmem:[#allocation7_spill] sm:$0xff] }
 0x245   : > { %10314 = vst [vmem:[#allocation47_spill] sm:$0xff] %v9752_v18  ;;  %v4477_v18 = vadd.f32 %v9631_v13, %v4118_v19  ;;  %v4134_v46 = vadd.f32 %v9700_v24, %v9595_v48  ;;  %v4132_v62 = vadd.f32 %v9704_v7, %v9598_v29  ;;  %v4485_v28 = vadd.f32 %v9658_v10, %v4126_v37 }
 0x246   : > { %v9755_v55 = vpop.f32.mrf.mxu1  ;;  %v5544_v1 = vpop.f32.mrf.mxu0  ;;  %v9807_v35 = vadd.f32 %v9662_v38, %v4124_v39  ;;  %v9815_v25 = vadd.f32 %v9670_v30, %v4125_v11  ;;  %v9818_v48 = vadd.f32 %v9674_v27, %v4130_v60  ;;  %v4135_v29 = vadd.f32 %v9708_v3, %v9601_v33  ;;  %v10319_v33 = vld [vmem:[#allocation28_spill] sm:$0xff] }
 0x247   : > { %10315 = vst [vmem:[#allocation48_spill] sm:$0xff] %v9755_v55  ;;  %v4475_v55 = vadd.f32 %v9636_v21, %v4116_v49  ;;  %v4479_v21 = vadd.f32 %v9652_v36, %v4120_v31  ;;  %v9823_v63 = vadd.f32 %v9678_v9, %v4128_v22  ;;  %v9826_v10 = vadd.f32 %v10316_v44, %v4131_v16  ;;  %v10321_v9 = vld [vmem:[#allocation14_spill] sm:$0xff] }
 0x248   : > { %v9761_v50 = vpop.f32.mrf.mxu1  ;;  %v6886_v26 = vpop.f32.mrf.mxu0  ;;  %v9837_v3 = vadd.f32 %v10319_v33, %v4132_v62  ;;  %v4133_v34 = vadd.f32 %v10321_v9, %v10320_v32  ;;  %v9842_v4 = vadd.f32 %v10322_v14, %v4135_v29  ;;  %v10325_v22 = vld [vmem:[#allocation30_spill] sm:$0xff]  ;;  %v10327_v29 = vld [vmem:[#allocation31_spill] sm:$0xff] }
 0x24a   : > { %v6851_v5 = vpop.f32.mrf.mxu1  ;;  %v5547_v51 = vpop.f32.mrf.mxu0 }
 0x24b   : > { %v5203_v57 = vadd.f32 %v6851_v5, %v4477_v18 }
 0x24c   : > { %v5074_v49 = vpop.f32.mrf.mxu1  ;;  %v6889_v19 = vpop.f32.mrf.mxu0 }
 0x24d   : > { %v5673_v13 = vadd.f32 %v6885_v61, %v5203_v57  ;;  %v5201_v41 = vadd.f32 %v5074_v49, %v4475_v55 }
 0x24e   : > { %v6852_v17 = vpop.f32.mrf.mxu1  ;;  %v5560_v15 = vpop.f32.mrf.mxu0 }
 0x24f   : > { %5705 = vst.msk [vmem:[%s9780_s16 + $0x10] sm:$0xff] %vm1631_vm12, %v5673_v13  ;;  %v5671_v55 = vadd.f32 %v5544_v1, %v5201_v41  ;;  %v5204_v61 = vadd.f32 %v6852_v17, %v4478_v43  ;;  %v9810_v1 = vadd.f32 %v9666_v23, %v4127_v8  ;;  %v9834_v23 = vadd.f32 %v10318_v42, %v4134_v46 }
 0x250   : > { %v5077_v36 = vpop.f32.mrf.mxu1  ;;  %v6890_v20 = vpop.f32.mrf.mxu0  ;;  %v5806_v31 = vmul.f32 %v5673_v13, %v5673_v13  ;;  %v5738_v37 = vsel %vm1631_vm12, %v5673_v13, 0.0  ;;  %v9856_v17 = vadd.f32 %v10325_v22, %v4133_v34 }
 0x251   : > { %5703 = vst.msk [vmem:[%s9780_s16] sm:$0xff] %vm1631_vm12, %v5671_v55  ;;  %v5674_v47 = vadd.f32 %v6886_v26, %v5204_v61  ;;  %v5202_v7 = vadd.f32 %v5077_v36, %v4476_v45  ;;  %v9829_v26 = vadd.f32 %v10317_v6, %v4129_v58  ;;  %v5804_v0 = vmul.f32 %v5671_v55, %v5671_v55 }
 0x252   : > { %v6855_v24 = vpop.f32.mrf.mxu1  ;;  %v5563_v52 = vpop.f32.mrf.mxu0  ;;  %v5735_v5 = vsel %vm1631_vm12, %v5671_v55, 0.0  ;;  %v5839_v16 = vsel %vm1631_vm12, %v5806_v31, 0.0 }
 0x253   : > { %5706 = vst.msk [vmem:[%s9780_s16 + $0x18] sm:$0xff] %vm1631_vm12, %v5674_v47  ;;  %v5207_v38 = vadd.f32 %v6855_v24, %v4481_v2  ;;  %v5672_v30 = vadd.f32 %v5547_v51, %v5202_v7  ;;  %v10323_v2 = vld [vmem:[#allocation13_spill] sm:$0xff]  ;;  %v5836_v39 = vsel %vm1631_vm12, %v5804_v0, 0.0  ;;  %v5807_v8 = vmul.f32 %v5674_v47, %v5674_v47 }
 0x254   : > { %v5090_v53 = vpop.f32.mrf.mxu1  ;;  %v6893_v27 = vpop.f32.mrf.mxu0  ;;  %v4138_v59 = vadd.f32 %v10324_v56, %v10323_v2 }
 0x255   : > { %v5677_v40 = vadd.f32 %v6889_v19, %v5207_v38  ;;  %v5205_v18 = vadd.f32 %v5090_v53, %v4479_v21  ;;  %5704 = vst.msk [vmem:[%s9780_s16 + $0x8] sm:$0xff] %vm1631_vm12, %v5672_v30  ;;  %v5736_v43 = vsel %vm1631_vm12, %v5672_v30, 0.0  ;;  %v5805_v45 = vmul.f32 %v5672_v30, %v5672_v30  ;;  %v10328_v38 = vld [vmem:[#allocation18_spill] sm:$0xff] }
 0x256   : > { %v6856_v51 = vpop.f32.mrf.mxu1  ;;  %v5576_v57 = vpop.f32.mrf.mxu0  ;;  %v5737_v49 = vadd.f32 %v5736_v43, %v5735_v5  ;;  %v9865_v42 = vadd.f32 %v10328_v38, %v4138_v59  ;;  %v5841_v33 = vsel %vm1631_vm12, %v5807_v8, 0.0  ;;  %v10329_v43 = vld [vmem:[#allocation12_spill] sm:$0xff] }
 0x257   : > { %5709 = vst.msk [vmem:[%s9780_s16 + $0x30] sm:$0xff] %vm1631_vm12, %v5677_v40  ;;  %v5675_v19 = vadd.f32 %v5560_v15, %v5205_v18  ;;  %v5837_v41 = vsel %vm1631_vm12, %v5805_v45, 0.0  ;;  %v5208_v21 = vadd.f32 %v6856_v51, %v4482_v12  ;;  %v5740_v15 = vsel %vm1631_vm12, %v5674_v47, 0.0  ;;  %v10326_v12 = vld [vmem:[#allocation19_spill] sm:$0xff] }
 0x258   : > { %v5093_v11 = vpop.f32.mrf.mxu1  ;;  %v6894_v60 = vpop.f32.mrf.mxu0  ;;  %v5739_v58 = vadd.f32 %v5738_v37, %v5737_v49  ;;  %v5838_v13 = vadd.f32 %v5837_v41, %v5836_v39  ;;  %v4136_v7 = vadd.f32 %v10327_v29, %v10326_v12  ;;  %v5810_v34 = vmul.f32 %v5677_v40, %v5677_v40  ;;  %v10331_v39 = vld [vmem:[#allocation33_spill] sm:$0xff]  ;;  %v10333_v12 = vld [vmem:[#allocation35_spill] sm:$0xff] }
 0x259   : > { %5707 = vst.msk [vmem:[%s9780_s16 + $0x20] sm:$0xff] %vm1631_vm12, %v5675_v19  ;;  %v5808_v55 = vmul.f32 %v5675_v19, %v5675_v19  ;;  %v5678_v61 = vadd.f32 %v6890_v20, %v5208_v21  ;;  %v5206_v46 = vadd.f32 %v5093_v11, %v4480_v54  ;;  %v5742_v0 = vsel %vm1631_vm12, %v5675_v19, 0.0  ;;  %v10330_v19 = vld [vmem:[#allocation9_spill] sm:$0xff]  ;;  %v10334_v29 = vld [vmem:[#allocation23_spill] sm:$0xff] }
 0x25a   : > { %v6859_v62 = vpop.f32.mrf.mxu1  ;;  %v5579_v36 = vpop.f32.mrf.mxu0  ;;  %v5840_v24 = vadd.f32 %v5839_v16, %v5838_v13  ;;  %v5741_v44 = vadd.f32 %v5740_v15, %v5739_v58  ;;  %v5746_v45 = vsel %vm1631_vm12, %v5677_v40, 0.0  ;;  %v4139_v8 = vadd.f32 %v10331_v39, %v10330_v19 }
 0x25b   : > { %v5211_v6 = vadd.f32 %v6859_v62, %v4485_v28  ;;  %5710 = vst.msk [vmem:[%s9780_s16 + $0x38] sm:$0xff] %vm1631_vm12, %v5678_v61  ;;  %v5676_v20 = vadd.f32 %v5563_v52, %v5206_v46  ;;  %v5843_v28 = vsel %vm1631_vm12, %v5808_v55, 0.0  ;;  %v9877_v52 = vadd.f32 %v10329_v43, %v4136_v7  ;;  %v10332_v62 = vld [vmem:[#allocation21_spill] sm:$0xff] }
 0x25c   : > { %v5106_v54 = vpop.f32.mrf.mxu1  ;;  %v6897_v47 = vpop.f32.mrf.mxu0  ;;  %v5743_v30 = vadd.f32 %v5742_v0, %v5741_v44  ;;  %v5842_v53 = vadd.f32 %v5841_v33, %v5840_v24  ;;  %v5847_v11 = vsel %vm1631_vm12, %v5810_v34, 0.0  ;;  %v5748_v22 = vsel %vm1631_vm12, %v5678_v61, 0.0  ;;  %v10335_v7 = vld [vmem:[#allocation37_spill] sm:$0xff] }
 0x25d   : > { %v5681_v32 = vadd.f32 %v6893_v27, %v5211_v6  ;;  %v5209_v9 = vadd.f32 %v5106_v54, %v9807_v35  ;;  %5708 = vst.msk [vmem:[%s9780_s16 + $0x28] sm:$0xff] %vm1631_vm12, %v5676_v20  ;;  %v5744_v31 = vsel %vm1631_vm12, %v5676_v20, 0.0  ;;  %v5809_v18 = vmul.f32 %v5676_v20, %v5676_v20 }
 0x25e   : > { %v6860_v14 = vpop.f32.mrf.mxu1  ;;  %v5592_v5 = vpop.f32.mrf.mxu0  ;;  %v5844_v51 = vadd.f32 %v5843_v28, %v5842_v53  ;;  %v5745_v27 = vadd.f32 %v5744_v31, %v5743_v30  ;;  %v5811_v35 = vmul.f32 %v5678_v61, %v5678_v61  ;;  %v4142_v24 = vadd.f32 %v10335_v7, %v10334_v29 }
 0x25f   : > { %5713 = vst.msk [vmem:[%s9780_s16 + $0x50] sm:$0xff] %vm1631_vm12, %v5681_v32  ;;  %v5845_v2 = vsel %vm1631_vm12, %v5809_v18, 0.0  ;;  %v5679_v56 = vadd.f32 %v5576_v57, %v5209_v9  ;;  %v5212_v59 = vadd.f32 %v6860_v14, %v9810_v1  ;;  %v5814_v0 = vmul.f32 %v5681_v32, %v5681_v32  ;;  %v10336_v14 = vld [vmem:[#allocation6_spill] sm:$0xff] }
 0x260   : > { %v5109_v37 = vpop.f32.mrf.mxu1  ;;  %v6898_v49 = vpop.f32.mrf.mxu0  ;;  %v5747_v41 = vadd.f32 %v5746_v45, %v5745_v27  ;;  %v5846_v21 = vadd.f32 %v5845_v2, %v5844_v51  ;;  %v5849_v61 = vsel %vm1631_vm12, %v5811_v35, 0.0  ;;  %v9908_v43 = vadd.f32 %v10336_v14, %v4139_v8 }
 0x261   : > { %v5210_v40 = vadd.f32 %v5109_v37, %v9815_v25  ;;  %5711 = vst.msk [vmem:[%s9780_s16 + $0x40] sm:$0xff] %vm1631_vm12, %v5679_v56  ;;  %v5812_v16 = vmul.f32 %v5679_v56, %v5679_v56  ;;  %v5682_v57 = vadd.f32 %v6894_v60, %v5212_v59  ;;  %v4137_v25 = vadd.f32 %v10333_v12, %v10332_v62  ;;  %v10337_v37 = vld [vmem:[#allocation16_spill] sm:$0xff] }
 0x262   : > { %v6863_v1 = vpop.f32.mrf.mxu1  ;;  %v5595_v58 = vpop.f32.mrf.mxu0  ;;  %v5848_v13 = vadd.f32 %v5847_v11, %v5846_v21  ;;  %v5749_v15 = vadd.f32 %v5748_v22, %v5747_v41  ;;  %v5750_v44 = vsel %vm1631_vm12, %v5679_v56, 0.0  ;;  %v5754_v45 = vsel %vm1631_vm12, %v5681_v32, 0.0  ;;  %v10338_v41 = vld [vmem:[#allocation32_spill] sm:$0xff]  ;;  %v10340_v11 = vld [vmem:[#allocation39_spill] sm:$0xff] }
 0x263   : > { %v5680_v55 = vadd.f32 %v5579_v36, %v5210_v40  ;;  %v5215_v46 = vadd.f32 %v6863_v1, %v9818_v48  ;;  %5714 = vst.msk [vmem:[%s9780_s16 + $0x58] sm:$0xff] %vm1631_vm12, %v5682_v57  ;;  %v5851_v20 = vsel %vm1631_vm12, %v5812_v16, 0.0  ;;  %v5815_v51 = vmul.f32 %v5682_v57, %v5682_v57  ;;  %v10339_v40 = vld [vmem:[#allocation8_spill] sm:$0xff] }
 0x264   : > { %v5122_v60 = vpop.f32.mrf.mxu1  ;;  %v6901_v6 = vpop.f32.mrf.mxu0  ;;  %v5751_v38 = vadd.f32 %v5750_v44, %v5749_v15  ;;  %v5850_v33 = vadd.f32 %v5849_v61, %v5848_v13  ;;  %v9915_v19 = vadd.f32 %v10337_v37, %v4137_v25  ;;  %v5756_v39 = vsel %vm1631_vm12, %v5682_v57, 0.0 }
 0x265   : > { %5712 = vst.msk [vmem:[%s9780_s16 + $0x48] sm:$0xff] %vm1631_vm12, %v5680_v55  ;;  %v5752_v48 = vsel %vm1631_vm12, %v5680_v55, 0.0  ;;  %v5813_v36 = vmul.f32 %v5680_v55, %v5680_v55  ;;  %v5685_v54 = vadd.f32 %v6897_v47, %v5215_v46  ;;  %v5213_v30 = vadd.f32 %v5122_v60, %v9823_v63 }
 0x266   : > { %v6864_v53 = vpop.f32.mrf.mxu1  ;;  %v5608_v9 = vpop.f32.mrf.mxu0  ;;  %v5852_v34 = vadd.f32 %v5851_v20, %v5850_v33  ;;  %v5753_v28 = vadd.f32 %v5752_v48, %v5751_v38  ;;  %v9922_v21 = vadd.f32 %v10338_v41, %v4142_v24  ;;  %v5857_v16 = vsel %vm1631_vm12, %v5815_v51, 0.0  ;;  %v10341_v48 = vld [vmem:[#allocation10_spill] sm:$0xff] }
 0x267   : > { %v5853_v31 = vsel %vm1631_vm12, %v5813_v36, 0.0  ;;  %v5216_v18 = vadd.f32 %v6864_v53, %v9826_v10  ;;  %5717 = vst.msk [vmem:[%s9780_s16 + $0x70] sm:$0xff] %vm1631_vm12, %v5685_v54  ;;  %v5683_v47 = vadd.f32 %v5592_v5, %v5213_v30  ;;  %v5855_v10 = vsel %vm1631_vm12, %v5814_v0, 0.0  ;;  %v10342_v36 = vld [vmem:[#allocation41_spill] sm:$0xff] }
 0x268   : > { %v5125_v27 = vpop.f32.mrf.mxu1  ;;  %v6902_v63 = vpop.f32.mrf.mxu0  ;;  %v5755_v35 = vadd.f32 %v5754_v45, %v5753_v28  ;;  %v5854_v2 = vadd.f32 %v5853_v31, %v5852_v34  ;;  %v5818_v46 = vmul.f32 %v5685_v54, %v5685_v54  ;;  %v5762_v0 = vsel %vm1631_vm12, %v5685_v54, 0.0  ;;  %v10343_v34 = vld [vmem:[#allocation34_spill] sm:$0xff] }
 0x269   : > { %v5686_v56 = vadd.f32 %v6898_v49, %v5216_v18  ;;  %v5214_v59 = vadd.f32 %v5125_v27, %v9829_v26  ;;  %5715 = vst.msk [vmem:[%s9780_s16 + $0x60] sm:$0xff] %vm1631_vm12, %v5683_v47  ;;  %v5816_v32 = vmul.f32 %v5683_v47, %v5683_v47  ;;  %v4140_v49 = vadd.f32 %v10340_v11, %v10339_v40  ;;  %v10344_v27 = vld [vmem:[#allocation15_spill] sm:$0xff] }
 0x26a   : > { %v6867_v8 = vpop.f32.mrf.mxu1  ;;  %v5611_v5 = vpop.f32.mrf.mxu0  ;;  %v5856_v26 = vadd.f32 %v5855_v10, %v5854_v2  ;;  %v5757_v22 = vadd.f32 %v5756_v39, %v5755_v35  ;;  %v5758_v57 = vsel %vm1631_vm12, %v5683_v47, 0.0  ;;  %v5863_v31 = vsel %vm1631_vm12, %v5818_v46, 0.0  ;;  %v10345_v35 = vld [vmem:[#allocation43_spill] sm:$0xff]  ;;  %v10346_v39 = vld [vmem:[#allocation36_spill] sm:$0xff] }
 0x26b   : > { %5718 = vst.msk [vmem:[%s9780_s16 + $0x78] sm:$0xff] %vm1631_vm12, %v5686_v56  ;;  %v5684_v1 = vadd.f32 %v5595_v58, %v5214_v59  ;;  %v5219_v13 = vadd.f32 %v6867_v8, %v9834_v23  ;;  %v5859_v29 = vsel %vm1631_vm12, %v5816_v32, 0.0  ;;  %v5819_v20 = vmul.f32 %v5686_v56, %v5686_v56 }
 0x26c   : > { %v5138_v15 = vpop.f32.mrf.mxu1  ;;  %v6905_v55 = vpop.f32.mrf.mxu0  ;;  %v5759_v62 = vadd.f32 %v5758_v57, %v5757_v22  ;;  %v5858_v12 = vadd.f32 %v5857_v16, %v5856_v26  ;;  %v9944_v28 = vadd.f32 %v10343_v34, %v4140_v49  ;;  %v5764_v18 = vsel %vm1631_vm12, %v5686_v56, 0.0 }
 0x26d   : > { %v5217_v25 = vadd.f32 %v5138_v15, %v9837_v3  ;;  %5716 = vst.msk [vmem:[%s9780_s16 + $0x68] sm:$0xff] %vm1631_vm12, %v5684_v1  ;;  %v5760_v7 = vsel %vm1631_vm12, %v5684_v1, 0.0  ;;  %v5817_v24 = vmul.f32 %v5684_v1, %v5684_v1  ;;  %v5689_v61 = vadd.f32 %v6901_v6, %v5219_v13  ;;  %v10347_v15 = vld [vmem:[#allocation38_spill] sm:$0xff] }
 0x26e   : > { %v6868_v44 = vpop.f32.mrf.mxu1  ;;  %v5624_v58 = vpop.f32.mrf.mxu0  ;;  %v5860_v23 = vadd.f32 %v5859_v29, %v5858_v12  ;;  %v5761_v60 = vadd.f32 %v5760_v7, %v5759_v62  ;;  %v4143_v3 = vadd.f32 %v10342_v36, %v10341_v48  ;;  %v4141_v2 = vadd.f32 %v10345_v35, %v10344_v27 }
 0x26f   : > { %v5687_v38 = vadd.f32 %v5608_v9, %v5217_v25  ;;  %v5220_v33 = vadd.f32 %v6868_v44, %v9842_v4  ;;  %v5861_v30 = vsel %vm1631_vm12, %v5817_v24, 0.0  ;;  %5721 = vst.msk [vmem:[%s9780_s16 + $0x90] sm:$0xff] %vm1631_vm12, %v5689_v61  ;;  %v5865_v8 = vsel %vm1631_vm12, %v5819_v20, 0.0  ;;  %v10348_v44 = vld [vmem:[#allocation17_spill] sm:$0xff] }
 0x270   : > { %v5141_v53 = vpop.f32.mrf.mxu1  ;;  %v6906_v6 = vpop.f32.mrf.mxu0  ;;  %v5763_v9 = vadd.f32 %v5762_v0, %v5761_v60  ;;  %v5862_v4 = vadd.f32 %v5861_v30, %v5860_v23  ;;  %v9955_v32 = vadd.f32 %v10346_v39, %v4143_v3  ;;  %v5822_v22 = vmul.f32 %v5689_v61, %v5689_v61  ;;  %v10349_v23 = vld [vmem:[#allocation45_spill] sm:$0xff] }
 0x271   : > { %5719 = vst.msk [vmem:[%s9780_s16 + $0x80] sm:$0xff] %vm1631_vm12, %v5687_v38  ;;  %v5820_v54 = vmul.f32 %v5687_v38, %v5687_v38  ;;  %v5690_v14 = vadd.f32 %v6902_v63, %v5220_v33  ;;  %v5218_v45 = vadd.f32 %v5141_v53, %v9856_v17  ;;  %v5766_v56 = vsel %vm1631_vm12, %v5687_v38, 0.0 }
 0x272   : > { %v6871_v51 = vpop.f32.mrf.mxu1  ;;  %v5627_v47 = vpop.f32.mrf.mxu0  ;;  %v5864_v59 = vadd.f32 %v5863_v31, %v5862_v4  ;;  %v5765_v37 = vadd.f32 %v5764_v18, %v5763_v9  ;;  %v5770_v46 = vsel %vm1631_vm12, %v5689_v61, 0.0  ;;  %v4146_v60 = vadd.f32 %v10349_v23, %v10348_v44  ;;  %v10350_v31 = vld [vmem:[#allocation20_spill] sm:$0xff]  ;;  %v10351_v9 = vld [vmem:[#allocation47_spill] sm:$0xff]  ;;  %v10352_v4 = vld [vmem:[#allocation22_spill] sm:$0xff] }
 0x273   : > { %v5223_v10 = vadd.f32 %v6871_v51, %v9865_v42  ;;  %5722 = vst.msk [vmem:[%s9780_s16 + $0x98] sm:$0xff] %vm1631_vm12, %v5690_v14  ;;  %v5688_v17 = vadd.f32 %v5611_v5, %v5218_v45  ;;  %v5867_v42 = vsel %vm1631_vm12, %v5820_v54, 0.0  ;;  %v4500_v5 = vadd.f32 %v10347_v15, %v4141_v2  ;;  %v10353_v18 = vld [vmem:[#allocation48_spill] sm:$0xff]  ;;  %v10355_v15 = vld [vmem:[#allocation42_spill] sm:$0xff] }
 0x274   : > { %v5154_v63 = vpop.f32.mrf.mxu1  ;;  %v6909_v41 = vpop.f32.mrf.mxu0  ;;  %v5767_v40 = vadd.f32 %v5766_v56, %v5765_v37  ;;  %v5866_v11 = vadd.f32 %v5865_v8, %v5864_v59  ;;  %v5871_v48 = vsel %vm1631_vm12, %v5822_v22, 0.0  ;;  %v5772_v36 = vsel %vm1631_vm12, %v5690_v14, 0.0 }
 0x275   : > { %v5693_v49 = vadd.f32 %v6905_v55, %v5223_v10  ;;  %v5221_v26 = vadd.f32 %v5154_v63, %v9877_v52  ;;  %5720 = vst.msk [vmem:[%s9780_s16 + $0x88] sm:$0xff] %vm1631_vm12, %v5688_v17  ;;  %v5768_v16 = vsel %vm1631_vm12, %v5688_v17, 0.0  ;;  %v5821_v57 = vmul.f32 %v5688_v17, %v5688_v17 }
 0x276   : > { %v6872_v1 = vpop.f32.mrf.mxu1  ;;  %v5640_v13 = vpop.f32.mrf.mxu0  ;;  %v5868_v62 = vadd.f32 %v5867_v42, %v5866_v11  ;;  %v5769_v12 = vadd.f32 %v5768_v16, %v5767_v40  ;;  %v5823_v52 = vmul.f32 %v5690_v14, %v5690_v14  ;;  %v4147_v54 = vadd.f32 %v10353_v18, %v10352_v4  ;;  %v10354_v40 = vld [vmem:[#allocation40_spill] sm:$0xff] }
 0x277   : > { %5725 = vst.msk [vmem:[%s9780_s16 + $0xb0] sm:$0xff] %vm1631_vm12, %v5693_v49  ;;  %v5869_v55 = vsel %vm1631_vm12, %v5821_v57, 0.0  ;;  %v5691_v25 = vadd.f32 %v5624_v58, %v5221_v26  ;;  %v5224_v29 = vadd.f32 %v6872_v1, %v9908_v43  ;;  %v5826_v35 = vmul.f32 %v5693_v49, %v5693_v49 }
 0x278   : > { %v5157_v7 = vpop.f32.mrf.mxu1  ;;  %v6910_v24 = vpop.f32.mrf.mxu0  ;;  %v5771_v38 = vadd.f32 %v5770_v46, %v5769_v12  ;;  %v5870_v33 = vadd.f32 %v5869_v55, %v5868_v62  ;;  %v5873_v14 = vsel %vm1631_vm12, %v5823_v52, 0.0  ;;  %v4505_v11 = vadd.f32 %v10354_v40, %v4146_v60  ;;  %v10356_v52 = vld [vmem:[#allocation44_spill] sm:$0xff] }
 0x279   : > { %v5222_v61 = vadd.f32 %v5157_v7, %v9915_v19  ;;  %5723 = vst.msk [vmem:[%s9780_s16 + $0xa0] sm:$0xff] %vm1631_vm12, %v5691_v25  ;;  %v5824_v3 = vmul.f32 %v5691_v25, %v5691_v25  ;;  %v5694_v58 = vadd.f32 %v6906_v6, %v5224_v29  ;;  %v4144_v19 = vadd.f32 %v10351_v9, %v10350_v31  ;;  %v10358_v9 = vld [vmem:[#allocation46_spill] sm:$0xff] }
 0x27a   : > { %v6875_v43 = vpop.f32.mrf.mxu1  ;;  %v5872_v0 = vadd.f32 %v5871_v48, %v5870_v33  ;;  %v5773_v20 = vadd.f32 %v5772_v36, %v5771_v38  ;;  %v5643_v34 = vpop.f32.mrf.mxu0  ;;  %v5774_v45 = vsel %vm1631_vm12, %v5691_v25, 0.0  ;;  %v5778_v26 = vsel %vm1631_vm12, %v5693_v49, 0.0  ;;  %v10357_v25 = vld [vmem:[#allocation24_spill] sm:$0xff] }
 0x27b   : > { %v5692_v30 = vadd.f32 %v5627_v47, %v5222_v61  ;;  %v5227_v53 = vadd.f32 %v6875_v43, %v9922_v21  ;;  %5726 = vst.msk [vmem:[%s9780_s16 + $0xb8] sm:$0xff] %vm1631_vm12, %v5694_v58  ;;  %v5875_v2 = vsel %vm1631_vm12, %v5824_v3, 0.0  ;;  %v5827_v22 = vmul.f32 %v5694_v58, %v5694_v58 }
 0x27c   : > { %v5170_v6 = vpop.f32.mrf.mxu1  ;;  %v5775_v51 = vadd.f32 %v5774_v45, %v5773_v20  ;;  %v5874_v27 = vadd.f32 %v5873_v14, %v5872_v0  ;;  %v6913_v63 = vpop.f32.mrf.mxu0  ;;  %v4503_v46 = vadd.f32 %v10355_v15, %v4144_v19  ;;  %v5879_v62 = vsel %vm1631_vm12, %v5826_v35, 0.0 }
 0x27d   : > { %5724 = vst.msk [vmem:[%s9780_s16 + $0xa8] sm:$0xff] %vm1631_vm12, %v5692_v30  ;;  %v5776_v21 = vsel %vm1631_vm12, %v5692_v30, 0.0  ;;  %v5825_v47 = vmul.f32 %v5692_v30, %v5692_v30  ;;  %v5697_v59 = vadd.f32 %v6909_v41, %v5227_v53  ;;  %v5225_v37 = vadd.f32 %v5170_v6, %v9944_v28 }
 0x27e   : > { %v6876_v10 = vpop.f32.mrf.mxu1  ;;  %v5876_v39 = vadd.f32 %v5875_v2, %v5874_v27  ;;  %v5777_v8 = vadd.f32 %v5776_v21, %v5775_v51  ;;  %v4506_v55 = vadd.f32 %v10356_v52, %v4147_v54 }
 0x27f   : > { %v5877_v56 = vsel %vm1631_vm12, %v5825_v47, 0.0  ;;  %v5228_v17 = vadd.f32 %v6876_v10, %v9955_v32  ;;  %5729 = vst.msk [vmem:[%s9780_s16 + $0xd0] sm:$0xff] %vm1631_vm12, %v5697_v59  ;;  %v5695_v42 = vadd.f32 %v5640_v13, %v5225_v37  ;;  %v5780_v32 = vsel %vm1631_vm12, %v5694_v58, 0.0 }
 0x280   : > { %v5173_v41 = vpop.f32.mrf.mxu1  ;;  %v5779_v28 = vadd.f32 %v5778_v26, %v5777_v8  ;;  %v5878_v16 = vadd.f32 %v5877_v56, %v5876_v39  ;;  %v4145_v13 = vadd.f32 %v9761_v50, %v10357_v25  ;;  %v5830_v33 = vmul.f32 %v5697_v59, %v5697_v59 }
 0x281   : > { %v5698_v57 = vadd.f32 %v6910_v24, %v5228_v17  ;;  %v5226_v1 = vadd.f32 %v5173_v41, %v4500_v5  ;;  %5727 = vst.msk [vmem:[%s9780_s16 + $0xc0] sm:$0xff] %vm1631_vm12, %v5695_v42  ;;  %v5828_v12 = vmul.f32 %v5695_v42, %v5695_v42  ;;  %v5656_v5 = vpop.f32.mrf.mxu0  ;;  %v5881_v24 = vsel %vm1631_vm12, %v5827_v22, 0.0 }
 0x282   : > { %v6879_v49 = vpop.f32.mrf.mxu1  ;;  %v5880_v29 = vadd.f32 %v5879_v62, %v5878_v16  ;;  %v5781_v7 = vadd.f32 %v5780_v32, %v5779_v28  ;;  %v5782_v44 = vsel %vm1631_vm12, %v5695_v42, 0.0  ;;  %v4504_v19 = vadd.f32 %v10358_v9, %v4145_v13 }
 0x283   : > { %5730 = vst.msk [vmem:[%s9780_s16 + $0xd8] sm:$0xff] %vm1631_vm12, %v5698_v57  ;;  %v5696_v23 = vadd.f32 %v5643_v34, %v5226_v1  ;;  %v5231_v60 = vadd.f32 %v6879_v49, %v4505_v11  ;;  %v5883_v3 = vsel %vm1631_vm12, %v5828_v12, 0.0  ;;  %v6914_v31 = vpop.f32.mrf.mxu0  ;;  %v5786_v4 = vsel %vm1631_vm12, %v5697_v59, 0.0 }
 0x284   : > { %v5186_v38 = vpop.f32.mrf.mxu1  ;;  %v5783_v61 = vadd.f32 %v5782_v44, %v5781_v7  ;;  %v5882_v48 = vadd.f32 %v5881_v24, %v5880_v29  ;;  %v5831_v18 = vmul.f32 %v5698_v57, %v5698_v57  ;;  %v5887_v45 = vsel %vm1631_vm12, %v5830_v33, 0.0 }
 0x285   : > { %v5229_v36 = vadd.f32 %v5186_v38, %v4503_v46  ;;  %5728 = vst.msk [vmem:[%s9780_s16 + $0xc8] sm:$0xff] %vm1631_vm12, %v5696_v23  ;;  %v5784_v50 = vsel %vm1631_vm12, %v5696_v23, 0.0  ;;  %v5829_v58 = vmul.f32 %v5696_v23, %v5696_v23  ;;  %v5701_v43 = vadd.f32 %v6913_v63, %v5231_v60  ;;  %v5659_v37 = vpop.f32.mrf.mxu0 }
 0x286   : > { %v6880_v0 = vpop.f32.mrf.mxu1  ;;  %v5884_v20 = vadd.f32 %v5883_v3, %v5882_v48  ;;  %v5785_v30 = vadd.f32 %v5784_v50, %v5783_v61  ;;  %v5788_v27 = vsel %vm1631_vm12, %v5698_v57, 0.0  ;;  %v5889_v10 = vsel %vm1631_vm12, %v5831_v18, 0.0 }
 0x287   : > { %v5699_v53 = vadd.f32 %v5656_v5, %v5229_v36  ;;  %v5232_v34 = vadd.f32 %v6880_v0, %v4506_v55  ;;  %v5885_v54 = vsel %vm1631_vm12, %v5829_v58, 0.0  ;;  %5733 = vst.msk [vmem:[%s9780_s16 + $0xf0] sm:$0xff] %vm1631_vm12, %v5701_v43  ;;  %v5834_v63 = vmul.f32 %v5701_v43, %v5701_v43 }
 0x288   : > { %v5189_v14 = vpop.f32.mrf.mxu1  ;;  %v5787_v6 = vadd.f32 %v5786_v4, %v5785_v30  ;;  %v5886_v51 = vadd.f32 %v5885_v54, %v5884_v20  ;;  %v5794_v41 = vsel %vm1631_vm12, %v5701_v43, 0.0 }
 0x289   : > { %5731 = vst.msk [vmem:[%s9780_s16 + $0xe0] sm:$0xff] %vm1631_vm12, %v5699_v53  ;;  %v5832_v21 = vmul.f32 %v5699_v53, %v5699_v53  ;;  %v5702_v47 = vadd.f32 %v6914_v31, %v5232_v34  ;;  %v5230_v35 = vadd.f32 %v5189_v14, %v4504_v19  ;;  %v5790_v39 = vsel %vm1631_vm12, %v5699_v53, 0.0 }
 0x28a   : > { %v5888_v2 = vadd.f32 %v5887_v45, %v5886_v51  ;;  %v5789_v59 = vadd.f32 %v5788_v27, %v5787_v6  ;;  %v5895_v15 = vsel %vm1631_vm12, %v5834_v63, 0.0 }
 0x28b   : > { %5734 = vst.msk [vmem:[%s9780_s16 + $0xf8] sm:$0xff] %vm1631_vm12, %v5702_v47  ;;  %v5700_v8 = vadd.f32 %v5659_v37, %v5230_v35  ;;  %v5891_v40 = vsel %vm1631_vm12, %v5832_v21, 0.0  ;;  %v5835_v28 = vmul.f32 %v5702_v47, %v5702_v47  ;;  %v5796_v46 = vsel %vm1631_vm12, %v5702_v47, 0.0 }
 0x28c   : > { %v5791_v56 = vadd.f32 %v5790_v39, %v5789_v59  ;;  %v5890_v17 = vadd.f32 %v5889_v10, %v5888_v2 }
 0x28d   : > { %5732 = vst.msk [vmem:[%s9780_s16 + $0xe8] sm:$0xff] %vm1631_vm12, %v5700_v8  ;;  %v5792_v11 = vsel %vm1631_vm12, %v5700_v8, 0.0  ;;  %v5833_v26 = vmul.f32 %v5700_v8, %v5700_v8  ;;  %v5897_v12 = vsel %vm1631_vm12, %v5835_v28, 0.0 }
 0x28e   : > { %v5892_v22 = vadd.f32 %v5891_v40, %v5890_v17  ;;  %v5793_v42 = vadd.f32 %v5792_v11, %v5791_v56 }
 0x28f   : > { %v5893_v16 = vsel %vm1631_vm12, %v5833_v26, 0.0 }
 0x290   : > { %v5795_v57 = vadd.f32 %v5794_v41, %v5793_v42  ;;  %v5894_v1 = vadd.f32 %v5893_v16, %v5892_v22 }
 0x292   : > { %v5797_v62 = vadd.f32 %v5796_v46, %v5795_v57  ;;  %v5896_v32 = vadd.f32 %v5895_v15, %v5894_v1 }
 0x294   : > { %v5798_v49 = vrot.slane %v5797_v62, 4  ;;  %v5898_v52 = vadd.f32 %v5897_v12, %v5896_v32 }
 0x296   : > { %v5799_v55 = vadd.f32 %v5798_v49, %v5797_v62  ;;  %v5899_v25 = vrot.slane %v5898_v52, 4 }
 0x298   : > { %v5800_v13 = vrot.slane %v5799_v55, 2  ;;  %v5900_v29 = vadd.f32 %v5899_v25, %v5898_v52 }
 0x29a   : > { %v5801_v7 = vadd.f32 %v5800_v13, %v5799_v55  ;;  %v5901_v5 = vrot.slane %v5900_v29, 2 }
 0x29c   : > { %v5802_v24 = vrot.slane %v5801_v7, 1  ;;  %v5902_v44 = vadd.f32 %v5901_v5, %v5900_v29 }
 0x29e   : > { %v5903_v23 = vrot.slane %v5902_v44, 1  ;;  %v5803_v60 = vadd.f32 %v5802_v24, %v5801_v7 }
 0x2a0   : > { %v5904_v38 = vadd.f32 %v5903_v23, %v5902_v44 }
 0x2a2   : > { %v5906_v33 = vsel %vm5905_vm0, %v5803_v60, %v5904_v38 }
 0x2a3   : > { %5908 = vst.msk [vmem:[%s225_s21] sm:$0x3] %vm5907_vm2, %v5906_v33 }
 0x2a4   : > { %7042 = shalt.err (!%p7039_p3)
}
 0x2a5   : > { %s7043_s12 = scalar_lea.hbm %s10042_s29, 32  ;;  %s7047_s9 = scalar_lea.hbm %s10082_s5, 64 }
 0x2a6   : > { %p7044_p4 = scmp.ne.s32.totalorder %s10042_s29, %s7043_s12  ;;  %p7048_p9 = scmp.lt.s32.totalorder %s10042_s29, %s10082_s5 }
 0x2a7   : > { %p7049_p10 = scmp.lt.s32.totalorder %s7047_s9, %s7043_s12 }
 0x2a8   : > { %p7045_p7 = pnand %p7044_p4, %p7160_p5 }
 0x2a9   : > { %p7050_p11 = por %p7049_p10, %p7048_p9 }
 0x2aa   : > { %p7046_p8 = pneg %p7045_p7 }
 0x2ac   : > { %p7051_p12 = pnand %p7050_p11, %p7046_p8 }
 0x2ae   : > { %7054 = shalt.err (!%p7051_p12)
}
 0x2af   : > { %6927 = dma.vmem_to_hbm [thread:$0]  (%p7160_p5), %s5932_s23, 32, %s10042_s29, %s5915_s7  }
 0x2b0 PF: > { %p6933_p13 = scmp.ge.s32.totalorder %s7089_s1, 2  ;;  %s5951_s30 = sand.u32 1, %s7077_s18  }
 0x2b1   : > { %s5952_s6 = scalar_lea.sflag [#allocation4], %s5951_s30 }
 0x2b2   : > { %p6930_p0 = pnand %p6933_p13, %p7164_p6 }
 0x2b4   : > { %p6931_p1 = pneg %p6930_p0 }
 0x2b6   : > { %7072 = dma.done.wait (%p6931_p1), %s5952_s6, 32  }
 0x2b7   : > { %7074 = vsyncadd (%p6931_p1), %s5952_s6, 4294967264  ;;  %p16_p2 = scmp.ge.s32.totalorder %s7147_s22, 4   ;;  %s10359_s18 = smov %s7081_s19 }
 0x2b8   : > { %s10360_s19 = smov %s7085_s20  ;;  %s10361_s20 = smov %s7158_s25 }
 0x2b9   : > { %s10362_s1 = smov %s7147_s22  ;;  %18 = sbr.rel (!%p16_p2) target bundleno = 3 (0x3), region = 94 }
 0x2be   :  { %5957 = vsyncpa [#allocation4], 1 }
 0x2bf   :  { %5959 = vsyncpa [#allocation4 + $0x1], 1 }

</bundles_post_ra>
